<compile_context>
chip_gen: v6e
topology: v6e:2x2x1
jax: 0.10.0
libtpu: 0.0.40
codegen_flags: <defaults>
</compile_context>

<pallas_src>
import functools

import jax
import jax.numpy as jnp
from jax.experimental import pallas as pl
from jax.experimental.pallas import tpu as pltpu


def _round_up(n, m):
    return ((n + m - 1) // m) * m


# 48 MiB: far above the ~6 MiB worst-case pipelined footprint of these tiles
# and below v7x's 64 MiB physical VMEM; v5e/v6e (128 MiB) have headroom.
_VMEM_LIMIT = 48 * 1024 * 1024


# -----------------------------------------------------------------------------
# Pallas kernel: im2col-GEMM with fused prologue/epilogue
# -----------------------------------------------------------------------------
def conv_gemm_kernel(a_ref, b_ref, kscale_ref, kshift_ref, bias_ref,
                     *out_refs, in_prologue, out_lrelu, emit_stats,
                     m_valid, tm, tn):
    """acc += prologue(A) @ B over the K grid axis (f32 VMEM scratch).

    Prologue (static flag): per-K-column affine (previous layer's folded
    BatchNorm) + LeakyReLU(0.2), with padded-row masking so the fused batch
    statistics of this layer only see real rows.

    Epilogue at the last K step: either (bias + optional LeakyReLU) or
    per-channel sum / sum-of-squares packed into one (8, tn) stats block
    (row 0 = sum, row 1 = ssq).  Output is cast to out_ref.dtype (bf16 for
    intermediate activations, f32 for the final layer).
    """
    if emit_stats:
        out_ref, stats_ref, acc_ref = out_refs
    else:
        out_ref, acc_ref = out_refs
        stats_ref = None

    k = pl.program_id(2)

    @pl.when(k == 0)
    def _():
        acc_ref[...] = jnp.zeros_like(acc_ref)

    a = a_ref[...]
    if in_prologue:
        af = a.astype(jnp.float32) * kscale_ref[...] + kshift_ref[...]
        af = jnp.where(af > 0, af, 0.2 * af)
        if emit_stats and (m_valid % tm != 0):
            # Mask zero-padded M rows (they became nonzero after the shift)
            # so this layer's fused batch statistics stay exact.
            row = (jax.lax.broadcasted_iota(jnp.int32, (tm, 1), 0)
                   + pl.program_id(0) * tm)
            af = jnp.where(row < m_valid, af, 0.0)
        a = af.astype(jnp.bfloat16)

    acc_ref[...] += jnp.dot(a, b_ref[...], preferred_element_type=jnp.float32)

    @pl.when(k == pl.num_programs(2) - 1)
    def _():
        z = acc_ref[...]
        if emit_stats:
            s = jnp.sum(z, axis=0, keepdims=True)          # (1, tn)
            sq = jnp.sum(z * z, axis=0, keepdims=True)     # (1, tn)
            rows = jax.lax.broadcasted_iota(jnp.int32, (8, tn), 0)
            stats_ref[...] = jnp.where(rows == 0, s,
                                       jnp.where(rows == 1, sq, 0.0))
        else:
            z = z + bias_ref[...]
            if out_lrelu:
                z = jnp.where(z > 0, z, 0.2 * z)
        out_ref[...] = z.astype(out_ref.dtype)


def pallas_conv_gemm(a, b, kscale, kshift, bias, *, tm, tn, tk,
                     in_prologue, out_lrelu, emit_stats, out_dtype, m_valid):
    Mp, Kp = a.shape
    _, Np = b.shape
    assert Mp % tm == 0 and Np % tn == 0 and Kp % tk == 0
    m_tiles, n_tiles, k_tiles = Mp // tm, Np // tn, Kp // tk

    kernel = functools.partial(
        conv_gemm_kernel, in_prologue=in_prologue, out_lrelu=out_lrelu,
        emit_stats=emit_stats, m_valid=m_valid, tm=tm, tn=tn)

    out_shape = jax.ShapeDtypeStruct((Mp, Np), out_dtype)
    out_spec = pl.BlockSpec((tm, tn), lambda i, j, k: (i, j))
    if emit_stats:
        out_shape = (out_shape,
                     jax.ShapeDtypeStruct((m_tiles * 8, Np), jnp.float32))
        out_spec = (out_spec, pl.BlockSpec((8, tn), lambda i, j, k: (i, j)))

    return pl.pallas_call(
        kernel,
        out_shape=out_shape,
        grid_spec=pltpu.PrefetchScalarGridSpec(
            num_scalar_prefetch=0,
            grid=(m_tiles, n_tiles, k_tiles),
            in_specs=[
                pl.BlockSpec((tm, tk), lambda i, j, k: (i, k)),
                pl.BlockSpec((tk, tn), lambda i, j, k: (k, j)),
                pl.BlockSpec((1, tk), lambda i, j, k: (0, k)),
                pl.BlockSpec((1, tk), lambda i, j, k: (0, k)),
                pl.BlockSpec((1, tn), lambda i, j, k: (0, j)),
            ],
            out_specs=out_spec,
            scratch_shapes=[pltpu.VMEM((tm, tn), jnp.float32)],
        ),
        compiler_params=pltpu.CompilerParams(
            dimension_semantics=("parallel", "parallel", "arbitrary"),
            vmem_limit_bytes=_VMEM_LIMIT),
    )(a, b, kscale, kshift, bias)


# -----------------------------------------------------------------------------
# Glue: reflect pad + im2col, tile picker, layer driver
# -----------------------------------------------------------------------------
def _im2col_4x4(x_nhwc, stride):
    """Reflect-pad by 1, extract 4x4 patches. Returns (patches, (N,Ho,Wo)).

    Matches PyTorch Conv2d(padding=1, padding_mode='reflect').  Runs on bf16
    activations so the materialized patch matrix is half the previous size.
    """
    # TODO(synk): gather the 16 taps inside the matmul kernel (16 accumulated
    # Cin->Cout matmuls over shifted windows) instead of materializing the
    # patch matrix in HBM; that would cut the remaining A-side traffic another
    # 4-16x on the stride-1 layers.
    xp = jnp.pad(x_nhwc, ((0, 0), (1, 1), (1, 1), (0, 0)), mode="reflect")
    n, h, w, c = xp.shape
    k = 4
    ho = (h - k) // stride + 1
    wo = (w - k) // stride + 1
    cols = []
    for i in range(k):
        for j in range(k):
            cols.append(xp[:, i:i + stride * (ho - 1) + 1:stride,
                              j:j + stride * (wo - 1) + 1:stride, :])
    p = jnp.stack(cols, axis=3)                     # (N, Ho, Wo, 16, C)
    return p.reshape(n * ho * wo, k * k * c), (n, ho, wo)


def _pick_tiles(m, cout, kdim):
    # K: pad to 256 and use the largest tile (up to 1024) that divides it —
    # fewer grid steps and fewer accumulator read-modify-writes per MXU FLOP.
    Kp = _round_up(kdim, 256)
    if Kp % 1024 == 0:
        tk = 1024
    elif Kp % 512 == 0:
        tk = 512
    else:
        tk = 256
    tn = 128                     # also right for v5e's 128-wide MXU
    Np = _round_up(cout, tn)
    tm = min(1024, _round_up(m, 16))
    Mp = _round_up(m, tm)
    # v7x has two TensorCores: make sure at least one "parallel" grid axis
    # has >= 2 tiles when the problem is big enough to split.
    if (Mp // tm) * (Np // tn) < 2 and m > 16:
        tm = _round_up((m + 1) // 2, 16)
        Mp = _round_up(m, tm)
    return tm, tn, tk, Mp, Np, Kp


def conv_layer(x_nhwc, weight, *, stride, bias=None, gamma=None, beta=None,
               in_affine=None, out_lrelu=False, out_dtype=jnp.bfloat16):
    """One 4x4 reflect-padded conv as im2col + fused Pallas GEMM.

    If gamma/beta are given (BatchNorm layer), the kernel also emits fused
    per-channel sum / sum-of-squares and this function returns
    (raw_activation, (bn_scale, bn_shift)); the BN affine + LeakyReLU are then
    applied in the *next* layer's A-tile prologue via `in_affine`, avoiding a
    separate elementwise pass over HBM.
    """
    emit_stats = gamma is not None
    cout, cin = weight.shape[0], weight.shape[1]

    patches, (n, ho, wo) = _im2col_4x4(x_nhwc.astype(jnp.bfloat16), stride)
    m, kdim = patches.shape
    assert kdim == 16 * cin
    tm, tn, tk, Mp, Np, Kp = _pick_tiles(m, cout, kdim)

    a = jnp.pad(patches, ((0, Mp - m), (0, Kp - kdim)))              # bf16
    wmat = jnp.transpose(weight, (2, 3, 1, 0)).reshape(kdim, cout)   # tap-major
    b = jnp.pad(wmat, ((0, Kp - kdim), (0, Np - cout))).astype(jnp.bfloat16)

    if in_affine is not None:
        sc, sh = in_affine       # per-channel of the previous layer
        kscale = jnp.pad(jnp.tile(sc, 16), (0, Kp - kdim)).reshape(1, Kp)
        kshift = jnp.pad(jnp.tile(sh, 16), (0, Kp - kdim)).reshape(1, Kp)
    else:
        kscale = jnp.zeros((1, Kp), jnp.float32)
        kshift = jnp.zeros((1, Kp), jnp.float32)

    bias_p = jnp.zeros((1, Np), jnp.float32)
    if bias is not None:
        bias_p = bias_p.at[0, :cout].set(bias)

    res = pallas_conv_gemm(
        a, b, kscale.astype(jnp.float32), kshift.astype(jnp.float32), bias_p,
        tm=tm, tn=tn, tk=tk, in_prologue=in_affine is not None,
        out_lrelu=out_lrelu, emit_stats=emit_stats, out_dtype=out_dtype,
        m_valid=m)

    if emit_stats:
        zp, stats = res
        mt = stats.shape[0] // 8
        st = stats.reshape(mt, 8, Np)
        s = st[:, 0, :cout].sum(axis=0)
        sq = st[:, 1, :cout].sum(axis=0)
        mean = s / m
        var = jnp.maximum(sq / m - mean * mean, 0.0)    # biased, like PyTorch
        bn_scale = gamma * jax.lax.rsqrt(var + 1e-5)
        bn_shift = beta - mean * bn_scale
        out = zp[:m, :cout].reshape(n, ho, wo, cout)
        return out, (bn_scale, bn_shift)

    zp = res
    return zp[:m, :cout].reshape(n, ho, wo, cout)


# -----------------------------------------------------------------------------
# Parameters (deterministic, in-script) and forward pass
# -----------------------------------------------------------------------------
def init_params(key, in_channels=9, features=64):
    ks = jax.random.split(key, 8)
    f = features
    p = {}
    p["w1"] = 0.02 * jax.random.normal(ks[0], (f, in_channels, 4, 4), jnp.float32)
    p["b1"] = jnp.zeros((f,), jnp.float32)
    p["w2"] = 0.02 * jax.random.normal(ks[1], (2 * f, f, 4, 4), jnp.float32)
    p["g2"], p["be2"] = jnp.ones((2 * f,), jnp.float32), jnp.zeros((2 * f,), jnp.float32)
    p["w3"] = 0.02 * jax.random.normal(ks[2], (4 * f, 2 * f, 4, 4), jnp.float32)
    p["g3"], p["be3"] = jnp.ones((4 * f,), jnp.float32), jnp.zeros((4 * f,), jnp.float32)
    p["w4"] = 0.02 * jax.random.normal(ks[3], (8 * f, 4 * f, 4, 4), jnp.float32)
    p["g4"], p["be4"] = jnp.ones((8 * f,), jnp.float32), jnp.zeros((8 * f,), jnp.float32)
    p["w5"] = 0.02 * jax.random.normal(ks[4], (1, 8 * f, 4, 4), jnp.float32)
    p["b5"] = jnp.zeros((1,), jnp.float32)
    return p


def patchgan_forward(x, y, p):
    # x, y are NCHW (PyTorch); convert to NHWC bf16 for the TPU path,
    # output back to NCHW f32 = (N, 1, H', W').
    combined = jnp.concatenate([x, y], axis=1)                 # (N, 9, H, W)
    h = jnp.transpose(combined, (0, 2, 3, 1)).astype(jnp.bfloat16)

    # initial: Conv + bias + LeakyReLU (fused epilogue), bf16 activation out.
    h = conv_layer(h, p["w1"], stride=2, bias=p["b1"], out_lrelu=True)
    # down1/down2/down3: Conv(no bias) + BatchNorm + LeakyReLU.  Each layer
    # writes its raw conv output (bf16) + fused batch statistics; the BN
    # affine + LeakyReLU are applied in the next layer's A-tile prologue.
    h, aff = conv_layer(h, p["w2"], stride=2, gamma=p["g2"], beta=p["be2"])
    h, aff = conv_layer(h, p["w3"], stride=2, gamma=p["g3"], beta=p["be3"],
                        in_affine=aff)
    h, aff = conv_layer(h, p["w4"], stride=1, gamma=p["g4"], beta=p["be4"],
                        in_affine=aff)
    # output: previous BN + LeakyReLU via prologue, Conv + bias, no activation.
    h = conv_layer(h, p["w5"], stride=1, bias=p["b5"], in_affine=aff,
                   out_lrelu=False, out_dtype=jnp.float32)

    return jnp.transpose(h, (0, 3, 1, 2))                      # NCHW


if __name__ == "__main__":
    key = jax.random.PRNGKey(0)
    kx, ky, kp = jax.random.split(key, 3)

    # small shapes consistent with the module: in_channels = 6 + 3 = 9
    x = jax.random.normal(kx, (2, 6, 32, 32), jnp.float32)
    y = jax.random.normal(ky, (2, 3, 32, 32), jnp.float32)
    params = init_params(kp)

    fwd = jax.jit(patchgan_forward)
    out = fwd(x, y, params)
    jax.block_until_ready(out)

    assert out.shape == (2, 1, 2, 2), out.shape
    assert out.dtype == jnp.float32
    print("KERNEL_OK")
</pallas_src>

<mosaic_0001>
module attributes {stable_mosaic.version = 11 : i64} {
  func.func @conv_gemm_kernel(%arg0: i32, %arg1: i32, %arg2: i32, %arg3: memref<256x256xbf16, #tpu.memory_space<vmem>>, %arg4: memref<256x128xbf16, #tpu.memory_space<vmem>>, %arg5: memref<1x256xf32, #tpu.memory_space<vmem>>, %arg6: memref<1x256xf32, #tpu.memory_space<vmem>>, %arg7: memref<1x128xf32, #tpu.memory_space<vmem>>, %arg8: memref<256x128xbf16, #tpu.memory_space<vmem>>, %arg9: memref<256x128xf32, #tpu.memory_space<vmem>>) attributes {dimension_semantics = [#tpu.dimension_semantics<parallel>, #tpu.dimension_semantics<parallel>, #tpu.dimension_semantics<arbitrary>], iteration_bounds = array<i64: 2, 1, 1>, scalar_prefetch = 0 : i64, scratch_operands = 1 : i64, tpu.core_type = #tpu.core_type<tc>, window_params = [{transform_indices = @transform_0, window_bounds = array<i64: 256, 256>}, {transform_indices = @transform_1, window_bounds = array<i64: 256, 128>}, {transform_indices = @transform_2, window_bounds = array<i64: 1, 256>}, {transform_indices = @transform_3, window_bounds = array<i64: 1, 256>}, {transform_indices = @transform_4, window_bounds = array<i64: 1, 128>}, {transform_indices = @transform_5, window_bounds = array<i64: 256, 128>}]} {
    %c0_i32 = arith.constant 0 : i32
    %0 = arith.cmpi eq, %arg2, %c0_i32 : i32
    %1 = arith.extui %0 : i1 to i32
    %c0_i32_0 = arith.constant 0 : i32
    %2 = arith.cmpi ne, %1, %c0_i32_0 : i32
    scf.if %2 {
      %cst_10 = arith.constant 0.000000e+00 : f32
      %12 = vector.broadcast %cst_10 : f32 to vector<256x128xf32>
      %c0_11 = arith.constant 0 : index
      %c0_12 = arith.constant 0 : index
      %13 = vector.load %arg9[%c0_11, %c0_12] : memref<256x128xf32, #tpu.memory_space<vmem>>, vector<256x128xf32>
      tpu.vector_store %arg9[%c0_11, %c0_12], %12 {strides = array<i32>} : memref<256x128xf32, #tpu.memory_space<vmem>>, vector<256x128xf32>,
    } else {
    }
    %c0 = arith.constant 0 : index
    %c0_1 = arith.constant 0 : index
    %3 = vector.load %arg3[%c0, %c0_1] : memref<256x256xbf16, #tpu.memory_space<vmem>>, vector<256x256xbf16>
    %c0_2 = arith.constant 0 : index
    %c0_3 = arith.constant 0 : index
    %4 = vector.load %arg9[%c0_2, %c0_3] : memref<256x128xf32, #tpu.memory_space<vmem>>, vector<256x128xf32>
    %c0_4 = arith.constant 0 : index
    %c0_5 = arith.constant 0 : index
    %5 = vector.load %arg4[%c0_4, %c0_5] : memref<256x128xbf16, #tpu.memory_space<vmem>>, vector<256x128xbf16>
    %cst = arith.constant dense<0.000000e+00> : vector<256x128xf32>
    %6 = tpu.matmul %3, %5, %cst {dimension_numbers = #tpu.dot_dimension_numbers<[1], [0], [0], [1], [0, 0, 1, 1], [], []>} : vector<256x256xbf16>, vector<256x128xbf16>, vector<256x128xf32> -> vector<256x128xf32>
    %7 = arith.addf %4, %6 : vector<256x128xf32>
    %c0_6 = arith.constant 0 : index
    %c0_7 = arith.constant 0 : index
    %8 = vector.load %arg9[%c0_6, %c0_7] : memref<256x128xf32, #tpu.memory_space<vmem>>, vector<256x128xf32>
    tpu.vector_store %arg9[%c0_6, %c0_7], %7 {strides = array<i32>} : memref<256x128xf32, #tpu.memory_space<vmem>>, vector<256x128xf32>,
    %c0_i32_8 = arith.constant 0 : i32
    %9 = arith.cmpi eq, %arg2, %c0_i32_8 : i32
    %10 = arith.extui %9 : i1 to i32
    %c0_i32_9 = arith.constant 0 : i32
    %11 = arith.cmpi ne, %10, %c0_i32_9 : i32
    scf.if %11 {
      %c0_10 = arith.constant 0 : index
      %c0_11 = arith.constant 0 : index
      %12 = vector.load %arg9[%c0_10, %c0_11] : memref<256x128xf32, #tpu.memory_space<vmem>>, vector<256x128xf32>
      %c0_12 = arith.constant 0 : index
      %c0_13 = arith.constant 0 : index
      %13 = vector.load %arg7[%c0_12, %c0_13] : memref<1x128xf32, #tpu.memory_space<vmem>>, vector<1x128xf32>
      %14 = vector.broadcast %13 : vector<1x128xf32> to vector<256x128xf32>
      %15 = arith.addf %12, %14 : vector<256x128xf32>
      %cst_14 = arith.constant 0.000000e+00 : f32
      %16 = vector.broadcast %cst_14 : f32 to vector<256x128xf32>
      %17 = arith.cmpf ogt, %15, %16 : vector<256x128xf32>
      %cst_15 = arith.constant 2.000000e-01 : f32
      %18 = vector.broadcast %cst_15 : f32 to vector<256x128xf32>
      %19 = arith.mulf %18, %15 : vector<256x128xf32>
      %20 = arith.select %17, %15, %19 : vector<256x128xi1>, vector<256x128xf32>
      %21 = arith.truncf %20 : vector<256x128xf32> to vector<256x128xbf16>
      %c0_16 = arith.constant 0 : index
      %c0_17 = arith.constant 0 : index
      %22 = vector.load %arg8[%c0_16, %c0_17] : memref<256x128xbf16, #tpu.memory_space<vmem>>, vector<256x128xbf16>
      tpu.vector_store %arg8[%c0_16, %c0_17], %21 {strides = array<i32>} : memref<256x128xbf16, #tpu.memory_space<vmem>>, vector<256x128xbf16>,
    } else {
    }
    return
  }
  func.func @transform_0(%arg0: i32, %arg1: i32, %arg2: i32) -> (i32, i32) {
    %c0_i32 = arith.constant 0 : i32
    return %arg0, %arg2 : i32, i32
  }
  func.func @transform_1(%arg0: i32, %arg1: i32, %arg2: i32) -> (i32, i32) {
    %c0_i32 = arith.constant 0 : i32
    return %arg2, %arg1 : i32, i32
  }
  func.func @transform_2(%arg0: i32, %arg1: i32, %arg2: i32) -> (i32, i32) {
    %c0_i32 = arith.constant 0 : i32
    %c0_i32_0 = arith.constant 0 : i32
    return %c0_i32, %arg2 : i32, i32
  }
  func.func @transform_3(%arg0: i32, %arg1: i32, %arg2: i32) -> (i32, i32) {
    %c0_i32 = arith.constant 0 : i32
    %c0_i32_0 = arith.constant 0 : i32
    return %c0_i32, %arg2 : i32, i32
  }
  func.func @transform_4(%arg0: i32, %arg1: i32, %arg2: i32) -> (i32, i32) {
    %c0_i32 = arith.constant 0 : i32
    %c0_i32_0 = arith.constant 0 : i32
    return %c0_i32, %arg1 : i32, i32
  }
  func.func @transform_5(%arg0: i32, %arg1: i32, %arg2: i32) -> (i32, i32) {
    %c0_i32 = arith.constant 0 : i32
    return %arg0, %arg1 : i32, i32
  }
}

module attributes {stable_mosaic.version = 11 : i64} {
  func.func @conv_gemm_kernel(%arg0: i32, %arg1: i32, %arg2: i32, %arg3: memref<64x1024xbf16, #tpu.memory_space<vmem>>, %arg4: memref<1024x128xbf16, #tpu.memory_space<vmem>>, %arg5: memref<1x1024xf32, #tpu.memory_space<vmem>>, %arg6: memref<1x1024xf32, #tpu.memory_space<vmem>>, %arg7: memref<1x128xf32, #tpu.memory_space<vmem>>, %arg8: memref<64x128xbf16, #tpu.memory_space<vmem>>, %arg9: memref<8x128xf32, #tpu.memory_space<vmem>>, %arg10: memref<64x128xf32, #tpu.memory_space<vmem>>) attributes {dimension_semantics = [#tpu.dimension_semantics<parallel>, #tpu.dimension_semantics<parallel>, #tpu.dimension_semantics<arbitrary>], iteration_bounds = array<i64: 2, 1, 1>, scalar_prefetch = 0 : i64, scratch_operands = 1 : i64, tpu.core_type = #tpu.core_type<tc>, window_params = [{transform_indices = @transform_0, window_bounds = array<i64: 64, 1024>}, {transform_indices = @transform_1, window_bounds = array<i64: 1024, 128>}, {transform_indices = @transform_2, window_bounds = array<i64: 1, 1024>}, {transform_indices = @transform_3, window_bounds = array<i64: 1, 1024>}, {transform_indices = @transform_4, window_bounds = array<i64: 1, 128>}, {transform_indices = @transform_5, window_bounds = array<i64: 64, 128>}, {transform_indices = @transform_6, window_bounds = array<i64: 8, 128>}]} {
    %c0_i32 = arith.constant 0 : i32
    %0 = arith.cmpi eq, %arg2, %c0_i32 : i32
    %1 = arith.extui %0 : i1 to i32
    %c0_i32_0 = arith.constant 0 : i32
    %2 = arith.cmpi ne, %1, %c0_i32_0 : i32
    scf.if %2 {
      %cst_10 = arith.constant 0.000000e+00 : f32
      %12 = vector.broadcast %cst_10 : f32 to vector<64x128xf32>
      %c0_11 = arith.constant 0 : index
      %c0_12 = arith.constant 0 : index
      %13 = vector.load %arg10[%c0_11, %c0_12] : memref<64x128xf32, #tpu.memory_space<vmem>>, vector<64x128xf32>
      tpu.vector_store %arg10[%c0_11, %c0_12], %12 {strides = array<i32>} : memref<64x128xf32, #tpu.memory_space<vmem>>, vector<64x128xf32>,
    } else {
    }
    %c0 = arith.constant 0 : index
    %c0_1 = arith.constant 0 : index
    %3 = vector.load %arg3[%c0, %c0_1] : memref<64x1024xbf16, #tpu.memory_space<vmem>>, vector<64x1024xbf16>
    %c0_2 = arith.constant 0 : index
    %c0_3 = arith.constant 0 : index
    %4 = vector.load %arg10[%c0_2, %c0_3] : memref<64x128xf32, #tpu.memory_space<vmem>>, vector<64x128xf32>
    %c0_4 = arith.constant 0 : index
    %c0_5 = arith.constant 0 : index
    %5 = vector.load %arg4[%c0_4, %c0_5] : memref<1024x128xbf16, #tpu.memory_space<vmem>>, vector<1024x128xbf16>
    %cst = arith.constant dense<0.000000e+00> : vector<64x128xf32>
    %6 = tpu.matmul %3, %5, %cst {dimension_numbers = #tpu.dot_dimension_numbers<[1], [0], [0], [1], [0, 0, 1, 1], [], []>} : vector<64x1024xbf16>, vector<1024x128xbf16>, vector<64x128xf32> -> vector<64x128xf32>
    %7 = arith.addf %4, %6 : vector<64x128xf32>
    %c0_6 = arith.constant 0 : index
    %c0_7 = arith.constant 0 : index
    %8 = vector.load %arg10[%c0_6, %c0_7] : memref<64x128xf32, #tpu.memory_space<vmem>>, vector<64x128xf32>
    tpu.vector_store %arg10[%c0_6, %c0_7], %7 {strides = array<i32>} : memref<64x128xf32, #tpu.memory_space<vmem>>, vector<64x128xf32>,
    %c0_i32_8 = arith.constant 0 : i32
    %9 = arith.cmpi eq, %arg2, %c0_i32_8 : i32
    %10 = arith.extui %9 : i1 to i32
    %c0_i32_9 = arith.constant 0 : i32
    %11 = arith.cmpi ne, %10, %c0_i32_9 : i32
    scf.if %11 {
      %c0_10 = arith.constant 0 : index
      %c0_11 = arith.constant 0 : index
      %12 = vector.load %arg10[%c0_10, %c0_11] : memref<64x128xf32, #tpu.memory_space<vmem>>, vector<64x128xf32>
      %cst_12 = arith.constant dense<0.000000e+00> : vector<128xf32>
      %13 = vector.multi_reduction <add>, %12, %cst_12 [0] : vector<64x128xf32> to vector<128xf32>
      %14 = vector.shape_cast %13 : vector<128xf32> to vector<1x128xf32>
      %15 = arith.mulf %12, %12 : vector<64x128xf32>
      %cst_13 = arith.constant dense<0.000000e+00> : vector<128xf32>
      %16 = vector.multi_reduction <add>, %15, %cst_13 [0] : vector<64x128xf32> to vector<128xf32>
      %17 = vector.shape_cast %16 : vector<128xf32> to vector<1x128xf32>
      %18 = tpu.iota {dimensions = array<i32: 0>} : vector<8x128xi32>
      %c0_i32_14 = arith.constant 0 : i32
      %19 = vector.broadcast %c0_i32_14 : i32 to vector<8x128xi32>
      %20 = arith.cmpi eq, %18, %19 : vector<8x128xi32>
      %c1_i32 = arith.constant 1 : i32
      %21 = vector.broadcast %c1_i32 : i32 to vector<8x128xi32>
      %22 = arith.cmpi eq, %18, %21 : vector<8x128xi32>
      %cst_15 = arith.constant 0.000000e+00 : f32
      %23 = vector.shape_cast %17 : vector<1x128xf32> to vector<1x128xf32>
      %24 = vector.broadcast %23 : vector<1x128xf32> to vector<8x128xf32>
      %25 = vector.broadcast %cst_15 : f32 to vector<8x128xf32>
      %26 = arith.select %22, %24, %25 : vector<8x128xi1>, vector<8x128xf32>
      %27 = vector.shape_cast %14 : vector<1x128xf32> to vector<1x128xf32>
      %28 = vector.broadcast %27 : vector<1x128xf32> to vector<8x128xf32>
      %29 = arith.select %20, %28, %26 : vector<8x128xi1>, vector<8x128xf32>
      %c0_16 = arith.constant 0 : index
      %c0_17 = arith.constant 0 : index
      %30 = vector.load %arg9[%c0_16, %c0_17] : memref<8x128xf32, #tpu.memory_space<vmem>>, vector<8x128xf32>
      tpu.vector_store %arg9[%c0_16, %c0_17], %29 {strides = array<i32>} : memref<8x128xf32, #tpu.memory_space<vmem>>, vector<8x128xf32>,
      %31 = arith.truncf %12 : vector<64x128xf32> to vector<64x128xbf16>
      %c0_18 = arith.constant 0 : index
      %c0_19 = arith.constant 0 : index
      %32 = vector.load %arg8[%c0_18, %c0_19] : memref<64x128xbf16, #tpu.memory_space<vmem>>, vector<64x128xbf16>
      tpu.vector_store %arg8[%c0_18, %c0_19], %31 {strides = array<i32>} : memref<64x128xbf16, #tpu.memory_space<vmem>>, vector<64x128xbf16>,
    } else {
    }
    return
  }
  func.func @transform_0(%arg0: i32, %arg1: i32, %arg2: i32) -> (i32, i32) {
    %c0_i32 = arith.constant 0 : i32
    return %arg0, %arg2 : i32, i32
  }
  func.func @transform_1(%arg0: i32, %arg1: i32, %arg2: i32) -> (i32, i32) {
    %c0_i32 = arith.constant 0 : i32
    return %arg2, %arg1 : i32, i32
  }
  func.func @transform_2(%arg0: i32, %arg1: i32, %arg2: i32) -> (i32, i32) {
    %c0_i32 = arith.constant 0 : i32
    %c0_i32_0 = arith.constant 0 : i32
    return %c0_i32, %arg2 : i32, i32
  }
  func.func @transform_3(%arg0: i32, %arg1: i32, %arg2: i32) -> (i32, i32) {
    %c0_i32 = arith.constant 0 : i32
    %c0_i32_0 = arith.constant 0 : i32
    return %c0_i32, %arg2 : i32, i32
  }
  func.func @transform_4(%arg0: i32, %arg1: i32, %arg2: i32) -> (i32, i32) {
    %c0_i32 = arith.constant 0 : i32
    %c0_i32_0 = arith.constant 0 : i32
    return %c0_i32, %arg1 : i32, i32
  }
  func.func @transform_5(%arg0: i32, %arg1: i32, %arg2: i32) -> (i32, i32) {
    %c0_i32 = arith.constant 0 : i32
    return %arg0, %arg1 : i32, i32
  }
  func.func @transform_6(%arg0: i32, %arg1: i32, %arg2: i32) -> (i32, i32) {
    %c0_i32 = arith.constant 0 : i32
    return %arg0, %arg1 : i32, i32
  }
}

module attributes {stable_mosaic.version = 11 : i64} {
  func.func @conv_gemm_kernel(%arg0: i32, %arg1: i32, %arg2: i32, %arg3: memref<32x1024xbf16, #tpu.memory_space<vmem>>, %arg4: memref<1024x128xbf16, #tpu.memory_space<vmem>>, %arg5: memref<1x1024xf32, #tpu.memory_space<vmem>>, %arg6: memref<1x1024xf32, #tpu.memory_space<vmem>>, %arg7: memref<1x128xf32, #tpu.memory_space<vmem>>, %arg8: memref<32x128xbf16, #tpu.memory_space<vmem>>, %arg9: memref<8x128xf32, #tpu.memory_space<vmem>>, %arg10: memref<32x128xf32, #tpu.memory_space<vmem>>) attributes {dimension_semantics = [#tpu.dimension_semantics<parallel>, #tpu.dimension_semantics<parallel>, #tpu.dimension_semantics<arbitrary>], iteration_bounds = array<i64: 1, 2, 2>, scalar_prefetch = 0 : i64, scratch_operands = 1 : i64, tpu.core_type = #tpu.core_type<tc>, window_params = [{transform_indices = @transform_0, window_bounds = array<i64: 32, 1024>}, {transform_indices = @transform_1, window_bounds = array<i64: 1024, 128>}, {transform_indices = @transform_2, window_bounds = array<i64: 1, 1024>}, {transform_indices = @transform_3, window_bounds = array<i64: 1, 1024>}, {transform_indices = @transform_4, window_bounds = array<i64: 1, 128>}, {transform_indices = @transform_5, window_bounds = array<i64: 32, 128>}, {transform_indices = @transform_6, window_bounds = array<i64: 8, 128>}]} {
    %c0_i32 = arith.constant 0 : i32
    %0 = arith.cmpi eq, %arg2, %c0_i32 : i32
    %1 = arith.extui %0 : i1 to i32
    %c0_i32_0 = arith.constant 0 : i32
    %2 = arith.cmpi ne, %1, %c0_i32_0 : i32
    scf.if %2 {
      %cst_15 = arith.constant 0.000000e+00 : f32
      %25 = vector.broadcast %cst_15 : f32 to vector<32x128xf32>
      %c0_16 = arith.constant 0 : index
      %c0_17 = arith.constant 0 : index
      %26 = vector.load %arg10[%c0_16, %c0_17] : memref<32x128xf32, #tpu.memory_space<vmem>>, vector<32x128xf32>
      tpu.vector_store %arg10[%c0_16, %c0_17], %25 {strides = array<i32>} : memref<32x128xf32, #tpu.memory_space<vmem>>, vector<32x128xf32>,
    } else {
    }
    %c0 = arith.constant 0 : index
    %c0_1 = arith.constant 0 : index
    %3 = vector.load %arg3[%c0, %c0_1] : memref<32x1024xbf16, #tpu.memory_space<vmem>>, vector<32x1024xbf16>
    %4 = arith.extf %3 : vector<32x1024xbf16> to vector<32x1024xf32>
    %c0_2 = arith.constant 0 : index
    %c0_3 = arith.constant 0 : index
    %5 = vector.load %arg5[%c0_2, %c0_3] : memref<1x1024xf32, #tpu.memory_space<vmem>>, vector<1x1024xf32>
    %6 = vector.broadcast %5 : vector<1x1024xf32> to vector<32x1024xf32>
    %7 = arith.mulf %4, %6 : vector<32x1024xf32>
    %c0_4 = arith.constant 0 : index
    %c0_5 = arith.constant 0 : index
    %8 = vector.load %arg6[%c0_4, %c0_5] : memref<1x1024xf32, #tpu.memory_space<vmem>>, vector<1x1024xf32>
    %9 = vector.broadcast %8 : vector<1x1024xf32> to vector<32x1024xf32>
    %10 = arith.addf %7, %9 : vector<32x1024xf32>
    %cst = arith.constant 0.000000e+00 : f32
    %11 = vector.broadcast %cst : f32 to vector<32x1024xf32>
    %12 = arith.cmpf ogt, %10, %11 : vector<32x1024xf32>
    %cst_6 = arith.constant 2.000000e-01 : f32
    %13 = vector.broadcast %cst_6 : f32 to vector<32x1024xf32>
    %14 = arith.mulf %13, %10 : vector<32x1024xf32>
    %15 = arith.select %12, %10, %14 : vector<32x1024xi1>, vector<32x1024xf32>
    %16 = arith.truncf %15 : vector<32x1024xf32> to vector<32x1024xbf16>
    %c0_7 = arith.constant 0 : index
    %c0_8 = arith.constant 0 : index
    %17 = vector.load %arg10[%c0_7, %c0_8] : memref<32x128xf32, #tpu.memory_space<vmem>>, vector<32x128xf32>
    %c0_9 = arith.constant 0 : index
    %c0_10 = arith.constant 0 : index
    %18 = vector.load %arg4[%c0_9, %c0_10] : memref<1024x128xbf16, #tpu.memory_space<vmem>>, vector<1024x128xbf16>
    %cst_11 = arith.constant dense<0.000000e+00> : vector<32x128xf32>
    %19 = tpu.matmul %16, %18, %cst_11 {dimension_numbers = #tpu.dot_dimension_numbers<[1], [0], [0], [1], [0, 0, 1, 1], [], []>} : vector<32x1024xbf16>, vector<1024x128xbf16>, vector<32x128xf32> -> vector<32x128xf32>
    %20 = arith.addf %17, %19 : vector<32x128xf32>
    %c0_12 = arith.constant 0 : index
    %c0_13 = arith.constant 0 : index
    %21 = vector.load %arg10[%c0_12, %c0_13] : memref<32x128xf32, #tpu.memory_space<vmem>>, vector<32x128xf32>
    tpu.vector_store %arg10[%c0_12, %c0_13], %20 {strides = array<i32>} : memref<32x128xf32, #tpu.memory_space<vmem>>, vector<32x128xf32>,
    %c1_i32 = arith.constant 1 : i32
    %22 = arith.cmpi eq, %arg2, %c1_i32 : i32
    %23 = arith.extui %22 : i1 to i32
    %c0_i32_14 = arith.constant 0 : i32
    %24 = arith.cmpi ne, %23, %c0_i32_14 : i32
    scf.if %24 {
      %c0_15 = arith.constant 0 : index
      %c0_16 = arith.constant 0 : index
      %25 = vector.load %arg10[%c0_15, %c0_16] : memref<32x128xf32, #tpu.memory_space<vmem>>, vector<32x128xf32>
      %cst_17 = arith.constant dense<0.000000e+00> : vector<128xf32>
      %26 = vector.multi_reduction <add>, %25, %cst_17 [0] : vector<32x128xf32> to vector<128xf32>
      %27 = vector.shape_cast %26 : vector<128xf32> to vector<1x128xf32>
      %28 = arith.mulf %25, %25 : vector<32x128xf32>
      %cst_18 = arith.constant dense<0.000000e+00> : vector<128xf32>
      %29 = vector.multi_reduction <add>, %28, %cst_18 [0] : vector<32x128xf32> to vector<128xf32>
      %30 = vector.shape_cast %29 : vector<128xf32> to vector<1x128xf32>
      %31 = tpu.iota {dimensions = array<i32: 0>} : vector<8x128xi32>
      %c0_i32_19 = arith.constant 0 : i32
      %32 = vector.broadcast %c0_i32_19 : i32 to vector<8x128xi32>
      %33 = arith.cmpi eq, %31, %32 : vector<8x128xi32>
      %c1_i32_20 = arith.constant 1 : i32
      %34 = vector.broadcast %c1_i32_20 : i32 to vector<8x128xi32>
      %35 = arith.cmpi eq, %31, %34 : vector<8x128xi32>
      %cst_21 = arith.constant 0.000000e+00 : f32
      %36 = vector.shape_cast %30 : vector<1x128xf32> to vector<1x128xf32>
      %37 = vector.broadcast %36 : vector<1x128xf32> to vector<8x128xf32>
      %38 = vector.broadcast %cst_21 : f32 to vector<8x128xf32>
      %39 = arith.select %35, %37, %38 : vector<8x128xi1>, vector<8x128xf32>
      %40 = vector.shape_cast %27 : vector<1x128xf32> to vector<1x128xf32>
      %41 = vector.broadcast %40 : vector<1x128xf32> to vector<8x128xf32>
      %42 = arith.select %33, %41, %39 : vector<8x128xi1>, vector<8x128xf32>
      %c0_22 = arith.constant 0 : index
      %c0_23 = arith.constant 0 : index
      %43 = vector.load %arg9[%c0_22, %c0_23] : memref<8x128xf32, #tpu.memory_space<vmem>>, vector<8x128xf32>
      tpu.vector_store %arg9[%c0_22, %c0_23], %42 {strides = array<i32>} : memref<8x128xf32, #tpu.memory_space<vmem>>, vector<8x128xf32>,
      %44 = arith.truncf %25 : vector<32x128xf32> to vector<32x128xbf16>
      %c0_24 = arith.constant 0 : index
      %c0_25 = arith.constant 0 : index
      %45 = vector.load %arg8[%c0_24, %c0_25] : memref<32x128xbf16, #tpu.memory_space<vmem>>, vector<32x128xbf16>
      tpu.vector_store %arg8[%c0_24, %c0_25], %44 {strides = array<i32>} : memref<32x128xbf16, #tpu.memory_space<vmem>>, vector<32x128xbf16>,
    } else {
    }
    return
  }
  func.func @transform_0(%arg0: i32, %arg1: i32, %arg2: i32) -> (i32, i32) {
    %c0_i32 = arith.constant 0 : i32
    return %arg0, %arg2 : i32, i32
  }
  func.func @transform_1(%arg0: i32, %arg1: i32, %arg2: i32) -> (i32, i32) {
    %c0_i32 = arith.constant 0 : i32
    return %arg2, %arg1 : i32, i32
  }
  func.func @transform_2(%arg0: i32, %arg1: i32, %arg2: i32) -> (i32, i32) {
    %c0_i32 = arith.constant 0 : i32
    %c0_i32_0 = arith.constant 0 : i32
    return %c0_i32, %arg2 : i32, i32
  }
  func.func @transform_3(%arg0: i32, %arg1: i32, %arg2: i32) -> (i32, i32) {
    %c0_i32 = arith.constant 0 : i32
    %c0_i32_0 = arith.constant 0 : i32
    return %c0_i32, %arg2 : i32, i32
  }
  func.func @transform_4(%arg0: i32, %arg1: i32, %arg2: i32) -> (i32, i32) {
    %c0_i32 = arith.constant 0 : i32
    %c0_i32_0 = arith.constant 0 : i32
    return %c0_i32, %arg1 : i32, i32
  }
  func.func @transform_5(%arg0: i32, %arg1: i32, %arg2: i32) -> (i32, i32) {
    %c0_i32 = arith.constant 0 : i32
    return %arg0, %arg1 : i32, i32
  }
  func.func @transform_6(%arg0: i32, %arg1: i32, %arg2: i32) -> (i32, i32) {
    %c0_i32 = arith.constant 0 : i32
    return %arg0, %arg1 : i32, i32
  }
}

module attributes {stable_mosaic.version = 11 : i64} {
  func.func @conv_gemm_kernel(%arg0: i32, %arg1: i32, %arg2: i32, %arg3: memref<32x1024xbf16, #tpu.memory_space<vmem>>, %arg4: memref<1024x128xbf16, #tpu.memory_space<vmem>>, %arg5: memref<1x1024xf32, #tpu.memory_space<vmem>>, %arg6: memref<1x1024xf32, #tpu.memory_space<vmem>>, %arg7: memref<1x128xf32, #tpu.memory_space<vmem>>, %arg8: memref<32x128xbf16, #tpu.memory_space<vmem>>, %arg9: memref<8x128xf32, #tpu.memory_space<vmem>>, %arg10: memref<32x128xf32, #tpu.memory_space<vmem>>) attributes {dimension_semantics = [#tpu.dimension_semantics<parallel>, #tpu.dimension_semantics<parallel>, #tpu.dimension_semantics<arbitrary>], iteration_bounds = array<i64: 1, 4, 4>, scalar_prefetch = 0 : i64, scratch_operands = 1 : i64, tpu.core_type = #tpu.core_type<tc>, window_params = [{transform_indices = @transform_0, window_bounds = array<i64: 32, 1024>}, {transform_indices = @transform_1, window_bounds = array<i64: 1024, 128>}, {transform_indices = @transform_2, window_bounds = array<i64: 1, 1024>}, {transform_indices = @transform_3, window_bounds = array<i64: 1, 1024>}, {transform_indices = @transform_4, window_bounds = array<i64: 1, 128>}, {transform_indices = @transform_5, window_bounds = array<i64: 32, 128>}, {transform_indices = @transform_6, window_bounds = array<i64: 8, 128>}]} {
    %c0_i32 = arith.constant 0 : i32
    %0 = arith.cmpi eq, %arg2, %c0_i32 : i32
    %1 = arith.extui %0 : i1 to i32
    %c0_i32_0 = arith.constant 0 : i32
    %2 = arith.cmpi ne, %1, %c0_i32_0 : i32
    scf.if %2 {
      %cst_16 = arith.constant 0.000000e+00 : f32
      %35 = vector.broadcast %cst_16 : f32 to vector<32x128xf32>
      %c0_17 = arith.constant 0 : index
      %c0_18 = arith.constant 0 : index
      %36 = vector.load %arg10[%c0_17, %c0_18] : memref<32x128xf32, #tpu.memory_space<vmem>>, vector<32x128xf32>
      tpu.vector_store %arg10[%c0_17, %c0_18], %35 {strides = array<i32>} : memref<32x128xf32, #tpu.memory_space<vmem>>, vector<32x128xf32>,
    } else {
    }
    %c0 = arith.constant 0 : index
    %c0_1 = arith.constant 0 : index
    %3 = vector.load %arg3[%c0, %c0_1] : memref<32x1024xbf16, #tpu.memory_space<vmem>>, vector<32x1024xbf16>
    %4 = arith.extf %3 : vector<32x1024xbf16> to vector<32x1024xf32>
    %c0_2 = arith.constant 0 : index
    %c0_3 = arith.constant 0 : index
    %5 = vector.load %arg5[%c0_2, %c0_3] : memref<1x1024xf32, #tpu.memory_space<vmem>>, vector<1x1024xf32>
    %6 = vector.broadcast %5 : vector<1x1024xf32> to vector<32x1024xf32>
    %7 = arith.mulf %4, %6 : vector<32x1024xf32>
    %c0_4 = arith.constant 0 : index
    %c0_5 = arith.constant 0 : index
    %8 = vector.load %arg6[%c0_4, %c0_5] : memref<1x1024xf32, #tpu.memory_space<vmem>>, vector<1x1024xf32>
    %9 = vector.broadcast %8 : vector<1x1024xf32> to vector<32x1024xf32>
    %10 = arith.addf %7, %9 : vector<32x1024xf32>
    %cst = arith.constant 0.000000e+00 : f32
    %11 = vector.broadcast %cst : f32 to vector<32x1024xf32>
    %12 = arith.cmpf ogt, %10, %11 : vector<32x1024xf32>
    %cst_6 = arith.constant 2.000000e-01 : f32
    %13 = vector.broadcast %cst_6 : f32 to vector<32x1024xf32>
    %14 = arith.mulf %13, %10 : vector<32x1024xf32>
    %15 = arith.select %12, %10, %14 : vector<32x1024xi1>, vector<32x1024xf32>
    %16 = tpu.iota {dimensions = array<i32: 0>} : vector<32x1xi32>
    %c32_i32 = arith.constant 32 : i32
    %17 = arith.muli %arg0, %c32_i32 : i32
    %18 = vector.broadcast %17 : i32 to vector<32x1xi32>
    %19 = arith.addi %16, %18 : vector<32x1xi32>
    %c18_i32 = arith.constant 18 : i32
    %20 = vector.broadcast %c18_i32 : i32 to vector<32x1xi32>
    %21 = arith.cmpi slt, %19, %20 : vector<32x1xi32>
    %cst_7 = arith.constant 0.000000e+00 : f32
    %22 = vector.shape_cast %21 : vector<32x1xi1> to vector<32x1xi1>
    %23 = vector.broadcast %22 : vector<32x1xi1> to vector<32x1024xi1>
    %24 = vector.broadcast %cst_7 : f32 to vector<32x1024xf32>
    %25 = arith.select %23, %15, %24 : vector<32x1024xi1>, vector<32x1024xf32>
    %26 = arith.truncf %25 : vector<32x1024xf32> to vector<32x1024xbf16>
    %c0_8 = arith.constant 0 : index
    %c0_9 = arith.constant 0 : index
    %27 = vector.load %arg10[%c0_8, %c0_9] : memref<32x128xf32, #tpu.memory_space<vmem>>, vector<32x128xf32>
    %c0_10 = arith.constant 0 : index
    %c0_11 = arith.constant 0 : index
    %28 = vector.load %arg4[%c0_10, %c0_11] : memref<1024x128xbf16, #tpu.memory_space<vmem>>, vector<1024x128xbf16>
    %cst_12 = arith.constant dense<0.000000e+00> : vector<32x128xf32>
    %29 = tpu.matmul %26, %28, %cst_12 {dimension_numbers = #tpu.dot_dimension_numbers<[1], [0], [0], [1], [0, 0, 1, 1], [], []>} : vector<32x1024xbf16>, vector<1024x128xbf16>, vector<32x128xf32> -> vector<32x128xf32>
    %30 = arith.addf %27, %29 : vector<32x128xf32>
    %c0_13 = arith.constant 0 : index
    %c0_14 = arith.constant 0 : index
    %31 = vector.load %arg10[%c0_13, %c0_14] : memref<32x128xf32, #tpu.memory_space<vmem>>, vector<32x128xf32>
    tpu.vector_store %arg10[%c0_13, %c0_14], %30 {strides = array<i32>} : memref<32x128xf32, #tpu.memory_space<vmem>>, vector<32x128xf32>,
    %c3_i32 = arith.constant 3 : i32
    %32 = arith.cmpi eq, %arg2, %c3_i32 : i32
    %33 = arith.extui %32 : i1 to i32
    %c0_i32_15 = arith.constant 0 : i32
    %34 = arith.cmpi ne, %33, %c0_i32_15 : i32
    scf.if %34 {
      %c0_16 = arith.constant 0 : index
      %c0_17 = arith.constant 0 : index
      %35 = vector.load %arg10[%c0_16, %c0_17] : memref<32x128xf32, #tpu.memory_space<vmem>>, vector<32x128xf32>
      %cst_18 = arith.constant dense<0.000000e+00> : vector<128xf32>
      %36 = vector.multi_reduction <add>, %35, %cst_18 [0] : vector<32x128xf32> to vector<128xf32>
      %37 = vector.shape_cast %36 : vector<128xf32> to vector<1x128xf32>
      %38 = arith.mulf %35, %35 : vector<32x128xf32>
      %cst_19 = arith.constant dense<0.000000e+00> : vector<128xf32>
      %39 = vector.multi_reduction <add>, %38, %cst_19 [0] : vector<32x128xf32> to vector<128xf32>
      %40 = vector.shape_cast %39 : vector<128xf32> to vector<1x128xf32>
      %41 = tpu.iota {dimensions = array<i32: 0>} : vector<8x128xi32>
      %c0_i32_20 = arith.constant 0 : i32
      %42 = vector.broadcast %c0_i32_20 : i32 to vector<8x128xi32>
      %43 = arith.cmpi eq, %41, %42 : vector<8x128xi32>
      %c1_i32 = arith.constant 1 : i32
      %44 = vector.broadcast %c1_i32 : i32 to vector<8x128xi32>
      %45 = arith.cmpi eq, %41, %44 : vector<8x128xi32>
      %cst_21 = arith.constant 0.000000e+00 : f32
      %46 = vector.shape_cast %40 : vector<1x128xf32> to vector<1x128xf32>
      %47 = vector.broadcast %46 : vector<1x128xf32> to vector<8x128xf32>
      %48 = vector.broadcast %cst_21 : f32 to vector<8x128xf32>
      %49 = arith.select %45, %47, %48 : vector<8x128xi1>, vector<8x128xf32>
      %50 = vector.shape_cast %37 : vector<1x128xf32> to vector<1x128xf32>
      %51 = vector.broadcast %50 : vector<1x128xf32> to vector<8x128xf32>
      %52 = arith.select %43, %51, %49 : vector<8x128xi1>, vector<8x128xf32>
      %c0_22 = arith.constant 0 : index
      %c0_23 = arith.constant 0 : index
      %53 = vector.load %arg9[%c0_22, %c0_23] : memref<8x128xf32, #tpu.memory_space<vmem>>, vector<8x128xf32>
      tpu.vector_store %arg9[%c0_22, %c0_23], %52 {strides = array<i32>} : memref<8x128xf32, #tpu.memory_space<vmem>>, vector<8x128xf32>,
      %54 = arith.truncf %35 : vector<32x128xf32> to vector<32x128xbf16>
      %c0_24 = arith.constant 0 : index
      %c0_25 = arith.constant 0 : index
      %55 = vector.load %arg8[%c0_24, %c0_25] : memref<32x128xbf16, #tpu.memory_space<vmem>>, vector<32x128xbf16>
      tpu.vector_store %arg8[%c0_24, %c0_25], %54 {strides = array<i32>} : memref<32x128xbf16, #tpu.memory_space<vmem>>, vector<32x128xbf16>,
    } else {
    }
    return
  }
  func.func @transform_0(%arg0: i32, %arg1: i32, %arg2: i32) -> (i32, i32) {
    %c0_i32 = arith.constant 0 : i32
    return %arg0, %arg2 : i32, i32
  }
  func.func @transform_1(%arg0: i32, %arg1: i32, %arg2: i32) -> (i32, i32) {
    %c0_i32 = arith.constant 0 : i32
    return %arg2, %arg1 : i32, i32
  }
  func.func @transform_2(%arg0: i32, %arg1: i32, %arg2: i32) -> (i32, i32) {
    %c0_i32 = arith.constant 0 : i32
    %c0_i32_0 = arith.constant 0 : i32
    return %c0_i32, %arg2 : i32, i32
  }
  func.func @transform_3(%arg0: i32, %arg1: i32, %arg2: i32) -> (i32, i32) {
    %c0_i32 = arith.constant 0 : i32
    %c0_i32_0 = arith.constant 0 : i32
    return %c0_i32, %arg2 : i32, i32
  }
  func.func @transform_4(%arg0: i32, %arg1: i32, %arg2: i32) -> (i32, i32) {
    %c0_i32 = arith.constant 0 : i32
    %c0_i32_0 = arith.constant 0 : i32
    return %c0_i32, %arg1 : i32, i32
  }
  func.func @transform_5(%arg0: i32, %arg1: i32, %arg2: i32) -> (i32, i32) {
    %c0_i32 = arith.constant 0 : i32
    return %arg0, %arg1 : i32, i32
  }
  func.func @transform_6(%arg0: i32, %arg1: i32, %arg2: i32) -> (i32, i32) {
    %c0_i32 = arith.constant 0 : i32
    return %arg0, %arg1 : i32, i32
  }
}

module attributes {stable_mosaic.version = 11 : i64} {
  func.func @conv_gemm_kernel(%arg0: i32, %arg1: i32, %arg2: i32, %arg3: memref<16x1024xbf16, #tpu.memory_space<vmem>>, %arg4: memref<1024x128xbf16, #tpu.memory_space<vmem>>, %arg5: memref<1x1024xf32, #tpu.memory_space<vmem>>, %arg6: memref<1x1024xf32, #tpu.memory_space<vmem>>, %arg7: memref<1x128xf32, #tpu.memory_space<vmem>>, %arg8: memref<16x128xf32, #tpu.memory_space<vmem>>, %arg9: memref<16x128xf32, #tpu.memory_space<vmem>>) attributes {dimension_semantics = [#tpu.dimension_semantics<parallel>, #tpu.dimension_semantics<parallel>, #tpu.dimension_semantics<arbitrary>], iteration_bounds = array<i64: 1, 1, 8>, scalar_prefetch = 0 : i64, scratch_operands = 1 : i64, tpu.core_type = #tpu.core_type<tc>, window_params = [{transform_indices = @transform_0, window_bounds = array<i64: 16, 1024>}, {transform_indices = @transform_1, window_bounds = array<i64: 1024, 128>}, {transform_indices = @transform_2, window_bounds = array<i64: 1, 1024>}, {transform_indices = @transform_3, window_bounds = array<i64: 1, 1024>}, {transform_indices = @transform_4, window_bounds = array<i64: 1, 128>}, {transform_indices = @transform_5, window_bounds = array<i64: 16, 128>}]} {
    %c0_i32 = arith.constant 0 : i32
    %0 = arith.cmpi eq, %arg2, %c0_i32 : i32
    %1 = arith.extui %0 : i1 to i32
    %c0_i32_0 = arith.constant 0 : i32
    %2 = arith.cmpi ne, %1, %c0_i32_0 : i32
    scf.if %2 {
      %cst_15 = arith.constant 0.000000e+00 : f32
      %25 = vector.broadcast %cst_15 : f32 to vector<16x128xf32>
      %c0_16 = arith.constant 0 : index
      %c0_17 = arith.constant 0 : index
      %26 = vector.load %arg9[%c0_16, %c0_17] : memref<16x128xf32, #tpu.memory_space<vmem>>, vector<16x128xf32>
      tpu.vector_store %arg9[%c0_16, %c0_17], %25 {strides = array<i32>} : memref<16x128xf32, #tpu.memory_space<vmem>>, vector<16x128xf32>,
    } else {
    }
    %c0 = arith.constant 0 : index
    %c0_1 = arith.constant 0 : index
    %3 = vector.load %arg3[%c0, %c0_1] : memref<16x1024xbf16, #tpu.memory_space<vmem>>, vector<16x1024xbf16>
    %4 = arith.extf %3 : vector<16x1024xbf16> to vector<16x1024xf32>
    %c0_2 = arith.constant 0 : index
    %c0_3 = arith.constant 0 : index
    %5 = vector.load %arg5[%c0_2, %c0_3] : memref<1x1024xf32, #tpu.memory_space<vmem>>, vector<1x1024xf32>
    %6 = vector.broadcast %5 : vector<1x1024xf32> to vector<16x1024xf32>
    %7 = arith.mulf %4, %6 : vector<16x1024xf32>
    %c0_4 = arith.constant 0 : index
    %c0_5 = arith.constant 0 : index
    %8 = vector.load %arg6[%c0_4, %c0_5] : memref<1x1024xf32, #tpu.memory_space<vmem>>, vector<1x1024xf32>
    %9 = vector.broadcast %8 : vector<1x1024xf32> to vector<16x1024xf32>
    %10 = arith.addf %7, %9 : vector<16x1024xf32>
    %cst = arith.constant 0.000000e+00 : f32
    %11 = vector.broadcast %cst : f32 to vector<16x1024xf32>
    %12 = arith.cmpf ogt, %10, %11 : vector<16x1024xf32>
    %cst_6 = arith.constant 2.000000e-01 : f32
    %13 = vector.broadcast %cst_6 : f32 to vector<16x1024xf32>
    %14 = arith.mulf %13, %10 : vector<16x1024xf32>
    %15 = arith.select %12, %10, %14 : vector<16x1024xi1>, vector<16x1024xf32>
    %16 = arith.truncf %15 : vector<16x1024xf32> to vector<16x1024xbf16>
    %c0_7 = arith.constant 0 : index
    %c0_8 = arith.constant 0 : index
    %17 = vector.load %arg9[%c0_7, %c0_8] : memref<16x128xf32, #tpu.memory_space<vmem>>, vector<16x128xf32>
    %c0_9 = arith.constant 0 : index
    %c0_10 = arith.constant 0 : index
    %18 = vector.load %arg4[%c0_9, %c0_10] : memref<1024x128xbf16, #tpu.memory_space<vmem>>, vector<1024x128xbf16>
    %cst_11 = arith.constant dense<0.000000e+00> : vector<16x128xf32>
    %19 = tpu.matmul %16, %18, %cst_11 {dimension_numbers = #tpu.dot_dimension_numbers<[1], [0], [0], [1], [0, 0, 1, 1], [], []>} : vector<16x1024xbf16>, vector<1024x128xbf16>, vector<16x128xf32> -> vector<16x128xf32>
    %20 = arith.addf %17, %19 : vector<16x128xf32>
    %c0_12 = arith.constant 0 : index
    %c0_13 = arith.constant 0 : index
    %21 = vector.load %arg9[%c0_12, %c0_13] : memref<16x128xf32, #tpu.memory_space<vmem>>, vector<16x128xf32>
    tpu.vector_store %arg9[%c0_12, %c0_13], %20 {strides = array<i32>} : memref<16x128xf32, #tpu.memory_space<vmem>>, vector<16x128xf32>,
    %c7_i32 = arith.constant 7 : i32
    %22 = arith.cmpi eq, %arg2, %c7_i32 : i32
    %23 = arith.extui %22 : i1 to i32
    %c0_i32_14 = arith.constant 0 : i32
    %24 = arith.cmpi ne, %23, %c0_i32_14 : i32
    scf.if %24 {
      %c0_15 = arith.constant 0 : index
      %c0_16 = arith.constant 0 : index
      %25 = vector.load %arg9[%c0_15, %c0_16] : memref<16x128xf32, #tpu.memory_space<vmem>>, vector<16x128xf32>
      %c0_17 = arith.constant 0 : index
      %c0_18 = arith.constant 0 : index
      %26 = vector.load %arg7[%c0_17, %c0_18] : memref<1x128xf32, #tpu.memory_space<vmem>>, vector<1x128xf32>
      %27 = vector.broadcast %26 : vector<1x128xf32> to vector<16x128xf32>
      %28 = arith.addf %25, %27 : vector<16x128xf32>
      %c0_19 = arith.constant 0 : index
      %c0_20 = arith.constant 0 : index
      %29 = vector.load %arg8[%c0_19, %c0_20] : memref<16x128xf32, #tpu.memory_space<vmem>>, vector<16x128xf32>
      tpu.vector_store %arg8[%c0_19, %c0_20], %28 {strides = array<i32>} : memref<16x128xf32, #tpu.memory_space<vmem>>, vector<16x128xf32>,
    } else {
    }
    return
  }
  func.func @transform_0(%arg0: i32, %arg1: i32, %arg2: i32) -> (i32, i32) {
    %c0_i32 = arith.constant 0 : i32
    return %arg0, %arg2 : i32, i32
  }
  func.func @transform_1(%arg0: i32, %arg1: i32, %arg2: i32) -> (i32, i32) {
    %c0_i32 = arith.constant 0 : i32
    return %arg2, %arg1 : i32, i32
  }
  func.func @transform_2(%arg0: i32, %arg1: i32, %arg2: i32) -> (i32, i32) {
    %c0_i32 = arith.constant 0 : i32
    %c0_i32_0 = arith.constant 0 : i32
    return %c0_i32, %arg2 : i32, i32
  }
  func.func @transform_3(%arg0: i32, %arg1: i32, %arg2: i32) -> (i32, i32) {
    %c0_i32 = arith.constant 0 : i32
    %c0_i32_0 = arith.constant 0 : i32
    return %c0_i32, %arg2 : i32, i32
  }
  func.func @transform_4(%arg0: i32, %arg1: i32, %arg2: i32) -> (i32, i32) {
    %c0_i32 = arith.constant 0 : i32
    %c0_i32_0 = arith.constant 0 : i32
    return %c0_i32, %arg1 : i32, i32
  }
  func.func @transform_5(%arg0: i32, %arg1: i32, %arg2: i32) -> (i32, i32) {
    %c0_i32 = arith.constant 0 : i32
    return %arg0, %arg1 : i32, i32
  }
}

</mosaic_0001>

<bundles_post_ra>
// kernel: patchgan_forward.5
= control target key start
LH: loop header
LB: loop body
LE: loop exit
PB: predicated region body
PF: predicated region fallthrough
CT: control target
= control target key end

     0   :  { %s1936_s18 = smov 0   ;;  %s1938_s19 = smov 0   ;;  %s2110_s0 = inlined_call_operand.vmem [shape: bf16[512,256], index: 0, kind: input, shape index: {}]   ;;  %s2111_s1 = inlined_call_operand.vmem [shape: bf16[256,128], index: 1, kind: input, shape index: {}]   ;;  %s2112_s2 = inlined_call_operand.vmem [shape: f32[1,256], index: 2, kind: input, shape index: {}, may-alias: {2,3}]   ;;  %s2113_s3 = inlined_call_operand.vmem [shape: f32[1,256], index: 3, kind: input, shape index: {}, may-alias: {2,3}]   ;;  %s2114_s4 = inlined_call_operand.vmem [shape: f32[1,128], index: 4, kind: input, shape index: {}]   ;;  %s2115_s5 = inlined_call_operand.vmem [shape: bf16[512,128], index: 5, kind: output, shape index: {}]  }
   0x1   :  { %s1940_s20 = smov 0  }
   0x2 LB: > { %s34_s2 = sadd.s32 1, %s1900_s19  ;;  %p1449_p0 = scmp.ge.s32.totalorder %s1904_s20, 1  ;;  %s1904_s20 = sphi %s1940_s20, %s15_s20   ;;  %s1900_s19 = sphi %s1938_s19, %s2117_s19   ;;  %s1896_s18 = sphi %s1936_s18, %s2116_s18  }
   0x3   : > { %p36_p1 = scmp.ge.s32.totalorder %s34_s2, 2  ;;  %p261_p2 = scmp.lt.s32.totalorder %s1904_s20, 3 }
   0x5   : > { %s2119_s2 = smov (%p36_p1, %s34_s2), 0  ;;  %p262_p3 = pnand %p1449_p0, %p261_p2 }
   0x6   : > { %s1450_s22 = sshll.u32 (!%p262_p3), %s1896_s18, 5 }
   0x7   : > { %265 = sbr.rel (%p262_p3) target bundleno = 310 (0x136), region = 40  ;;  %p318_p4 = scmp.lt.s32.totalorder (!%p262_p3), %s1450_s22, 63 }
   0xc   : > { %v1818_v0 = vld [vmem:[%s2111_s1 + $0x78] sm:$0xff]   ;;  %v1820_v2 = vld [vmem:[%s2111_s1 + $0x70] sm:$0xff]   ;;  %v1822_v4 = vld [vmem:[%s2111_s1 + $0x68] sm:$0xff]   ;;  %s2121_s22 = smov (!%p318_p4, %s1450_s22), 63 }
   0xd   : > { %v1819_v1 = vld [vmem:[%s2111_s1 + $0x38] sm:$0xff]   ;;  %1666 = vmatprep.subr.bf16.mxu0 %v1818_v0  ;;  %1778 = vmatprep.subr.bf16.mxu1 %v1818_v0  ;;  %v1821_v3 = vld [vmem:[%s2111_s1 + $0x30] sm:$0xff]   ;;  %v1823_v5 = vld [vmem:[%s2111_s1 + $0x28] sm:$0xff]   ;;  %s1538_s12 = sshll.u32 %s2121_s22, 3  ;;  %s1454_s11 = sshll.u32 %s2121_s22, 2 }
   0xe   : > { %1667 = vmatpush3.bf16.msra.mxu0 %v1819_v1  ;;  %1786 = vmatpush3.bf16.msra.mxu1 %v1819_v1  ;;  %v1824_v6 = vld [vmem:[%s2111_s1 + $0x60] sm:$0xff]   ;;  %v1826_v8 = vld [vmem:[%s2111_s1 + $0x58] sm:$0xff]   ;;  %s1987_s17 = scalar_lea.vmem %s2110_s0, %s1538_s12  ;;  %v1828_v10 = vld [vmem:[%s2111_s1 + $0x50] sm:$0xff]   ;;  %s2055_s14 = scalar_lea.vmem %s2115_s5, %s1454_s11 }
   0xf   : > { %1668 = vmatprep.subr.bf16.mxu0 %v1820_v2  ;;  %1779 = vmatprep.subr.bf16.mxu1 %v1820_v2  ;;  %v1825_v7 = vld [vmem:[%s2111_s1 + $0x20] sm:$0xff]   ;;  %v1827_v9 = vld [vmem:[%s2111_s1 + $0x18] sm:$0xff]   ;;  %v1829_v13 = vld [vmem:[%s2111_s1 + $0x10] sm:$0xff]  }
  0x10   : > { %v1836_v11 = vld [vmem:[%s1987_s17 + $0x4] ss:$8 sps:$4 sm:$0xff]   ;;  %v1834_v18 = vld [vmem:[%s1987_s17] ss:$8 sps:$4 sm:$0xff]   ;;  %v1840_v20 = vld [vmem:[%s1987_s17 + $0x14] ss:$8 sps:$4 sm:$0xff]  }
  0x11   : > { %v1839_v12 = vld [vmem:[%s1987_s17 + $0x84] ss:$8 sps:$4 sm:$0xff]   ;;  %780 = vmatprep.mubr.bf16.mxu0 %v1836_v11  ;;  %v1837_v19 = vld [vmem:[%s1987_s17 + $0x80] ss:$8 sps:$4 sm:$0xff]   ;;  %v1842_v21 = vld [vmem:[%s1987_s17 + $0x94] ss:$8 sps:$4 sm:$0xff]  }
  0x12   : > { %1669 = vmatpush3.bf16.msra.mxu0 %v1821_v3  ;;  %1787 = vmatpush3.bf16.msra.mxu1 %v1821_v3  ;;  %v1830_v14 = vld [vmem:[%s2111_s1 + $0x48] sm:$0xff]   ;;  %v1832_v16 = vld [vmem:[%s2111_s1 + $0x40] sm:$0xff]   ;;  %v1844_v22 = vld [vmem:[%s1987_s17 + $0x10] ss:$8 sps:$4 sm:$0xff]  }
  0x13   : > { %1670 = vmatprep.subr.bf16.mxu0 %v1822_v4  ;;  %1780 = vmatprep.subr.bf16.mxu1 %v1822_v4  ;;  %v1831_v15 = vld [vmem:[%s2111_s1 + $0x8] sm:$0xff]   ;;  %v1833_v17 = vld [vmem:[%s2111_s1] sm:$0xff]   ;;  %v1845_v23 = vld [vmem:[%s1987_s17 + $0x90] ss:$8 sps:$4 sm:$0xff]  }
  0x14   : > { %844 = vmatprep.mubr.bf16.mxu1 %v1839_v12  ;;  %v1846_v24 = vld [vmem:[%s1987_s17 + $0x24] ss:$8 sps:$4 sm:$0xff]   ;;  %v1850_v26 = vld [vmem:[%s1987_s17 + $0x20] ss:$8 sps:$4 sm:$0xff]   ;;  %v1852_v28 = vld [vmem:[%s1987_s17 + $0x34] ss:$8 sps:$4 sm:$0xff]  }
  0x15   : > { %v1848_v25 = vld [vmem:[%s1987_s17 + $0xa4] ss:$8 sps:$4 sm:$0xff]   ;;  %v1851_v27 = vld [vmem:[%s1987_s17 + $0xa0] ss:$8 sps:$4 sm:$0xff]   ;;  %v1854_v29 = vld [vmem:[%s1987_s17 + $0xb4] ss:$8 sps:$4 sm:$0xff]  }
  0x16   : > { %1671 = vmatpush3.bf16.msra.mxu0 %v1823_v5  ;;  %1788 = vmatpush3.bf16.msra.mxu1 %v1823_v5  ;;  %v1856_v30 = vld [vmem:[%s1987_s17 + $0x30] ss:$8 sps:$4 sm:$0xff]   ;;  %v1858_v32 = vld [vmem:[%s1987_s17 + $0x44] ss:$8 sps:$4 sm:$0xff]   ;;  %v1862_v34 = vld [vmem:[%s1987_s17 + $0x40] ss:$8 sps:$4 sm:$0xff]  }
  0x17   : > { %1672 = vmatprep.subr.bf16.mxu0 %v1824_v6  ;;  %1781 = vmatprep.subr.bf16.mxu1 %v1824_v6  ;;  %v1857_v31 = vld [vmem:[%s1987_s17 + $0xb0] ss:$8 sps:$4 sm:$0xff]   ;;  %v1860_v33 = vld [vmem:[%s1987_s17 + $0xc4] ss:$8 sps:$4 sm:$0xff]   ;;  %v1863_v35 = vld [vmem:[%s1987_s17 + $0xc0] ss:$8 sps:$4 sm:$0xff]  }
  0x18   : > { %v1864_v36 = vld [vmem:[%s1987_s17 + $0x54] ss:$8 sps:$4 sm:$0xff]   ;;  %v1868_v38 = vld [vmem:[%s1987_s17 + $0x50] ss:$8 sps:$4 sm:$0xff]   ;;  %v1870_v40 = vld [vmem:[%s1987_s17 + $0x64] ss:$8 sps:$4 sm:$0xff]  }
  0x19   : > { %v1866_v37 = vld [vmem:[%s1987_s17 + $0xd4] ss:$8 sps:$4 sm:$0xff]   ;;  %v1869_v39 = vld [vmem:[%s1987_s17 + $0xd0] ss:$8 sps:$4 sm:$0xff]   ;;  %v1872_v41 = vld [vmem:[%s1987_s17 + $0xe4] ss:$8 sps:$4 sm:$0xff]  }
  0x1a   : > { %1673 = vmatpush3.bf16.msra.mxu0 %v1825_v7  ;;  %1789 = vmatpush3.bf16.msra.mxu1 %v1825_v7  ;;  %v1874_v42 = vld [vmem:[%s1987_s17 + $0x60] ss:$8 sps:$4 sm:$0xff]   ;;  %v1876_v44 = vld [vmem:[%s1987_s17 + $0x74] ss:$8 sps:$4 sm:$0xff]   ;;  %v1880_v46 = vld [vmem:[%s1987_s17 + $0x70] ss:$8 sps:$4 sm:$0xff]  }
  0x1b   : > { %1674 = vmatprep.subr.bf16.mxu0 %v1826_v8  ;;  %1782 = vmatprep.subr.bf16.mxu1 %v1826_v8  ;;  %v1875_v43 = vld [vmem:[%s1987_s17 + $0xe0] ss:$8 sps:$4 sm:$0xff]   ;;  %v1878_v45 = vld [vmem:[%s1987_s17 + $0xf4] ss:$8 sps:$4 sm:$0xff]   ;;  %v1881_v47 = vld [vmem:[%s1987_s17 + $0xf0] ss:$8 sps:$4 sm:$0xff]  }
  0x1c   : > { %v2045_v51 = vld [vmem:[%s2114_s4] ss:$0 sm:$0xff] }
  0x1e   : > { %1675 = vmatpush3.bf16.msra.mxu0 %v1827_v9  ;;  %1790 = vmatpush3.bf16.msra.mxu1 %v1827_v9 }
  0x1f   : > { %1676 = vmatprep.subr.bf16.mxu0 %v1828_v10  ;;  %1783 = vmatprep.subr.bf16.mxu1 %v1828_v10 }
  0x22   : > { %1677 = vmatpush3.bf16.msra.mxu0 %v1829_v13  ;;  %1791 = vmatpush3.bf16.msra.mxu1 %v1829_v13 }
  0x23   : > { %1678 = vmatprep.subr.bf16.mxu0 %v1830_v14  ;;  %1784 = vmatprep.subr.bf16.mxu1 %v1830_v14 }
  0x26   : > { %1679 = vmatpush3.bf16.msra.mxu0 %v1831_v15  ;;  %1792 = vmatpush3.bf16.msra.mxu1 %v1831_v15 }
  0x27   : > { %1680 = vmatprep.subr.bf16.mxu0 %v1832_v16  ;;  %1785 = vmatprep.subr.bf16.mxu1 %v1832_v16 }
  0x2a   : > { %1681 = vmatpush3.bf16.msra.mxu0 %v1833_v17  ;;  %1793 = vmatpush3.bf16.msra.mxu1 %v1833_v17 }
  0x2d   : > { %781 = vmatmul.mubr.bf16.vlgmr.msra.gmra.mxu0 %v1834_v18  ;;  %845 = vmatmul.mubr.bf16.vlgmr.msra.gmra.mxu1 %v1837_v19 }
  0x2e   : > { %788 = vmatprep.mubr.bf16.mxu0 %v1840_v20  ;;  %852 = vmatprep.mubr.bf16.mxu1 %v1842_v21 }
  0x35   : > { %789 = vmatmul.mubr.bf16.gmra.mxu0 %v1844_v22  ;;  %853 = vmatmul.mubr.bf16.gmra.mxu1 %v1845_v23 }
  0x36   : > { %796 = vmatprep.mubr.bf16.mxu0 %v1846_v24  ;;  %860 = vmatprep.mubr.bf16.mxu1 %v1848_v25 }
  0x3d   : > { %797 = vmatmul.mubr.bf16.gmra.mxu0 %v1850_v26  ;;  %861 = vmatmul.mubr.bf16.gmra.mxu1 %v1851_v27 }
  0x3e   : > { %804 = vmatprep.mubr.bf16.mxu0 %v1852_v28  ;;  %868 = vmatprep.mubr.bf16.mxu1 %v1854_v29 }
  0x45   : > { %805 = vmatmul.mubr.bf16.gmra.mxu0 %v1856_v30  ;;  %869 = vmatmul.mubr.bf16.gmra.mxu1 %v1857_v31 }
  0x46   : > { %812 = vmatprep.mubr.bf16.mxu0 %v1858_v32  ;;  %876 = vmatprep.mubr.bf16.mxu1 %v1860_v33 }
  0x4d   : > { %813 = vmatmul.mubr.bf16.gmra.mxu0 %v1862_v34  ;;  %877 = vmatmul.mubr.bf16.gmra.mxu1 %v1863_v35 }
  0x4e   : > { %820 = vmatprep.mubr.bf16.mxu0 %v1864_v36  ;;  %884 = vmatprep.mubr.bf16.mxu1 %v1866_v37 }
  0x55   : > { %821 = vmatmul.mubr.bf16.gmra.mxu0 %v1868_v38  ;;  %885 = vmatmul.mubr.bf16.gmra.mxu1 %v1869_v39 }
  0x56   : > { %828 = vmatprep.mubr.bf16.mxu0 %v1870_v40  ;;  %892 = vmatprep.mubr.bf16.mxu1 %v1872_v41 }
  0x5d   : > { %829 = vmatmul.mubr.bf16.gmra.mxu0 %v1874_v42  ;;  %893 = vmatmul.mubr.bf16.gmra.mxu1 %v1875_v43 }
  0x5e   : > { %836 = vmatprep.mubr.bf16.mxu0 %v1876_v44  ;;  %900 = vmatprep.mubr.bf16.mxu1 %v1878_v45 }
  0x65   : > { %837 = vmatmul.mubr.bf16.gmra.mxu0 %v1880_v46  ;;  %901 = vmatmul.mubr.bf16.gmra.mxu1 %v1881_v47 }
  0xed   : > { %v1682_v48 = vpop.f32.mrf.mxu0  ;;  %v1730_v49 = vpop.f32.mrf.mxu1 }
  0xef   : > { %v1683_v50 = vpop.f32.mrf.mxu0  ;;  %v1731_v52 = vpop.f32.mrf.mxu1 }
  0xf0   : > { %v1684_v53 = vadd.f32 %v1683_v50, %v1682_v48  ;;  %v1732_v54 = vadd.f32 %v1731_v52, %v1730_v49 }
  0xf1   : > { %v1685_v55 = vpop.f32.mrf.mxu0  ;;  %v1733_v56 = vpop.f32.mrf.mxu1 }
  0xf2   : > { %v1015_v57 = vadd.f32 %v1684_v53, %v2045_v51  ;;  %v1031_v58 = vadd.f32 %v1732_v54, %v2045_v51 }
  0xf3   : > { %v1686_v59 = vpop.f32.mrf.mxu0  ;;  %v1734_v60 = vpop.f32.mrf.mxu1 }
  0xf4   : > { %v1687_v61 = vadd.f32 %v1686_v59, %v1685_v55  ;;  %v1735_v62 = vadd.f32 %v1734_v60, %v1733_v56  ;;  %v1079_v1 = vmul.f32 0.2, %v1015_v57  ;;  %v1095_v2 = vmul.f32 0.2, %v1031_v58 }
  0xf5   : > { %v1688_v63 = vpop.f32.mrf.mxu0  ;;  %v1736_v0 = vpop.f32.mrf.mxu1  ;;  %vm1047_vm0 = vcmp.gt.f32.partialorder %v1015_v57, 0.0  ;;  %vm1063_vm1 = vcmp.gt.f32.partialorder %v1031_v58, 0.0 }
  0xf6   : > { %v1016_v3 = vadd.f32 %v1687_v61, %v2045_v51  ;;  %v1032_v4 = vadd.f32 %v1735_v62, %v2045_v51  ;;  %v1111_v13 = vsel %vm1047_vm0, %v1015_v57, %v1079_v1  ;;  %v1127_v14 = vsel %vm1063_vm1, %v1031_v58, %v1095_v2 }
  0xf7   : > { %v1689_v5 = vpop.f32.mrf.mxu0  ;;  %v1737_v6 = vpop.f32.mrf.mxu1 }
  0xf8   : > { %v1690_v7 = vadd.f32 %v1689_v5, %v1688_v63  ;;  %v1738_v8 = vadd.f32 %v1737_v6, %v1736_v0  ;;  %vm1048_vm2 = vcmp.gt.f32.partialorder %v1016_v3, 0.0  ;;  %v1080_v9 = vmul.f32 0.2, %v1016_v3 }
  0xf9   : > { %vm1064_vm3 = vcmp.gt.f32.partialorder %v1032_v4, 0.0  ;;  %v1096_v10 = vmul.f32 0.2, %v1032_v4  ;;  %v1691_v11 = vpop.f32.mrf.mxu0  ;;  %v1739_v12 = vpop.f32.mrf.mxu1 }
  0xfa   : > { %v1112_v15 = vsel %vm1048_vm2, %v1016_v3, %v1080_v9  ;;  %v1017_v17 = vadd.f32 %v1690_v7, %v2045_v51  ;;  %v1033_v18 = vadd.f32 %v1738_v8, %v2045_v51 }
  0xfb   : > { %v1128_v16 = vsel %vm1064_vm3, %v1032_v4, %v1096_v10  ;;  %v1692_v19 = vpop.f32.mrf.mxu0  ;;  %v1740_v20 = vpop.f32.mrf.mxu1  ;;  %v1574_v21 = vpack.c.bf16 %v1112_v15, %v1111_v13 }
  0xfc   : > { %v1614_v22 = vpack.c.bf16 %v1128_v16, %v1127_v14  ;;  %v1693_v23 = vadd.f32 %v1692_v19, %v1691_v11  ;;  %v1741_v24 = vadd.f32 %v1740_v20, %v1739_v12  ;;  %v1081_v27 = vmul.f32 0.2, %v1017_v17 }
  0xfd   : > { %v1694_v25 = vpop.f32.mrf.mxu0  ;;  %v1742_v26 = vpop.f32.mrf.mxu1  ;;  %1575 = vst [vmem:[%s2055_s14] sm:$0xff] %v1574_v21   ;;  %v1097_v28 = vmul.f32 0.2, %v1033_v18  ;;  %vm1049_vm4 = vcmp.gt.f32.partialorder %v1017_v17, 0.0  ;;  %vm1065_vm5 = vcmp.gt.f32.partialorder %v1033_v18, 0.0 }
  0xfe   : > { %1658 = vst [vmem:[%s2055_s14 + $0x40] sm:$0xff] %v1614_v22   ;;  %v1018_v29 = vadd.f32 %v1693_v23, %v2045_v51  ;;  %v1034_v30 = vadd.f32 %v1741_v24, %v2045_v51  ;;  %v1113_v41 = vsel %vm1049_vm4, %v1017_v17, %v1081_v27 }
  0xff   : > { %v1695_v31 = vpop.f32.mrf.mxu0  ;;  %v1743_v32 = vpop.f32.mrf.mxu1  ;;  %v1129_v42 = vsel %vm1065_vm5, %v1033_v18, %v1097_v28 }
 0x100   : > { %v1696_v33 = vadd.f32 %v1695_v31, %v1694_v25  ;;  %v1744_v34 = vadd.f32 %v1743_v32, %v1742_v26  ;;  %vm1050_vm6 = vcmp.gt.f32.partialorder %v1018_v29, 0.0  ;;  %v1082_v35 = vmul.f32 0.2, %v1018_v29 }
 0x101   : > { %vm1066_vm7 = vcmp.gt.f32.partialorder %v1034_v30, 0.0  ;;  %v1098_v36 = vmul.f32 0.2, %v1034_v30  ;;  %v1697_v37 = vpop.f32.mrf.mxu0  ;;  %v1745_v38 = vpop.f32.mrf.mxu1 }
 0x102   : > { %v1019_v39 = vadd.f32 %v1696_v33, %v2045_v51  ;;  %v1035_v40 = vadd.f32 %v1744_v34, %v2045_v51  ;;  %v1114_v43 = vsel %vm1050_vm6, %v1018_v29, %v1082_v35 }
 0x103   : > { %v1130_v44 = vsel %vm1066_vm7, %v1034_v30, %v1098_v36  ;;  %v1698_v45 = vpop.f32.mrf.mxu0  ;;  %v1746_v46 = vpop.f32.mrf.mxu1  ;;  %v1579_v47 = vpack.c.bf16 %v1114_v43, %v1113_v41 }
 0x104   : > { %v1619_v48 = vpack.c.bf16 %v1130_v44, %v1129_v42  ;;  %v1699_v49 = vadd.f32 %v1698_v45, %v1697_v37  ;;  %v1747_v50 = vadd.f32 %v1746_v46, %v1745_v38  ;;  %v1083_v54 = vmul.f32 0.2, %v1019_v39 }
 0x105   : > { %v1700_v52 = vpop.f32.mrf.mxu0  ;;  %v1748_v53 = vpop.f32.mrf.mxu1  ;;  %1651 = vst [vmem:[%s2055_s14 + $0x8] sm:$0xff] %v1579_v47   ;;  %v1099_v55 = vmul.f32 0.2, %v1035_v40  ;;  %vm1051_vm8 = vcmp.gt.f32.partialorder %v1019_v39, 0.0  ;;  %vm1067_vm9 = vcmp.gt.f32.partialorder %v1035_v40, 0.0 }
 0x106   : > { %1659 = vst [vmem:[%s2055_s14 + $0x48] sm:$0xff] %v1619_v48   ;;  %v1020_v56 = vadd.f32 %v1699_v49, %v2045_v51  ;;  %v1036_v57 = vadd.f32 %v1747_v50, %v2045_v51  ;;  %v1115_v2 = vsel %vm1051_vm8, %v1019_v39, %v1083_v54 }
 0x107   : > { %v1701_v58 = vpop.f32.mrf.mxu0  ;;  %v1749_v59 = vpop.f32.mrf.mxu1  ;;  %v1131_v3 = vsel %vm1067_vm9, %v1035_v40, %v1099_v55 }
 0x108   : > { %v1702_v60 = vadd.f32 %v1701_v58, %v1700_v52  ;;  %v1750_v61 = vadd.f32 %v1749_v59, %v1748_v53  ;;  %vm1052_vm10 = vcmp.gt.f32.partialorder %v1020_v56, 0.0  ;;  %v1084_v62 = vmul.f32 0.2, %v1020_v56 }
 0x109   : > { %vm1068_vm11 = vcmp.gt.f32.partialorder %v1036_v57, 0.0  ;;  %v1100_v63 = vmul.f32 0.2, %v1036_v57  ;;  %v1703_v0 = vpop.f32.mrf.mxu0  ;;  %v1751_v1 = vpop.f32.mrf.mxu1 }
 0x10a   : > { %v1116_v4 = vsel %vm1052_vm10, %v1020_v56, %v1084_v62  ;;  %v1021_v6 = vadd.f32 %v1702_v60, %v2045_v51  ;;  %v1037_v7 = vadd.f32 %v1750_v61, %v2045_v51 }
 0x10b   : > { %v1132_v5 = vsel %vm1068_vm11, %v1036_v57, %v1100_v63  ;;  %v1704_v8 = vpop.f32.mrf.mxu0  ;;  %v1752_v9 = vpop.f32.mrf.mxu1  ;;  %v1584_v10 = vpack.c.bf16 %v1116_v4, %v1115_v2 }
 0x10c   : > { %v1624_v11 = vpack.c.bf16 %v1132_v5, %v1131_v3  ;;  %v1705_v12 = vadd.f32 %v1704_v8, %v1703_v0  ;;  %v1753_v13 = vadd.f32 %v1752_v9, %v1751_v1  ;;  %v1085_v16 = vmul.f32 0.2, %v1021_v6 }
 0x10d   : > { %v1706_v14 = vpop.f32.mrf.mxu0  ;;  %v1754_v15 = vpop.f32.mrf.mxu1  ;;  %1652 = vst [vmem:[%s2055_s14 + $0x10] sm:$0xff] %v1584_v10   ;;  %v1101_v17 = vmul.f32 0.2, %v1037_v7  ;;  %vm1053_vm12 = vcmp.gt.f32.partialorder %v1021_v6, 0.0  ;;  %vm1069_vm13 = vcmp.gt.f32.partialorder %v1037_v7, 0.0 }
 0x10e   : > { %1660 = vst [vmem:[%s2055_s14 + $0x50] sm:$0xff] %v1624_v11   ;;  %v1022_v18 = vadd.f32 %v1705_v12, %v2045_v51  ;;  %v1038_v19 = vadd.f32 %v1753_v13, %v2045_v51  ;;  %v1117_v30 = vsel %vm1053_vm12, %v1021_v6, %v1085_v16 }
 0x10f   : > { %v1707_v20 = vpop.f32.mrf.mxu0  ;;  %v1755_v21 = vpop.f32.mrf.mxu1  ;;  %v1133_v31 = vsel %vm1069_vm13, %v1037_v7, %v1101_v17 }
 0x110   : > { %v1708_v22 = vadd.f32 %v1707_v20, %v1706_v14  ;;  %v1756_v23 = vadd.f32 %v1755_v21, %v1754_v15  ;;  %vm1054_vm14 = vcmp.gt.f32.partialorder %v1022_v18, 0.0  ;;  %v1086_v24 = vmul.f32 0.2, %v1022_v18 }
 0x111   : > { %vm1070_vm15 = vcmp.gt.f32.partialorder %v1038_v19, 0.0  ;;  %v1102_v25 = vmul.f32 0.2, %v1038_v19  ;;  %v1709_v26 = vpop.f32.mrf.mxu0  ;;  %v1757_v27 = vpop.f32.mrf.mxu1 }
 0x112   : > { %v1023_v28 = vadd.f32 %v1708_v22, %v2045_v51  ;;  %v1039_v29 = vadd.f32 %v1756_v23, %v2045_v51  ;;  %v1118_v32 = vsel %vm1054_vm14, %v1022_v18, %v1086_v24 }
 0x113   : > { %v1134_v33 = vsel %vm1070_vm15, %v1038_v19, %v1102_v25  ;;  %v1710_v34 = vpop.f32.mrf.mxu0  ;;  %v1758_v35 = vpop.f32.mrf.mxu1  ;;  %v1589_v36 = vpack.c.bf16 %v1118_v32, %v1117_v30 }
 0x114   : > { %v1629_v37 = vpack.c.bf16 %v1134_v33, %v1133_v31  ;;  %v1711_v38 = vadd.f32 %v1710_v34, %v1709_v26  ;;  %v1759_v39 = vadd.f32 %v1758_v35, %v1757_v27  ;;  %v1087_v42 = vmul.f32 0.2, %v1023_v28 }
 0x115   : > { %v1712_v40 = vpop.f32.mrf.mxu0  ;;  %v1760_v41 = vpop.f32.mrf.mxu1  ;;  %1653 = vst [vmem:[%s2055_s14 + $0x18] sm:$0xff] %v1589_v36   ;;  %v1103_v43 = vmul.f32 0.2, %v1039_v29  ;;  %vm1055_vm0 = vcmp.gt.f32.partialorder %v1023_v28, 0.0  ;;  %vm1071_vm1 = vcmp.gt.f32.partialorder %v1039_v29, 0.0 }
 0x116   : > { %1661 = vst [vmem:[%s2055_s14 + $0x58] sm:$0xff] %v1629_v37   ;;  %v1024_v44 = vadd.f32 %v1711_v38, %v2045_v51  ;;  %v1040_v45 = vadd.f32 %v1759_v39, %v2045_v51  ;;  %v1119_v55 = vsel %vm1055_vm0, %v1023_v28, %v1087_v42 }
 0x117   : > { %v1713_v46 = vpop.f32.mrf.mxu0  ;;  %v1761_v47 = vpop.f32.mrf.mxu1  ;;  %v1135_v56 = vsel %vm1071_vm1, %v1039_v29, %v1103_v43 }
 0x118   : > { %v1714_v48 = vadd.f32 %v1713_v46, %v1712_v40  ;;  %v1762_v49 = vadd.f32 %v1761_v47, %v1760_v41  ;;  %vm1056_vm2 = vcmp.gt.f32.partialorder %v1024_v44, 0.0  ;;  %v1088_v50 = vmul.f32 0.2, %v1024_v44 }
 0x119   : > { %vm1072_vm3 = vcmp.gt.f32.partialorder %v1040_v45, 0.0  ;;  %v1104_v52 = vmul.f32 0.2, %v1040_v45  ;;  %v1715_v53 = vpop.f32.mrf.mxu0  ;;  %v1763_v54 = vpop.f32.mrf.mxu1 }
 0x11a   : > { %v1120_v57 = vsel %vm1056_vm2, %v1024_v44, %v1088_v50  ;;  %v1025_v59 = vadd.f32 %v1714_v48, %v2045_v51  ;;  %v1041_v60 = vadd.f32 %v1762_v49, %v2045_v51 }
 0x11b   : > { %v1136_v58 = vsel %vm1072_vm3, %v1040_v45, %v1104_v52  ;;  %v1716_v61 = vpop.f32.mrf.mxu0  ;;  %v1764_v62 = vpop.f32.mrf.mxu1  ;;  %v1594_v63 = vpack.c.bf16 %v1120_v57, %v1119_v55 }
 0x11c   : > { %v1634_v0 = vpack.c.bf16 %v1136_v58, %v1135_v56  ;;  %v1717_v1 = vadd.f32 %v1716_v61, %v1715_v53  ;;  %v1765_v2 = vadd.f32 %v1764_v62, %v1763_v54  ;;  %v1089_v5 = vmul.f32 0.2, %v1025_v59 }
 0x11d   : > { %v1718_v3 = vpop.f32.mrf.mxu0  ;;  %v1766_v4 = vpop.f32.mrf.mxu1  ;;  %1654 = vst [vmem:[%s2055_s14 + $0x20] sm:$0xff] %v1594_v63   ;;  %v1105_v6 = vmul.f32 0.2, %v1041_v60  ;;  %vm1057_vm4 = vcmp.gt.f32.partialorder %v1025_v59, 0.0  ;;  %vm1073_vm5 = vcmp.gt.f32.partialorder %v1041_v60, 0.0 }
 0x11e   : > { %1662 = vst [vmem:[%s2055_s14 + $0x60] sm:$0xff] %v1634_v0   ;;  %v1026_v7 = vadd.f32 %v1717_v1, %v2045_v51  ;;  %v1042_v8 = vadd.f32 %v1765_v2, %v2045_v51  ;;  %v1121_v19 = vsel %vm1057_vm4, %v1025_v59, %v1089_v5 }
 0x11f   : > { %v1719_v9 = vpop.f32.mrf.mxu0  ;;  %v1767_v10 = vpop.f32.mrf.mxu1  ;;  %v1137_v20 = vsel %vm1073_vm5, %v1041_v60, %v1105_v6 }
 0x120   : > { %v1720_v11 = vadd.f32 %v1719_v9, %v1718_v3  ;;  %v1768_v12 = vadd.f32 %v1767_v10, %v1766_v4  ;;  %vm1058_vm6 = vcmp.gt.f32.partialorder %v1026_v7, 0.0  ;;  %v1090_v13 = vmul.f32 0.2, %v1026_v7 }
 0x121   : > { %vm1074_vm7 = vcmp.gt.f32.partialorder %v1042_v8, 0.0  ;;  %v1106_v14 = vmul.f32 0.2, %v1042_v8  ;;  %v1721_v15 = vpop.f32.mrf.mxu0  ;;  %v1769_v16 = vpop.f32.mrf.mxu1 }
 0x122   : > { %v1027_v17 = vadd.f32 %v1720_v11, %v2045_v51  ;;  %v1043_v18 = vadd.f32 %v1768_v12, %v2045_v51  ;;  %v1122_v21 = vsel %vm1058_vm6, %v1026_v7, %v1090_v13 }
 0x123   : > { %v1138_v22 = vsel %vm1074_vm7, %v1042_v8, %v1106_v14  ;;  %v1722_v23 = vpop.f32.mrf.mxu0  ;;  %v1770_v24 = vpop.f32.mrf.mxu1  ;;  %v1599_v25 = vpack.c.bf16 %v1122_v21, %v1121_v19 }
 0x124   : > { %v1639_v26 = vpack.c.bf16 %v1138_v22, %v1137_v20  ;;  %v1723_v27 = vadd.f32 %v1722_v23, %v1721_v15  ;;  %v1771_v28 = vadd.f32 %v1770_v24, %v1769_v16  ;;  %v1091_v31 = vmul.f32 0.2, %v1027_v17 }
 0x125   : > { %v1724_v29 = vpop.f32.mrf.mxu0  ;;  %v1772_v30 = vpop.f32.mrf.mxu1  ;;  %1655 = vst [vmem:[%s2055_s14 + $0x28] sm:$0xff] %v1599_v25   ;;  %v1107_v32 = vmul.f32 0.2, %v1043_v18  ;;  %vm1059_vm8 = vcmp.gt.f32.partialorder %v1027_v17, 0.0  ;;  %vm1075_vm9 = vcmp.gt.f32.partialorder %v1043_v18, 0.0 }
 0x126   : > { %1663 = vst [vmem:[%s2055_s14 + $0x68] sm:$0xff] %v1639_v26   ;;  %v1028_v33 = vadd.f32 %v1723_v27, %v2045_v51  ;;  %v1044_v34 = vadd.f32 %v1771_v28, %v2045_v51  ;;  %v1123_v43 = vsel %vm1059_vm8, %v1027_v17, %v1091_v31 }
 0x127   : > { %v1725_v35 = vpop.f32.mrf.mxu0  ;;  %v1773_v36 = vpop.f32.mrf.mxu1  ;;  %v1139_v44 = vsel %vm1075_vm9, %v1043_v18, %v1107_v32 }
 0x128   : > { %v1726_v37 = vadd.f32 %v1725_v35, %v1724_v29  ;;  %v1774_v38 = vadd.f32 %v1773_v36, %v1772_v30  ;;  %vm1060_vm10 = vcmp.gt.f32.partialorder %v1028_v33, 0.0  ;;  %v1092_v39 = vmul.f32 0.2, %v1028_v33 }
 0x129   : > { %vm1076_vm11 = vcmp.gt.f32.partialorder %v1044_v34, 0.0  ;;  %v1108_v40 = vmul.f32 0.2, %v1044_v34  ;;  %v1727_v41 = vpop.f32.mrf.mxu0  ;;  %v1775_v42 = vpop.f32.mrf.mxu1 }
 0x12a   : > { %v1124_v45 = vsel %vm1060_vm10, %v1028_v33, %v1092_v39  ;;  %v1029_v47 = vadd.f32 %v1726_v37, %v2045_v51  ;;  %v1045_v48 = vadd.f32 %v1774_v38, %v2045_v51 }
 0x12b   : > { %v1140_v46 = vsel %vm1076_vm11, %v1044_v34, %v1108_v40  ;;  %v1728_v49 = vpop.f32.mrf.mxu0  ;;  %v1776_v50 = vpop.f32.mrf.mxu1  ;;  %v1604_v52 = vpack.c.bf16 %v1124_v45, %v1123_v43 }
 0x12c   : > { %v1644_v53 = vpack.c.bf16 %v1140_v46, %v1139_v44  ;;  %v1729_v54 = vadd.f32 %v1728_v49, %v1727_v41  ;;  %v1777_v55 = vadd.f32 %v1776_v50, %v1775_v42  ;;  %v1093_v56 = vmul.f32 0.2, %v1029_v47 }
 0x12d   : > { %1656 = vst [vmem:[%s2055_s14 + $0x30] sm:$0xff] %v1604_v52   ;;  %v1109_v57 = vmul.f32 0.2, %v1045_v48  ;;  %vm1061_vm12 = vcmp.gt.f32.partialorder %v1029_v47, 0.0  ;;  %vm1077_vm13 = vcmp.gt.f32.partialorder %v1045_v48, 0.0 }
 0x12e   : > { %1664 = vst [vmem:[%s2055_s14 + $0x70] sm:$0xff] %v1644_v53   ;;  %v1030_v58 = vadd.f32 %v1729_v54, %v2045_v51  ;;  %v1046_v59 = vadd.f32 %v1777_v55, %v2045_v51  ;;  %v1125_v62 = vsel %vm1061_vm12, %v1029_v47, %v1093_v56 }
 0x12f   : > { %v1141_v63 = vsel %vm1077_vm13, %v1045_v48, %v1109_v57 }
 0x130   : > { %vm1062_vm14 = vcmp.gt.f32.partialorder %v1030_v58, 0.0  ;;  %v1094_v60 = vmul.f32 0.2, %v1030_v58  ;;  %vm1078_vm15 = vcmp.gt.f32.partialorder %v1046_v59, 0.0  ;;  %v1110_v61 = vmul.f32 0.2, %v1046_v59 }
 0x132   : > { %v1126_v0 = vsel %vm1062_vm14, %v1030_v58, %v1094_v60  ;;  %v1142_v1 = vsel %vm1078_vm15, %v1046_v59, %v1110_v61 }
 0x133   : > { %v1609_v2 = vpack.c.bf16 %v1126_v0, %v1125_v62  ;;  %v1649_v3 = vpack.c.bf16 %v1142_v1, %v1141_v63 }
 0x135   : > { %1657 = vst [vmem:[%s2055_s14 + $0x38] sm:$0xff] %v1609_v2   ;;  %1665 = vst [vmem:[%s2055_s14 + $0x78] sm:$0xff] %v1649_v3  }
 0x136 PF: > { %s15_s20 = sadd.s32 1, %s1904_s20   ;;  %s2116_s18 = smov %s1900_s19 }
 0x137   : > { %p12_p5 = scmp.ge.s32.totalorder %s15_s20, 4   ;;  %s2117_s19 = smov %s2119_s2 }
 0x139   :  { %14 = sbr.rel (!%p12_p5) target bundleno = 2 (0x2), region = 90 }

// kernel: patchgan_forward.6
= control target key start
LH: loop header
LB: loop body
LE: loop exit
PB: predicated region body
PF: predicated region fallthrough
CT: control target
= control target key end

     0   :  { %s2137_s21 = smov 0   ;;  %s2139_s22 = smov 0   ;;  %s2444_s0 = inlined_call_operand.vmem [shape: bf16[128,1024], index: 0, kind: input, shape index: {}]   ;;  %s2445_s1 = inlined_call_operand.vmem [shape: bf16[1024,128], index: 1, kind: input, shape index: {}]   ;;  %s2446_s2 = inlined_call_operand.vmem [shape: f32[1,1024], index: 2, kind: input, shape index: {}, may-alias: {2,3}]   ;;  %s2447_s3 = inlined_call_operand.vmem [shape: f32[1,1024], index: 3, kind: input, shape index: {}, may-alias: {2,3}]   ;;  %s2448_s4 = inlined_call_operand.vmem [shape: f32[1,128], index: 4, kind: input, shape index: {}]   ;;  %s2449_s5 = inlined_call_operand.vmem [shape: bf16[128,128], index: 5, kind: output, shape index: {0}]   ;;  %s2450_s6 = inlined_call_operand.vmem [shape: f32[16,128], index: 6, kind: output, shape index: {1}]  }
   0x1   :  { %s2141_s23 = smov 0  }
   0x2 LB: > { %s36_s2 = sadd.s32 1, %s2096_s22  ;;  %p1685_p0 = scmp.ge.s32.totalorder %s2100_s23, 1  ;;  %s2100_s23 = sphi %s2141_s23, %s17_s23   ;;  %s2096_s22 = sphi %s2139_s22, %s2452_s22   ;;  %s2092_s21 = sphi %s2137_s21, %s2451_s21  }
   0x3   : > { %p38_p1 = scmp.ge.s32.totalorder %s36_s2, 2  ;;  %p291_p2 = scmp.lt.s32.totalorder %s2100_s23, 3 }
   0x5   : > { %s2454_s2 = smov (%p38_p1, %s36_s2), 0  ;;  %p292_p3 = pnand %p1685_p0, %p291_p2 }
   0x6   : > { %s1686_s7 = sshll.u32 (!%p292_p3), %s2092_s21, 3  ;;  %p398_p5 = scmp.lt.s32.totalorder (!%p292_p3), %s2092_s21, 1 }
   0x7   : > { %295 = sbr.rel (%p292_p3) target bundleno = 326 (0x146), region = 40  ;;  %p357_p4 = scmp.lt.s32.totalorder (!%p292_p3), %s1686_s7, 15 }
   0xc   : > { %v2014_v0 = vld [vmem:[%s2445_s1 + $0x78] sm:$0xff]   ;;  %v2018_v4 = vld [vmem:[%s2445_s1 + $0x70] sm:$0xff]   ;;  %v2022_v8 = vld [vmem:[%s2445_s1 + $0x68] sm:$0xff]   ;;  %s2456_s7 = smov (!%p357_p4, %s1686_s7), 15  ;;  %s2458_s21 = smov (!%p398_p5, %s2092_s21), 1 }
   0xd   : > { %v2015_v1 = vld [vmem:[%s2445_s1 + $0xf8] sm:$0xff]   ;;  %1830 = vmatprep.subr.bf16.mxu0 %v2014_v0  ;;  %v2019_v5 = vld [vmem:[%s2445_s1 + $0xf0] sm:$0xff]   ;;  %v2023_v9 = vld [vmem:[%s2445_s1 + $0xe8] sm:$0xff]   ;;  %s1798_s8 = sshll.u32 %s2456_s7, 5 }
   0xe   : > { %v2016_v2 = vld [vmem:[%s2445_s1 + $0x38] sm:$0xff]   ;;  %1870 = vmatprep.subr.bf16.mxu1 %v2015_v1  ;;  %v2020_v6 = vld [vmem:[%s2445_s1 + $0x30] sm:$0xff]   ;;  %v2024_v10 = vld [vmem:[%s2445_s1 + $0x28] sm:$0xff]   ;;  %s2254_s17 = scalar_lea.vmem %s2444_s0, %s1798_s8 }
   0xf   : > { %v2017_v3 = vld [vmem:[%s2445_s1 + $0xb8] sm:$0xff]   ;;  %1831 = vmatpush3.bf16.msra.mxu0 %v2016_v2  ;;  %v2021_v7 = vld [vmem:[%s2445_s1 + $0xb0] sm:$0xff]   ;;  %v2025_v11 = vld [vmem:[%s2445_s1 + $0xa8] sm:$0xff]  }
  0x10   : > { %1871 = vmatpush3.bf16.msra.mxu1 %v2017_v3  ;;  %1832 = vmatprep.subr.bf16.mxu0 %v2018_v4  ;;  %v2026_v12 = vld [vmem:[%s2445_s1 + $0x60] sm:$0xff]   ;;  %v2030_v16 = vld [vmem:[%s2445_s1 + $0x58] sm:$0xff]   ;;  %v2034_v20 = vld [vmem:[%s2445_s1 + $0x50] sm:$0xff]  }
  0x11   : > { %1872 = vmatprep.subr.bf16.mxu1 %v2019_v5  ;;  %v2027_v13 = vld [vmem:[%s2445_s1 + $0xe0] sm:$0xff]   ;;  %v2031_v17 = vld [vmem:[%s2445_s1 + $0xd8] sm:$0xff]   ;;  %v2035_v21 = vld [vmem:[%s2445_s1 + $0xd0] sm:$0xff]  }
  0x12   : > { %v2028_v14 = vld [vmem:[%s2445_s1 + $0x20] sm:$0xff]   ;;  %v2032_v18 = vld [vmem:[%s2445_s1 + $0x18] sm:$0xff]   ;;  %v2036_v22 = vld [vmem:[%s2445_s1 + $0x10] sm:$0xff]  }
  0x13   : > { %1833 = vmatpush3.bf16.msra.mxu0 %v2020_v6  ;;  %v2029_v15 = vld [vmem:[%s2445_s1 + $0xa0] sm:$0xff]   ;;  %v2033_v19 = vld [vmem:[%s2445_s1 + $0x98] sm:$0xff]   ;;  %v2037_v23 = vld [vmem:[%s2445_s1 + $0x90] sm:$0xff]  }
  0x14   : > { %1873 = vmatpush3.bf16.msra.mxu1 %v2021_v7  ;;  %1834 = vmatprep.subr.bf16.mxu0 %v2022_v8  ;;  %v2038_v24 = vld [vmem:[%s2445_s1 + $0x48] sm:$0xff]   ;;  %v2042_v28 = vld [vmem:[%s2445_s1 + $0x40] sm:$0xff]   ;;  %v2046_v40 = vld [vmem:[%s2445_s1 + $0x178] sm:$0xff]  }
  0x15   : > { %1874 = vmatprep.subr.bf16.mxu1 %v2023_v9  ;;  %v2039_v25 = vld [vmem:[%s2445_s1 + $0xc8] sm:$0xff]   ;;  %v2043_v29 = vld [vmem:[%s2445_s1 + $0xc0] sm:$0xff]   ;;  %v2047_v41 = vld [vmem:[%s2445_s1 + $0x1f8] sm:$0xff]  }
  0x16   : > { %v2040_v26 = vld [vmem:[%s2445_s1 + $0x8] sm:$0xff]   ;;  %v2044_v30 = vld [vmem:[%s2445_s1] sm:$0xff]   ;;  %v2048_v42 = vld [vmem:[%s2445_s1 + $0x138] sm:$0xff]  }
  0x17   : > { %1835 = vmatpush3.bf16.msra.mxu0 %v2024_v10  ;;  %v2041_v27 = vld [vmem:[%s2445_s1 + $0x88] sm:$0xff]   ;;  %v2045_v31 = vld [vmem:[%s2445_s1 + $0x80] sm:$0xff]   ;;  %v2049_v43 = vld [vmem:[%s2445_s1 + $0x1b8] sm:$0xff]  }
  0x18   : > { %1875 = vmatpush3.bf16.msra.mxu1 %v2025_v11  ;;  %1836 = vmatprep.subr.bf16.mxu0 %v2026_v12  ;;  %v418_v32 = vld [vmem:[%s2254_s17] sm:$0xff]  ;;  %v419_v34 = vld [vmem:[%s2254_s17 + $0x8] sm:$0xff]  ;;  %v2050_v44 = vld [vmem:[%s2445_s1 + $0x170] sm:$0xff]  }
  0x19   : > { %1876 = vmatprep.subr.bf16.mxu1 %v2027_v13  ;;  %v422_v33 = vld [vmem:[%s2254_s17 + $0x20] sm:$0xff]  ;;  %v423_v37 = vld [vmem:[%s2254_s17 + $0x28] sm:$0xff]  ;;  %v2051_v45 = vld [vmem:[%s2445_s1 + $0x1f0] sm:$0xff]  }
  0x1a   : > { %v1692_v35 = vcombine.low %v418_v32, %v422_v33  ;;  %v1693_v36 = vcombine.high %v418_v32, %v422_v33  ;;  %v1694_v38 = vcombine.low %v419_v34, %v423_v37  ;;  %v1695_v39 = vcombine.high %v419_v34, %v423_v37  ;;  %v2052_v46 = vld [vmem:[%s2445_s1 + $0x130] sm:$0xff]   ;;  %v426_v48 = vld [vmem:[%s2254_s17 + $0x40] sm:$0xff]  ;;  %v427_v51 = vld [vmem:[%s2254_s17 + $0x48] sm:$0xff] }
  0x1b   : > { %1837 = vmatpush3.bf16.msra.mxu0 %v2028_v14  ;;  %v2053_v47 = vld [vmem:[%s2445_s1 + $0x1b0] sm:$0xff]   ;;  %v430_v49 = vld [vmem:[%s2254_s17 + $0x60] sm:$0xff]  ;;  %v431_v52 = vld [vmem:[%s2254_s17 + $0x68] sm:$0xff] }
  0x1c   : > { %1877 = vmatpush3.bf16.msra.mxu1 %v2029_v15  ;;  %1838 = vmatprep.subr.bf16.mxu0 %v2030_v16  ;;  %v1701_v50 = vcombine.high %v426_v48, %v430_v49  ;;  %v1700_v53 = vcombine.low %v426_v48, %v430_v49  ;;  %v1703_v54 = vcombine.high %v427_v51, %v431_v52  ;;  %v2054_v56 = vld [vmem:[%s2445_s1 + $0x168] sm:$0xff]   ;;  %v2058_v60 = vld [vmem:[%s2445_s1 + $0x160] sm:$0xff]   ;;  %v2062_v8 = vld [vmem:[%s2445_s1 + $0x158] sm:$0xff]  }
  0x1d   : > { %1878 = vmatprep.subr.bf16.mxu1 %v2031_v17  ;;  %1162 = vmatprep.mubr.bf16.mxu0 %v1693_v36  ;;  %v1702_v55 = vcombine.low %v427_v51, %v431_v52  ;;  %v2055_v57 = vld [vmem:[%s2445_s1 + $0x1e8] sm:$0xff]   ;;  %v2059_v61 = vld [vmem:[%s2445_s1 + $0x1e0] sm:$0xff]   ;;  %v2063_v9 = vld [vmem:[%s2445_s1 + $0x1d8] sm:$0xff]  }
  0x1e   : > { %1227 = vmatprep.mubr.bf16.mxu1 %v1695_v39  ;;  %v2056_v58 = vld [vmem:[%s2445_s1 + $0x128] sm:$0xff]   ;;  %v2060_v62 = vld [vmem:[%s2445_s1 + $0x120] sm:$0xff]   ;;  %v2064_v10 = vld [vmem:[%s2445_s1 + $0x118] sm:$0xff]  }
  0x1f   : > { %1839 = vmatpush3.bf16.msra.mxu0 %v2032_v18  ;;  %v2057_v59 = vld [vmem:[%s2445_s1 + $0x1a8] sm:$0xff]   ;;  %v2061_v63 = vld [vmem:[%s2445_s1 + $0x1a0] sm:$0xff]   ;;  %v2065_v11 = vld [vmem:[%s2445_s1 + $0x198] sm:$0xff]  }
  0x20   : > { %1879 = vmatpush3.bf16.msra.mxu1 %v2033_v19  ;;  %1840 = vmatprep.subr.bf16.mxu0 %v2034_v20  ;;  %v434_v0 = vld [vmem:[%s2254_s17 + $0x80] sm:$0xff]  ;;  %v435_v2 = vld [vmem:[%s2254_s17 + $0x88] sm:$0xff]  ;;  %v2066_v12 = vld [vmem:[%s2445_s1 + $0x150] sm:$0xff]  }
  0x21   : > { %1880 = vmatprep.subr.bf16.mxu1 %v2035_v21  ;;  %v438_v1 = vld [vmem:[%s2254_s17 + $0xa0] sm:$0xff]  ;;  %v439_v3 = vld [vmem:[%s2254_s17 + $0xa8] sm:$0xff]  ;;  %v2067_v13 = vld [vmem:[%s2445_s1 + $0x1d0] sm:$0xff]  }
  0x22   : > { %v1709_v4 = vcombine.high %v434_v0, %v438_v1  ;;  %v1711_v5 = vcombine.high %v435_v2, %v439_v3  ;;  %v1708_v6 = vcombine.low %v434_v0, %v438_v1  ;;  %v1710_v7 = vcombine.low %v435_v2, %v439_v3  ;;  %v2068_v14 = vld [vmem:[%s2445_s1 + $0x110] sm:$0xff]   ;;  %v442_v16 = vld [vmem:[%s2254_s17 + $0xc0] sm:$0xff]  ;;  %v443_v18 = vld [vmem:[%s2254_s17 + $0xc8] sm:$0xff] }
  0x23   : > { %1841 = vmatpush3.bf16.msra.mxu0 %v2036_v22  ;;  %v2069_v15 = vld [vmem:[%s2445_s1 + $0x190] sm:$0xff]   ;;  %v446_v17 = vld [vmem:[%s2254_s17 + $0xe0] sm:$0xff]  ;;  %v447_v20 = vld [vmem:[%s2254_s17 + $0xe8] sm:$0xff] }
  0x24   : > { %1881 = vmatpush3.bf16.msra.mxu1 %v2037_v23  ;;  %1842 = vmatprep.subr.bf16.mxu0 %v2038_v24  ;;  %v1717_v19 = vcombine.high %v442_v16, %v446_v17  ;;  %v1716_v21 = vcombine.low %v442_v16, %v446_v17  ;;  %v1719_v22 = vcombine.high %v443_v18, %v447_v20  ;;  %v2070_v24 = vld [vmem:[%s2445_s1 + $0x148] sm:$0xff]   ;;  %v420_v32 = vld [vmem:[%s2254_s17 + $0x10] sm:$0xff]  ;;  %v421_v36 = vld [vmem:[%s2254_s17 + $0x18] sm:$0xff] }
  0x25   : > { %1882 = vmatprep.subr.bf16.mxu1 %v2039_v25  ;;  %v1718_v23 = vcombine.low %v443_v18, %v447_v20  ;;  %v2071_v25 = vld [vmem:[%s2445_s1 + $0x1c8] sm:$0xff]   ;;  %v424_v33 = vld [vmem:[%s2254_s17 + $0x30] sm:$0xff]  ;;  %v425_v37 = vld [vmem:[%s2254_s17 + $0x38] sm:$0xff] }
  0x26   : > { %v1696_v34 = vcombine.low %v420_v32, %v424_v33  ;;  %v1698_v39 = vcombine.low %v421_v36, %v425_v37  ;;  %v437_v48 = vld [vmem:[%s2254_s17 + $0x98] sm:$0xff] }
  0x27   : > { %1843 = vmatpush3.bf16.msra.mxu0 %v2040_v26  ;;  %v2072_v26 = vld [vmem:[%s2445_s1 + $0x108] sm:$0xff]   ;;  %v441_v49 = vld [vmem:[%s2254_s17 + $0xb8] sm:$0xff] }
  0x28   : > { %1883 = vmatpush3.bf16.msra.mxu1 %v2041_v27  ;;  %1844 = vmatprep.subr.bf16.mxu0 %v2042_v28  ;;  %v2073_v27 = vld [vmem:[%s2445_s1 + $0x188] sm:$0xff]   ;;  %v2074_v28 = vld [vmem:[%s2445_s1 + $0x140] sm:$0xff]  }
  0x29   : > { %1884 = vmatprep.subr.bf16.mxu1 %v2043_v29  ;;  %v2075_v29 = vld [vmem:[%s2445_s1 + $0x1c0] sm:$0xff]  }
  0x2b   : > { %1845 = vmatpush3.bf16.msra.mxu0 %v2044_v30  ;;  %v2076_v30 = vld [vmem:[%s2445_s1 + $0x100] sm:$0xff]  }
  0x2c   : > { %1885 = vmatpush3.bf16.msra.mxu1 %v2045_v31  ;;  %1910 = vmatprep.subr.bf16.mxu0 %v2046_v40  ;;  %v2077_v31 = vld [vmem:[%s2445_s1 + $0x180] sm:$0xff]   ;;  %v1699_v40 = vcombine.high %v421_v36, %v425_v37 }
  0x2d   : > { %1950 = vmatprep.subr.bf16.mxu1 %v2047_v41  ;;  %v432_v41 = vld [vmem:[%s2254_s17 + $0x70] sm:$0xff] }
  0x2e   : > { %1163 = vmatmul.mubr.bf16.vlgmr.msra.gmra.mxu0 %v1692_v35  ;;  %v1697_v35 = vcombine.high %v420_v32, %v424_v33 }
  0x2f   : > { %1228 = vmatmul.mubr.bf16.vlgmr.msra.gmra.mxu1 %v1694_v38  ;;  %1911 = vmatpush3.bf16.msra.mxu0 %v2048_v42  ;;  %v428_v38 = vld [vmem:[%s2254_s17 + $0x50] sm:$0xff]  ;;  %v429_v42 = vld [vmem:[%s2254_s17 + $0x58] sm:$0xff] }
  0x30   : > { %1951 = vmatpush3.bf16.msra.mxu1 %v2049_v43  ;;  %1912 = vmatprep.subr.bf16.mxu0 %v2050_v44  ;;  %v433_v43 = vld [vmem:[%s2254_s17 + $0x78] sm:$0xff]  ;;  %v1705_v44 = vcombine.high %v428_v38, %v432_v41 }
  0x31   : > { %1952 = vmatprep.subr.bf16.mxu1 %v2051_v45  ;;  %1170 = vmatprep.mubr.bf16.mxu0 %v1701_v50  ;;  %v1707_v45 = vcombine.high %v429_v42, %v433_v43  ;;  %v1704_v50 = vcombine.low %v428_v38, %v432_v41  ;;  %v1706_v51 = vcombine.low %v429_v42, %v433_v43 }
  0x32   : > { %1235 = vmatprep.mubr.bf16.mxu1 %v1703_v54  ;;  %v444_v54 = vld [vmem:[%s2254_s17 + $0xd0] sm:$0xff] }
  0x33   : > { %1913 = vmatpush3.bf16.msra.mxu0 %v2052_v46  ;;  %v436_v46 = vld [vmem:[%s2254_s17 + $0x90] sm:$0xff] }
  0x34   : > { %1953 = vmatpush3.bf16.msra.mxu1 %v2053_v47  ;;  %1914 = vmatprep.subr.bf16.mxu0 %v2054_v56  ;;  %v440_v47 = vld [vmem:[%s2254_s17 + $0xb0] sm:$0xff]  ;;  %v445_v56 = vld [vmem:[%s2254_s17 + $0xd8] sm:$0xff] }
  0x35   : > { %1954 = vmatprep.subr.bf16.mxu1 %v2055_v57  ;;  %v1713_v52 = vcombine.high %v436_v46, %v440_v47  ;;  %v449_v57 = vld [vmem:[%s2254_s17 + $0xf8] sm:$0xff] }
  0x36   : > { %1171 = vmatmul.mubr.bf16.gmra.mxu0 %v1700_v53  ;;  %v1715_v53 = vcombine.high %v437_v48, %v441_v49 }
  0x37   : > { %1236 = vmatmul.mubr.bf16.gmra.mxu1 %v1702_v55  ;;  %1915 = vmatpush3.bf16.msra.mxu0 %v2056_v58  ;;  %v448_v55 = vld [vmem:[%s2254_s17 + $0xf0] sm:$0xff]  ;;  %v1712_v58 = vcombine.low %v436_v46, %v440_v47  ;;  %s1690_s17 = sshll.u32 %s2456_s7, 2  ;;  %s1691_s7 = sshll.u32 %s2458_s21, 3 }
  0x38   : > { %1955 = vmatpush3.bf16.msra.mxu1 %v2057_v59  ;;  %1916 = vmatprep.subr.bf16.mxu0 %v2058_v60  ;;  %v1714_v59 = vcombine.low %v437_v48, %v441_v49  ;;  %v1721_v60 = vcombine.high %v444_v54, %v448_v55  ;;  %s2414_s26 = scalar_lea.vmem %s2449_s5, %s1690_s17  ;;  %s404_s29 = scalar_lea.vmem %s2450_s6, %s1691_s7 }
  0x39   : > { %1956 = vmatprep.subr.bf16.mxu1 %v2059_v61  ;;  %1178 = vmatprep.mubr.bf16.mxu0 %v1709_v4  ;;  %v1723_v61 = vcombine.high %v445_v56, %v449_v57 }
  0x3a   : > { %1243 = vmatprep.mubr.bf16.mxu1 %v1711_v5 }
  0x3b   : > { %1917 = vmatpush3.bf16.msra.mxu0 %v2060_v62  ;;  %v1720_v62 = vcombine.low %v444_v54, %v448_v55 }
  0x3c   : > { %1957 = vmatpush3.bf16.msra.mxu1 %v2061_v63  ;;  %1918 = vmatprep.subr.bf16.mxu0 %v2062_v8  ;;  %v1722_v63 = vcombine.low %v445_v56, %v449_v57 }
  0x3d   : > { %1958 = vmatprep.subr.bf16.mxu1 %v2063_v9 }
  0x3e   : > { %1179 = vmatmul.mubr.bf16.gmra.mxu0 %v1708_v6 }
  0x3f   : > { %1244 = vmatmul.mubr.bf16.gmra.mxu1 %v1710_v7  ;;  %1919 = vmatpush3.bf16.msra.mxu0 %v2064_v10 }
  0x40   : > { %1959 = vmatpush3.bf16.msra.mxu1 %v2065_v11  ;;  %1920 = vmatprep.subr.bf16.mxu0 %v2066_v12 }
  0x41   : > { %1960 = vmatprep.subr.bf16.mxu1 %v2067_v13  ;;  %1186 = vmatprep.mubr.bf16.mxu0 %v1717_v19 }
  0x42   : > { %1251 = vmatprep.mubr.bf16.mxu1 %v1719_v22 }
  0x43   : > { %1921 = vmatpush3.bf16.msra.mxu0 %v2068_v14 }
  0x44   : > { %1961 = vmatpush3.bf16.msra.mxu1 %v2069_v15  ;;  %1922 = vmatprep.subr.bf16.mxu0 %v2070_v24 }
  0x45   : > { %1962 = vmatprep.subr.bf16.mxu1 %v2071_v25 }
  0x46   : > { %1187 = vmatmul.mubr.bf16.gmra.mxu0 %v1716_v21 }
  0x47   : > { %1252 = vmatmul.mubr.bf16.gmra.mxu1 %v1718_v23  ;;  %1923 = vmatpush3.bf16.msra.mxu0 %v2072_v26 }
  0x48   : > { %1963 = vmatpush3.bf16.msra.mxu1 %v2073_v27  ;;  %1924 = vmatprep.subr.bf16.mxu0 %v2074_v28 }
  0x49   : > { %1964 = vmatprep.subr.bf16.mxu1 %v2075_v29  ;;  %1292 = vmatprep.mubr.bf16.mxu0 %v1697_v35 }
  0x4a   : > { %1357 = vmatprep.mubr.bf16.mxu1 %v1699_v40 }
  0x4b   : > { %1925 = vmatpush3.bf16.msra.mxu0 %v2076_v30 }
  0x4c   : > { %1965 = vmatpush3.bf16.msra.mxu1 %v2077_v31 }
  0x4e   : > { %1293 = vmatmul.mubr.bf16.vlgmr.msra.gmra.mxu0 %v1696_v34 }
  0x4f   : > { %1358 = vmatmul.mubr.bf16.vlgmr.msra.gmra.mxu1 %v1698_v39  ;;  %1300 = vmatprep.mubr.bf16.mxu0 %v1705_v44 }
  0x50   : > { %1365 = vmatprep.mubr.bf16.mxu1 %v1707_v45 }
  0x56   : > { %1301 = vmatmul.mubr.bf16.gmra.mxu0 %v1704_v50 }
  0x57   : > { %1366 = vmatmul.mubr.bf16.gmra.mxu1 %v1706_v51  ;;  %1308 = vmatprep.mubr.bf16.mxu0 %v1713_v52 }
  0x58   : > { %1373 = vmatprep.mubr.bf16.mxu1 %v1715_v53 }
  0x5e   : > { %1309 = vmatmul.mubr.bf16.gmra.mxu0 %v1712_v58 }
  0x5f   : > { %1374 = vmatmul.mubr.bf16.gmra.mxu1 %v1714_v59  ;;  %1316 = vmatprep.mubr.bf16.mxu0 %v1721_v60 }
  0x60   : > { %1381 = vmatprep.mubr.bf16.mxu1 %v1723_v61 }
  0x66   : > { %1317 = vmatmul.mubr.bf16.gmra.mxu0 %v1720_v62 }
  0x67   : > { %1382 = vmatmul.mubr.bf16.gmra.mxu1 %v1722_v63 }
  0xee   : > { %v1846_v0 = vpop.f32.mrf.mxu0 }
  0xef   : > { %v1886_v1 = vpop.f32.mrf.mxu1 }
  0xf0   : > { %v1847_v2 = vpop.f32.mrf.mxu0 }
  0xf1   : > { %v1887_v3 = vpop.f32.mrf.mxu1  ;;  %v1848_v33 = vadd.f32 %v1847_v2, %v1846_v0 }
  0xf2   : > { %v1849_v4 = vpop.f32.mrf.mxu0  ;;  %v1888_v34 = vadd.f32 %v1887_v3, %v1886_v1 }
  0xf3   : > { %v1889_v5 = vpop.f32.mrf.mxu1 }
  0xf4   : > { %v1850_v6 = vpop.f32.mrf.mxu0  ;;  %v1230_v42 = vadd.f32 %v1888_v34, %v1848_v33 }
  0xf5   : > { %v1890_v7 = vpop.f32.mrf.mxu1  ;;  %v1851_v37 = vadd.f32 %v1850_v6, %v1849_v4 }
  0xf6   : > { %v1852_v8 = vpop.f32.mrf.mxu0  ;;  %v1891_v38 = vadd.f32 %v1890_v7, %v1889_v5 }
  0xf7   : > { %v1892_v9 = vpop.f32.mrf.mxu1 }
  0xf8   : > { %v1853_v10 = vpop.f32.mrf.mxu0  ;;  %v1233_v45 = vadd.f32 %v1891_v38, %v1851_v37 }
  0xf9   : > { %v1893_v11 = vpop.f32.mrf.mxu1  ;;  %v1854_v49 = vadd.f32 %v1853_v10, %v1852_v8 }
  0xfa   : > { %v1855_v12 = vpop.f32.mrf.mxu0  ;;  %v1894_v51 = vadd.f32 %v1893_v11, %v1892_v9 }
  0xfb   : > { %v1895_v13 = vpop.f32.mrf.mxu1 }
  0xfc   : > { %v1856_v14 = vpop.f32.mrf.mxu0  ;;  %v1238_v0 = vadd.f32 %v1894_v51, %v1854_v49 }
  0xfd   : > { %v1896_v15 = vpop.f32.mrf.mxu1  ;;  %v1857_v56 = vadd.f32 %v1856_v14, %v1855_v12 }
  0xfe   : > { %v1858_v16 = vpop.f32.mrf.mxu0  ;;  %v1897_v58 = vadd.f32 %v1896_v15, %v1895_v13 }
  0xff   : > { %v1898_v17 = vpop.f32.mrf.mxu1 }
 0x100   : > { %v1859_v18 = vpop.f32.mrf.mxu0  ;;  %v1241_v6 = vadd.f32 %v1897_v58, %v1857_v56 }
 0x101   : > { %v1899_v19 = vpop.f32.mrf.mxu1  ;;  %v1860_v3 = vadd.f32 %v1859_v18, %v1858_v16 }
 0x102   : > { %v2390_v20 = vpop.f32.mrf.mxu0  ;;  %v1900_v4 = vadd.f32 %v1899_v19, %v1898_v17 }
 0x103   : > { %v2392_v21 = vpop.f32.mrf.mxu1 }
 0x104   : > { %v1862_v22 = vpop.f32.mrf.mxu0  ;;  %v1246_v15 = vadd.f32 %v1900_v4, %v1860_v3 }
 0x105   : > { %v1902_v23 = vpop.f32.mrf.mxu1 }
 0x106   : > { %v2394_v24 = vpop.f32.mrf.mxu0  ;;  %v1903_v34 = vadd.f32 %v1902_v23, %v2392_v21 }
 0x107   : > { %v2396_v25 = vpop.f32.mrf.mxu1 }
 0x108   : > { %v2398_v26 = vpop.f32.mrf.mxu0 }
 0x109   : > { %v2400_v27 = vpop.f32.mrf.mxu1 }
 0x10a   : > { %v2402_v28 = vpop.f32.mrf.mxu0 }
 0x10b   : > { %v2404_v29 = vpop.f32.mrf.mxu1 }
 0x10c   : > { %v2406_v30 = vpop.f32.mrf.mxu0 }
 0x10d   : > { %v2408_v31 = vpop.f32.mrf.mxu1  ;;  %v1869_v51 = vadd.f32 %v2406_v30, %v2402_v28 }
 0x10e   : > { %v1926_v32 = vpop.f32.mrf.mxu0 }
 0x10f   : > { %v1966_v35 = vpop.f32.mrf.mxu1 }
 0x110   : > { %v1927_v36 = vpop.f32.mrf.mxu0 }
 0x111   : > { %v1928_v39 = vadd.f32 %v1927_v36, %v1926_v32  ;;  %v1967_v40 = vpop.f32.mrf.mxu1  ;;  %v1863_v32 = vadd.f32 %v1862_v22, %v2390_v20  ;;  %v1906_v20 = vadd.f32 %v2400_v27, %v2396_v25 }
 0x112   : > { %v1929_v41 = vpop.f32.mrf.mxu0  ;;  %v1968_v52 = vadd.f32 %v1967_v40, %v1966_v35 }
 0x113   : > { %v1969_v43 = vpop.f32.mrf.mxu1  ;;  %v1295_v46 = vadd.f32 %v1928_v39, %v1230_v42  ;;  %v1249_v42 = vadd.f32 %v1903_v34, %v1863_v32 }
 0x114   : > { %v1930_v44 = vpop.f32.mrf.mxu0 }
 0x115   : > { %v1931_v47 = vadd.f32 %v1930_v44, %v1929_v41  ;;  %v1970_v48 = vpop.f32.mrf.mxu1  ;;  %v1360_v59 = vadd.f32 %v1968_v52, %v1295_v46 }
 0x116   : > { %v1932_v50 = vpop.f32.mrf.mxu0  ;;  %v1971_v54 = vadd.f32 %v1970_v48, %v1969_v43  ;;  %v1866_v43 = vadd.f32 %v2398_v26, %v2394_v24  ;;  %v1909_v24 = vadd.f32 %v2408_v31, %v2404_v29 }
 0x117   : > { %v1298_v53 = vadd.f32 %v1931_v47, %v1233_v45  ;;  %v1972_v55 = vpop.f32.mrf.mxu1  ;;  %v1430_v23 = vmul.f32 %v1360_v59, %v1360_v59 }
 0x118   : > { %v1933_v57 = vpop.f32.mrf.mxu0  ;;  %v1254_v27 = vadd.f32 %v1906_v20, %v1866_v43  ;;  %v1257_v30 = vadd.f32 %v1909_v24, %v1869_v51 }
 0x119   : > { %v1363_v60 = vadd.f32 %v1971_v54, %v1298_v53  ;;  %v1934_v61 = vadd.f32 %v1933_v57, %v1932_v50  ;;  %v1973_v62 = vpop.f32.mrf.mxu1 }
 0x11a   : > { %v1935_v63 = vpop.f32.mrf.mxu0  ;;  %v1974_v11 = vadd.f32 %v1973_v62, %v1972_v55 }
 0x11b   : > { %v1810_v1 = vpack.c.bf16 %v1363_v60, %v1360_v59  ;;  %v1975_v2 = vpop.f32.mrf.mxu1  ;;  %v1303_v7 = vadd.f32 %v1934_v61, %v1238_v0  ;;  %v1431_v39 = vmul.f32 %v1363_v60, %v1363_v60  ;;  %v1417_v47 = vadd.f32 %v1363_v60, %v1360_v59 }
 0x11c   : > { %v1936_v5 = vpop.f32.mrf.mxu0 }
 0x11d   : > { %1811 = vst [vmem:[%s2414_s26] sm:$0xff] %v1810_v1   ;;  %v1937_v8 = vadd.f32 %v1936_v5, %v1935_v63  ;;  %v1976_v9 = vpop.f32.mrf.mxu1  ;;  %v1368_v16 = vadd.f32 %v1974_v11, %v1303_v7  ;;  %v1438_v26 = vadd.f32 %v1431_v39, %v1430_v23 }
 0x11e   : > { %v1938_v10 = vpop.f32.mrf.mxu0  ;;  %v1977_v13 = vadd.f32 %v1976_v9, %v1975_v2 }
 0x11f   : > { %v1306_v12 = vadd.f32 %v1937_v8, %v1241_v6  ;;  %v1978_v14 = vpop.f32.mrf.mxu1  ;;  %v1432_v44 = vmul.f32 %v1368_v16, %v1368_v16  ;;  %v1418_v53 = vadd.f32 %v1417_v47, %v1368_v16 }
 0x120   : > { %v1939_v33 = vpop.f32.mrf.mxu0 }
 0x121   : > { %v1371_v17 = vadd.f32 %v1977_v13, %v1306_v12  ;;  %v1940_v18 = vadd.f32 %v1939_v33, %v1938_v10  ;;  %v1979_v19 = vpop.f32.mrf.mxu1  ;;  %v1439_v57 = vadd.f32 %v1438_v26, %v1432_v44 }
 0x122   : > { %v1941_v35 = vpop.f32.mrf.mxu0  ;;  %v1980_v40 = vadd.f32 %v1979_v19, %v1978_v14 }
 0x123   : > { %v1815_v36 = vpack.c.bf16 %v1371_v17, %v1368_v16  ;;  %v1311_v37 = vadd.f32 %v1940_v18, %v1246_v15  ;;  %v1981_v38 = vpop.f32.mrf.mxu1  ;;  %v1433_v52 = vmul.f32 %v1371_v17, %v1371_v17  ;;  %v1419_v60 = vadd.f32 %v1418_v53, %v1371_v17 }
 0x124   : > { %v1942_v41 = vpop.f32.mrf.mxu0  ;;  %v1451_v18 = vlaneseq }
 0x125   : > { %1827 = vst [vmem:[%s2414_s26 + $0x8] sm:$0xff] %v1815_v36   ;;  %v1943_v21 = vadd.f32 %v1942_v41, %v1941_v35  ;;  %v1982_v22 = vpop.f32.mrf.mxu1  ;;  %v1376_v45 = vadd.f32 %v1980_v40, %v1311_v37  ;;  %v1440_v0 = vadd.f32 %v1439_v57, %v1433_v52 }
 0x126   : > { %v1944_v46 = vpop.f32.mrf.mxu0  ;;  %v1983_v49 = vadd.f32 %v1982_v22, %v1981_v38  ;;  %v1452_v38 = vshrl.u32 %v1451_v18, 7 }
 0x127   : > { %v1314_v48 = vadd.f32 %v1943_v21, %v1249_v42  ;;  %v1984_v50 = vpop.f32.mrf.mxu1  ;;  %v1434_v58 = vmul.f32 %v1376_v45, %v1376_v45  ;;  %v1420_v31 = vadd.f32 %v1419_v60, %v1376_v45 }
 0x128   : > { %v1945_v25 = vpop.f32.mrf.mxu0  ;;  %vm1454_vm0 = vcmp.eq.s32.totalorder %v1452_v38, 1  ;;  %vm1453_vm1 = vcmp.eq.s32.totalorder %v1452_v38, 0 }
 0x129   : > { %v1379_v54 = vadd.f32 %v1983_v49, %v1314_v48  ;;  %v1946_v55 = vadd.f32 %v1945_v25, %v1944_v46  ;;  %v1985_v56 = vpop.f32.mrf.mxu1  ;;  %v1441_v5 = vadd.f32 %v1440_v0, %v1434_v58 }
 0x12a   : > { %v1947_v59 = vpop.f32.mrf.mxu0  ;;  %v1986_v63 = vadd.f32 %v1985_v56, %v1984_v50 }
 0x12b   : > { %v1820_v61 = vpack.c.bf16 %v1379_v54, %v1376_v45  ;;  %v1319_v62 = vadd.f32 %v1946_v55, %v1254_v27  ;;  %v1987_v28 = vpop.f32.mrf.mxu1  ;;  %v1435_v1 = vmul.f32 %v1379_v54, %v1379_v54  ;;  %v1421_v6 = vadd.f32 %v1420_v31, %v1379_v54 }
 0x12c   : > { %v1948_v29 = vpop.f32.mrf.mxu0 }
 0x12d   : > { %1828 = vst [vmem:[%s2414_s26 + $0x10] sm:$0xff] %v1820_v61   ;;  %v1384_v2 = vadd.f32 %v1986_v63, %v1319_v62  ;;  %v1949_v3 = vadd.f32 %v1948_v29, %v1947_v59  ;;  %v1988_v4 = vpop.f32.mrf.mxu1  ;;  %v1442_v10 = vadd.f32 %v1441_v5, %v1435_v1 }
 0x12e   : > { %v1989_v9 = vadd.f32 %v1988_v4, %v1987_v28 }
 0x12f   : > { %v1436_v7 = vmul.f32 %v1384_v2, %v1384_v2  ;;  %v1322_v8 = vadd.f32 %v1949_v3, %v1257_v30  ;;  %v1422_v11 = vadd.f32 %v1421_v6, %v1384_v2 }
 0x131   : > { %v1387_v12 = vadd.f32 %v1989_v9, %v1322_v8  ;;  %v1443_v13 = vadd.f32 %v1442_v10, %v1436_v7 }
 0x133   : > { %v1423_v14 = vadd.f32 %v1422_v11, %v1387_v12  ;;  %v1437_v15 = vmul.f32 %v1387_v12, %v1387_v12  ;;  %v1825_v32 = vpack.c.bf16 %v1387_v12, %v1384_v2 }
 0x135   : > { %v1424_v33 = vrot.slane %v1423_v14, 4  ;;  %v1444_v34 = vadd.f32 %v1443_v13, %v1437_v15  ;;  %1829 = vst [vmem:[%s2414_s26 + $0x18] sm:$0xff] %v1825_v32  }
 0x137   : > { %v1425_v16 = vadd.f32 %v1424_v33, %v1423_v14  ;;  %v1445_v17 = vrot.slane %v1444_v34, 4 }
 0x139   : > { %v1426_v19 = vrot.slane %v1425_v16, 2  ;;  %v1446_v35 = vadd.f32 %v1445_v17, %v1444_v34 }
 0x13b   : > { %v1427_v36 = vadd.f32 %v1426_v19, %v1425_v16  ;;  %v1447_v37 = vrot.slane %v1446_v35, 2 }
 0x13d   : > { %v1448_v39 = vadd.f32 %v1447_v37, %v1446_v35  ;;  %v1428_v40 = vrot.slane %v1427_v36, 1 }
 0x13f   : > { %v1449_v41 = vrot.slane %v1448_v39, 1  ;;  %v1429_v43 = vadd.f32 %v1428_v40, %v1427_v36 }
 0x141   : > { %v1450_v42 = vadd.f32 %v1449_v41, %v1448_v39 }
 0x143   : > { %v1455_v20 = vsel %vm1454_vm0, %v1450_v42, 0.0 }
 0x144   : > { %v1456_v21 = vsel %vm1453_vm1, %v1429_v43, %v1455_v20 }
 0x145   : > { %1457 = vst [vmem:[%s404_s29] sm:$0xff] %v1456_v21 }
 0x146 PF: > { %s17_s23 = sadd.s32 1, %s2100_s23   ;;  %s2451_s21 = smov %s2096_s22 }
 0x147   : > { %p14_p6 = scmp.ge.s32.totalorder %s17_s23, 4   ;;  %s2452_s22 = smov %s2454_s2 }
 0x149   :  { %16 = sbr.rel (!%p14_p6) target bundleno = 2 (0x2), region = 102 }

// kernel: tile.33
= control target key start
LH: loop header
LB: loop body
LE: loop exit
PB: predicated region body
PF: predicated region fallthrough
CT: control target
= control target key end

     0   :  { %s28_s0 = inlined_call_operand.vmem [shape: f32[128], index: 0, kind: input, shape index: {}]   ;;  %s29_s1 = inlined_call_operand.vmem [shape: f32[16,128], index: 1, kind: output, shape index: {}]  }
   0x1   :  { %v4_v0 = vld [vmem:[%s28_s0] ss:$0 sm:$0xff] }
   0x2   :  { %5 = vst [vmem:[%s29_s1] sm:$0xff] %v4_v0  ;;  %8 = vst [vmem:[%s29_s1 + $0x8] sm:$0xff] %v4_v0 }

// kernel: patchgan_forward.7
= control target key start
LH: loop header
LB: loop body
LE: loop exit
PB: predicated region body
PF: predicated region fallthrough
CT: control target
= control target key end

     0   :  { %s3509_s0 = inlined_call_operand.vmem [shape: bf16[32,2048], index: 0, kind: input, shape index: {}]   ;;  %s3510_s1 = inlined_call_operand.vmem [shape: bf16[2048,256], index: 1, kind: input, shape index: {}]   ;;  %s3511_s2 = inlined_call_operand.vmem [shape: f32[1,2048], index: 2, kind: input, shape index: {}]   ;;  %s3512_s3 = inlined_call_operand.vmem [shape: f32[1,2048], index: 3, kind: input, shape index: {}]   ;;  %s3513_s4 = inlined_call_operand.vmem [shape: f32[1,256], index: 4, kind: input, shape index: {}]   ;;  %s3514_s5 = inlined_call_operand.vmem [shape: bf16[32,256], index: 5, kind: output, shape index: {0}]   ;;  %s3515_s6 = inlined_call_operand.vmem [shape: f32[8,256], index: 6, kind: output, shape index: {1}]  }
   0x1   :  { %3520 = sst [smem:[#allocation11_spill]] %s3509_s0 }
   0x2   :  { %3521 = sst [smem:[#allocation12_spill]] %s3510_s1 }
   0x3   :  { %s2802_s21 = smov 0   ;;  %s2804_s22 = smov 0  }
   0x4   :  { %s2806_s23 = smov 0   ;;  %s2808_s24 = smov 0  }
   0x5   :  { %s2810_s25 = smov 0   ;;  %s2812_s26 = smov 0  }
   0x6   :  { %s2814_s27 = smov 0   ;;  %s2816_s4 = smov 0  }
   0x7   :  { %s2818_s28 = smov 0   ;;  %s2820_s29 = smov 0  }
   0x8   :  { %s2822_s30 = smov 0  }
   0x9 LB: > { %3522 = sst [smem:[#allocation6_spill]] %s2756_s28  ;;  %s2304_s7 = sadd.s32 4294967295, %s2764_s30   ;;  %s2764_s30 = sphi %s2822_s30, %s17_s30   ;;  %s2760_s29 = sphi %s2820_s29, %s3536_s29   ;;  %s2756_s28 = sphi %s2818_s28, %s3535_s28   ;;  %s2752_s4 = sphi %s2816_s4, %s3543_s4   ;;  %s2748_s27 = sphi %s2814_s27, %s3533_s27   ;;  %s2744_s26 = sphi %s2812_s26, %s3542_s26   ;;  %s2740_s25 = sphi %s2810_s25, %s3541_s25   ;;  %s2736_s24 = sphi %s2808_s24, %s3540_s24   ;;  %s2732_s23 = sphi %s2806_s23, %s3539_s23   ;;  %s2728_s22 = sphi %s2804_s22, %s3538_s22   ;;  %s2724_s21 = sphi %s2802_s21, %s3537_s21  }
   0xa   : > { %3523 = sst [smem:[#allocation7_spill]] %s2760_s29  ;;  %s29_s8 = sadd.s32 1, %s2756_s28 }
   0xb   : > { %p30_p0 = scmp.ge.s32.totalorder %s29_s8, 2  ;;  %s32_s9 = sadd.s32 1, %s2760_s29 }
   0xc   : > { %s45_s10 = sadd.s32 1, %s2744_s26  ;;  %p52_p1 = scmp.ne.s32.totalorder %s2744_s26, %s2740_s25 }
   0xd   : > { %s3545_s8 = smov (%p30_p0, %s29_s8), 0  ;;  %s3547_s9 = smov (!%p30_p0, %s32_s9), %s2760_s29 }
   0xe   : > { %3524 = sst [smem:[#allocation8_spill]] %s3545_s8  ;;  %s41_s11 = ssub.s32 %s2756_s28, %s3545_s8 }
   0xf   : > { %p53_p2 = scmp.eq.s32.totalorder %s2764_s30, 0  ;;  %p34_p3 = scmp.ge.s32.totalorder %s3547_s9, 2 }
  0x10   : > { %p43_p4 = scmp.eq.s32.totalorder %s41_s11, 0  ;;  %s73_s13 = sadd.s32 1, %s2736_s24 }
  0x11   : > { %p2869_p5 = por %p53_p2, %p52_p1  ;;  %s3549_s9 = smov (%p34_p3, %s3547_s9), 0 }
  0x12   : > { %3526 = sst [smem:[#allocation9_spill]] %s3549_s9  ;;  %s69_s15 = ssub.s32 %s2760_s29, %s3549_s9 }
  0x13   : > { %s2877_s14 = scalar_select %p43_p4, %s2744_s26, %s45_s10  }
  0x14   : > { %p80_p6 = scmp.ne.s32.totalorder %s2736_s24, %s2732_s23  ;;  %s70_s16 = sor.u32 %s69_s15, %s41_s11 }
  0x15   : > { %3527 = sst [smem:[#allocation10_spill]] %s2877_s14  ;;  %p177_p7 = scmp.eq.s32.totalorder %s69_s15, 0 }
  0x16   : > { %p71_p8 = scmp.eq.s32.totalorder %s70_s16, 0  ;;  %p2883_p9 = por %p80_p6, %p53_p2 }
  0x17   : > { %s179_s18 = sadd.s32 1, %s2728_s22  ;;  %p189_p10 = scmp.ne.s32.totalorder %s2728_s22, %s2724_s21 }
  0x18   : > { %s2891_s19 = scalar_select %p71_p8, %s2736_s24, %s73_s13  }
  0x19   : > { %s2894_s20 = scalar_select %p177_p7, %s2728_s22, %s179_s18  }
  0x1a   : > { %p190_p11 = scmp.eq.s32.totalorder %s2304_s7, 3  ;;  %p2307_p13 = scmp.ge.s32.totalorder %s2764_s30, 4 }
  0x1c   : > { %p2896_p12 = por %p190_p11, %p189_p10  ;;  %240 = sbr.rel (%p2307_p13) target bundleno = 146 (0x92), region = 16 }
  0x21   : > { %243 = sbr.rel (!%p2869_p5) target bundleno = 51 (0x33), region = 20  ;;  %s245_s10 = sand.u32 (%p2869_p5), 1, %s2744_s26  }
  0x22   : > { %s2396_s11 = sshll.u32 (%p2869_p5), %s2756_s28, 5  ;;  %s2308_s15 = sshll.u32 (%p2869_p5), %s245_s10, 7 }
  0x23   : > { %s3530_s0 = sld [smem:[#allocation11_spill]] (%p2869_p5)  ;;  %s247_s7 = scalar_lea.vmem (%p2869_p5), [#allocation3], %s2308_s15 }
  0x29   : > { %s2908_s18 = scalar_lea.vmem %s3530_s0, %s2396_s11 }
  0x2a   : > { %v266_v0 = vld [vmem:[%s2908_s18] sm:$0xff]  ;;  %v268_v1 = vld [vmem:[%s2908_s18 + $0x8] sm:$0xff]  ;;  %v270_v2 = vld [vmem:[%s2908_s18 + $0x10] sm:$0xff] }
  0x2b   : > { %267 = vst [vmem:[%s247_s7] sm:$0xff] %v266_v0  ;;  %269 = vst [vmem:[%s247_s7 + $0x8] sm:$0xff] %v268_v1  ;;  %v272_v3 = vld [vmem:[%s2908_s18 + $0x18] sm:$0xff]  ;;  %v274_v4 = vld [vmem:[%s2908_s18 + $0x40] sm:$0xff] }
  0x2c   : > { %271 = vst [vmem:[%s247_s7 + $0x10] sm:$0xff] %v270_v2  ;;  %v276_v5 = vld [vmem:[%s2908_s18 + $0x48] sm:$0xff]  ;;  %273 = vst [vmem:[%s247_s7 + $0x18] sm:$0xff] %v272_v3  ;;  %v278_v6 = vld [vmem:[%s2908_s18 + $0x50] sm:$0xff] }
  0x2d   : > { %275 = vst [vmem:[%s247_s7 + $0x20] sm:$0xff] %v274_v4  ;;  %277 = vst [vmem:[%s247_s7 + $0x28] sm:$0xff] %v276_v5  ;;  %v280_v7 = vld [vmem:[%s2908_s18 + $0x58] sm:$0xff]  ;;  %v282_v8 = vld [vmem:[%s2908_s18 + $0x80] sm:$0xff] }
  0x2e   : > { %279 = vst [vmem:[%s247_s7 + $0x30] sm:$0xff] %v278_v6  ;;  %281 = vst [vmem:[%s247_s7 + $0x38] sm:$0xff] %v280_v7  ;;  %v284_v9 = vld [vmem:[%s2908_s18 + $0x88] sm:$0xff]  ;;  %v286_v10 = vld [vmem:[%s2908_s18 + $0x90] sm:$0xff] }
  0x2f   : > { %283 = vst [vmem:[%s247_s7 + $0x40] sm:$0xff] %v282_v8  ;;  %v288_v11 = vld [vmem:[%s2908_s18 + $0x98] sm:$0xff]  ;;  %285 = vst [vmem:[%s247_s7 + $0x48] sm:$0xff] %v284_v9  ;;  %v290_v12 = vld [vmem:[%s2908_s18 + $0xc0] sm:$0xff] }
  0x30   : > { %287 = vst [vmem:[%s247_s7 + $0x50] sm:$0xff] %v286_v10  ;;  %289 = vst [vmem:[%s247_s7 + $0x58] sm:$0xff] %v288_v11  ;;  %v292_v13 = vld [vmem:[%s2908_s18 + $0xc8] sm:$0xff]  ;;  %v294_v14 = vld [vmem:[%s2908_s18 + $0xd0] sm:$0xff] }
  0x31   : > { %291 = vst [vmem:[%s247_s7 + $0x60] sm:$0xff] %v290_v12  ;;  %293 = vst [vmem:[%s247_s7 + $0x68] sm:$0xff] %v292_v13  ;;  %v296_v15 = vld [vmem:[%s2908_s18 + $0xd8] sm:$0xff] }
  0x32   : > { %295 = vst [vmem:[%s247_s7 + $0x70] sm:$0xff] %v294_v14  ;;  %297 = vst [vmem:[%s247_s7 + $0x78] sm:$0xff] %v296_v15 }
  0x33 PF: > { %303 = sbr.rel (!%p2883_p9) target bundleno = 146 (0x92), region = 43  ;;  %s305_s12 = sand.u32 (%p2883_p9), 1, %s2736_s24  }
  0x34   : > { %s2397_s10 = sshll.u32 (%p2883_p9), %s2756_s28, 8  ;;  %s2311_s11 = sshll.u32 (%p2883_p9), %s305_s12, 9 }
  0x35   : > { %s310_s15 = sadd.s32 (%p2883_p9), %s2760_s29, %s2397_s10  ;;  %s3531_s1 = sld [smem:[#allocation12_spill]] (%p2883_p9) }
  0x36   : > { %s2314_s13 = sshll.u32 (%p2883_p9), %s310_s15, 2  ;;  %s2939_s17 = scalar_lea.vmem (%p2883_p9), [#allocation4], %s2311_s11 }
  0x3b   : > { %s2934_s9 = scalar_lea.vmem %s3531_s1, %s2314_s13 }
  0x3c   : > { %v329_v16 = vld [vmem:[%s2934_s9] sm:$0xf]  ;;  %v331_v17 = vld [vmem:[%s2934_s9 + $0x8] sm:$0xf]  ;;  %v333_v18 = vld [vmem:[%s2934_s9 + $0x10] sm:$0xf] }
  0x3d   : > { %330 = vst [vmem:[%s2939_s17] sm:$0xf] %v329_v16  ;;  %332 = vst [vmem:[%s2939_s17 + $0x4] sm:$0xf] %v331_v17  ;;  %v335_v19 = vld [vmem:[%s2934_s9 + $0x18] sm:$0xf] }
  0x3e   : > { %334 = vst [vmem:[%s2939_s17 + $0x8] sm:$0xf] %v333_v18  ;;  %v337_v20 = vld [vmem:[%s2934_s9 + $0x20] sm:$0xf]  ;;  %v339_v21 = vld [vmem:[%s2934_s9 + $0x28] sm:$0xf] }
  0x3f   : > { %336 = vst [vmem:[%s2939_s17 + $0xc] sm:$0xf] %v335_v19  ;;  %338 = vst [vmem:[%s2939_s17 + $0x10] sm:$0xf] %v337_v20  ;;  %v341_v22 = vld [vmem:[%s2934_s9 + $0x30] sm:$0xf] }
  0x40   : > { %340 = vst [vmem:[%s2939_s17 + $0x14] sm:$0xf] %v339_v21  ;;  %v343_v23 = vld [vmem:[%s2934_s9 + $0x38] sm:$0xf]  ;;  %v345_v24 = vld [vmem:[%s2934_s9 + $0x40] sm:$0xf] }
  0x41   : > { %342 = vst [vmem:[%s2939_s17 + $0x18] sm:$0xf] %v341_v22  ;;  %344 = vst [vmem:[%s2939_s17 + $0x1c] sm:$0xf] %v343_v23  ;;  %v347_v25 = vld [vmem:[%s2934_s9 + $0x48] sm:$0xf] }
  0x42   : > { %346 = vst [vmem:[%s2939_s17 + $0x20] sm:$0xf] %v345_v24  ;;  %v349_v26 = vld [vmem:[%s2934_s9 + $0x50] sm:$0xf]  ;;  %v351_v27 = vld [vmem:[%s2934_s9 + $0x58] sm:$0xf] }
  0x43   : > { %348 = vst [vmem:[%s2939_s17 + $0x24] sm:$0xf] %v347_v25  ;;  %350 = vst [vmem:[%s2939_s17 + $0x28] sm:$0xf] %v349_v26  ;;  %v353_v28 = vld [vmem:[%s2934_s9 + $0x60] sm:$0xf] }
  0x44   : > { %352 = vst [vmem:[%s2939_s17 + $0x2c] sm:$0xf] %v351_v27  ;;  %v355_v29 = vld [vmem:[%s2934_s9 + $0x68] sm:$0xf]  ;;  %v357_v30 = vld [vmem:[%s2934_s9 + $0x70] sm:$0xf] }
  0x45   : > { %354 = vst [vmem:[%s2939_s17 + $0x30] sm:$0xf] %v353_v28  ;;  %356 = vst [vmem:[%s2939_s17 + $0x34] sm:$0xf] %v355_v29  ;;  %v359_v31 = vld [vmem:[%s2934_s9 + $0x78] sm:$0xf] }
  0x46   : > { %358 = vst [vmem:[%s2939_s17 + $0x38] sm:$0xf] %v357_v30  ;;  %v361_v32 = vld [vmem:[%s2934_s9 + $0x80] sm:$0xf]  ;;  %v363_v33 = vld [vmem:[%s2934_s9 + $0x88] sm:$0xf] }
  0x47   : > { %360 = vst [vmem:[%s2939_s17 + $0x3c] sm:$0xf] %v359_v31  ;;  %362 = vst [vmem:[%s2939_s17 + $0x40] sm:$0xf] %v361_v32  ;;  %v365_v34 = vld [vmem:[%s2934_s9 + $0x90] sm:$0xf] }
  0x48   : > { %364 = vst [vmem:[%s2939_s17 + $0x44] sm:$0xf] %v363_v33  ;;  %v367_v35 = vld [vmem:[%s2934_s9 + $0x98] sm:$0xf]  ;;  %v369_v36 = vld [vmem:[%s2934_s9 + $0xa0] sm:$0xf] }
  0x49   : > { %366 = vst [vmem:[%s2939_s17 + $0x48] sm:$0xf] %v365_v34  ;;  %368 = vst [vmem:[%s2939_s17 + $0x4c] sm:$0xf] %v367_v35  ;;  %v371_v37 = vld [vmem:[%s2934_s9 + $0xa8] sm:$0xf] }
  0x4a   : > { %370 = vst [vmem:[%s2939_s17 + $0x50] sm:$0xf] %v369_v36  ;;  %v373_v38 = vld [vmem:[%s2934_s9 + $0xb0] sm:$0xf]  ;;  %v375_v39 = vld [vmem:[%s2934_s9 + $0xb8] sm:$0xf] }
  0x4b   : > { %372 = vst [vmem:[%s2939_s17 + $0x54] sm:$0xf] %v371_v37  ;;  %374 = vst [vmem:[%s2939_s17 + $0x58] sm:$0xf] %v373_v38  ;;  %v377_v40 = vld [vmem:[%s2934_s9 + $0xc0] sm:$0xf] }
  0x4c   : > { %376 = vst [vmem:[%s2939_s17 + $0x5c] sm:$0xf] %v375_v39  ;;  %v379_v41 = vld [vmem:[%s2934_s9 + $0xc8] sm:$0xf]  ;;  %v381_v42 = vld [vmem:[%s2934_s9 + $0xd0] sm:$0xf] }
  0x4d   : > { %378 = vst [vmem:[%s2939_s17 + $0x60] sm:$0xf] %v377_v40  ;;  %380 = vst [vmem:[%s2939_s17 + $0x64] sm:$0xf] %v379_v41  ;;  %v383_v43 = vld [vmem:[%s2934_s9 + $0xd8] sm:$0xf] }
  0x4e   : > { %382 = vst [vmem:[%s2939_s17 + $0x68] sm:$0xf] %v381_v42  ;;  %v385_v44 = vld [vmem:[%s2934_s9 + $0xe0] sm:$0xf]  ;;  %v387_v45 = vld [vmem:[%s2934_s9 + $0xe8] sm:$0xf] }
  0x4f   : > { %384 = vst [vmem:[%s2939_s17 + $0x6c] sm:$0xf] %v383_v43  ;;  %386 = vst [vmem:[%s2939_s17 + $0x70] sm:$0xf] %v385_v44  ;;  %v389_v46 = vld [vmem:[%s2934_s9 + $0xf0] sm:$0xf] }
  0x50   : > { %388 = vst [vmem:[%s2939_s17 + $0x74] sm:$0xf] %v387_v45  ;;  %v391_v47 = vld [vmem:[%s2934_s9 + $0xf8] sm:$0xf]  ;;  %v393_v48 = vld [vmem:[%s2934_s9 + $0x100] sm:$0xf] }
  0x51   : > { %390 = vst [vmem:[%s2939_s17 + $0x78] sm:$0xf] %v389_v46  ;;  %392 = vst [vmem:[%s2939_s17 + $0x7c] sm:$0xf] %v391_v47  ;;  %v395_v49 = vld [vmem:[%s2934_s9 + $0x108] sm:$0xf] }
  0x52   : > { %394 = vst [vmem:[%s2939_s17 + $0x80] sm:$0xf] %v393_v48  ;;  %v397_v50 = vld [vmem:[%s2934_s9 + $0x110] sm:$0xf]  ;;  %v399_v51 = vld [vmem:[%s2934_s9 + $0x118] sm:$0xf] }
  0x53   : > { %396 = vst [vmem:[%s2939_s17 + $0x84] sm:$0xf] %v395_v49  ;;  %398 = vst [vmem:[%s2939_s17 + $0x88] sm:$0xf] %v397_v50  ;;  %v401_v52 = vld [vmem:[%s2934_s9 + $0x120] sm:$0xf] }
  0x54   : > { %400 = vst [vmem:[%s2939_s17 + $0x8c] sm:$0xf] %v399_v51  ;;  %v403_v53 = vld [vmem:[%s2934_s9 + $0x128] sm:$0xf]  ;;  %v405_v54 = vld [vmem:[%s2934_s9 + $0x130] sm:$0xf] }
  0x55   : > { %402 = vst [vmem:[%s2939_s17 + $0x90] sm:$0xf] %v401_v52  ;;  %404 = vst [vmem:[%s2939_s17 + $0x94] sm:$0xf] %v403_v53  ;;  %v407_v55 = vld [vmem:[%s2934_s9 + $0x138] sm:$0xf] }
  0x56   : > { %406 = vst [vmem:[%s2939_s17 + $0x98] sm:$0xf] %v405_v54  ;;  %v409_v56 = vld [vmem:[%s2934_s9 + $0x140] sm:$0xf]  ;;  %v411_v57 = vld [vmem:[%s2934_s9 + $0x148] sm:$0xf] }
  0x57   : > { %408 = vst [vmem:[%s2939_s17 + $0x9c] sm:$0xf] %v407_v55  ;;  %410 = vst [vmem:[%s2939_s17 + $0xa0] sm:$0xf] %v409_v56  ;;  %v413_v58 = vld [vmem:[%s2934_s9 + $0x150] sm:$0xf] }
  0x58   : > { %412 = vst [vmem:[%s2939_s17 + $0xa4] sm:$0xf] %v411_v57  ;;  %v415_v59 = vld [vmem:[%s2934_s9 + $0x158] sm:$0xf]  ;;  %v417_v60 = vld [vmem:[%s2934_s9 + $0x160] sm:$0xf] }
  0x59   : > { %414 = vst [vmem:[%s2939_s17 + $0xa8] sm:$0xf] %v413_v58  ;;  %416 = vst [vmem:[%s2939_s17 + $0xac] sm:$0xf] %v415_v59  ;;  %v419_v61 = vld [vmem:[%s2934_s9 + $0x168] sm:$0xf] }
  0x5a   : > { %418 = vst [vmem:[%s2939_s17 + $0xb0] sm:$0xf] %v417_v60  ;;  %v421_v62 = vld [vmem:[%s2934_s9 + $0x170] sm:$0xf]  ;;  %v423_v63 = vld [vmem:[%s2934_s9 + $0x178] sm:$0xf] }
  0x5b   : > { %420 = vst [vmem:[%s2939_s17 + $0xb4] sm:$0xf] %v419_v61  ;;  %422 = vst [vmem:[%s2939_s17 + $0xb8] sm:$0xf] %v421_v62  ;;  %v425_v0 = vld [vmem:[%s2934_s9 + $0x180] sm:$0xf] }
  0x5c   : > { %424 = vst [vmem:[%s2939_s17 + $0xbc] sm:$0xf] %v423_v63  ;;  %v427_v1 = vld [vmem:[%s2934_s9 + $0x188] sm:$0xf]  ;;  %v429_v2 = vld [vmem:[%s2934_s9 + $0x190] sm:$0xf] }
  0x5d   : > { %426 = vst [vmem:[%s2939_s17 + $0xc0] sm:$0xf] %v425_v0  ;;  %428 = vst [vmem:[%s2939_s17 + $0xc4] sm:$0xf] %v427_v1  ;;  %v431_v3 = vld [vmem:[%s2934_s9 + $0x198] sm:$0xf] }
  0x5e   : > { %430 = vst [vmem:[%s2939_s17 + $0xc8] sm:$0xf] %v429_v2  ;;  %v433_v4 = vld [vmem:[%s2934_s9 + $0x1a0] sm:$0xf]  ;;  %v435_v5 = vld [vmem:[%s2934_s9 + $0x1a8] sm:$0xf] }
  0x5f   : > { %432 = vst [vmem:[%s2939_s17 + $0xcc] sm:$0xf] %v431_v3  ;;  %434 = vst [vmem:[%s2939_s17 + $0xd0] sm:$0xf] %v433_v4  ;;  %v437_v6 = vld [vmem:[%s2934_s9 + $0x1b0] sm:$0xf] }
  0x60   : > { %436 = vst [vmem:[%s2939_s17 + $0xd4] sm:$0xf] %v435_v5  ;;  %v439_v7 = vld [vmem:[%s2934_s9 + $0x1b8] sm:$0xf]  ;;  %v441_v8 = vld [vmem:[%s2934_s9 + $0x1c0] sm:$0xf] }
  0x61   : > { %438 = vst [vmem:[%s2939_s17 + $0xd8] sm:$0xf] %v437_v6  ;;  %440 = vst [vmem:[%s2939_s17 + $0xdc] sm:$0xf] %v439_v7  ;;  %v443_v9 = vld [vmem:[%s2934_s9 + $0x1c8] sm:$0xf] }
  0x62   : > { %442 = vst [vmem:[%s2939_s17 + $0xe0] sm:$0xf] %v441_v8  ;;  %v445_v10 = vld [vmem:[%s2934_s9 + $0x1d0] sm:$0xf]  ;;  %v447_v11 = vld [vmem:[%s2934_s9 + $0x1d8] sm:$0xf] }
  0x63   : > { %444 = vst [vmem:[%s2939_s17 + $0xe4] sm:$0xf] %v443_v9  ;;  %446 = vst [vmem:[%s2939_s17 + $0xe8] sm:$0xf] %v445_v10  ;;  %v449_v12 = vld [vmem:[%s2934_s9 + $0x1e0] sm:$0xf] }
  0x64   : > { %448 = vst [vmem:[%s2939_s17 + $0xec] sm:$0xf] %v447_v11  ;;  %v451_v13 = vld [vmem:[%s2934_s9 + $0x1e8] sm:$0xf]  ;;  %v453_v14 = vld [vmem:[%s2934_s9 + $0x1f0] sm:$0xf] }
  0x65   : > { %450 = vst [vmem:[%s2939_s17 + $0xf0] sm:$0xf] %v449_v12  ;;  %452 = vst [vmem:[%s2939_s17 + $0xf4] sm:$0xf] %v451_v13  ;;  %v455_v15 = vld [vmem:[%s2934_s9 + $0x1f8] sm:$0xf] }
  0x66   : > { %454 = vst [vmem:[%s2939_s17 + $0xf8] sm:$0xf] %v453_v14  ;;  %v457_v16 = vld [vmem:[%s2934_s9 + $0x200] sm:$0xf]  ;;  %v459_v17 = vld [vmem:[%s2934_s9 + $0x208] sm:$0xf] }
  0x67   : > { %456 = vst [vmem:[%s2939_s17 + $0xfc] sm:$0xf] %v455_v15  ;;  %458 = vst [vmem:[%s2939_s17 + $0x100] sm:$0xf] %v457_v16  ;;  %v461_v18 = vld [vmem:[%s2934_s9 + $0x210] sm:$0xf] }
  0x68   : > { %460 = vst [vmem:[%s2939_s17 + $0x104] sm:$0xf] %v459_v17  ;;  %v463_v19 = vld [vmem:[%s2934_s9 + $0x218] sm:$0xf]  ;;  %v465_v20 = vld [vmem:[%s2934_s9 + $0x220] sm:$0xf] }
  0x69   : > { %462 = vst [vmem:[%s2939_s17 + $0x108] sm:$0xf] %v461_v18  ;;  %464 = vst [vmem:[%s2939_s17 + $0x10c] sm:$0xf] %v463_v19  ;;  %v467_v21 = vld [vmem:[%s2934_s9 + $0x228] sm:$0xf] }
  0x6a   : > { %466 = vst [vmem:[%s2939_s17 + $0x110] sm:$0xf] %v465_v20  ;;  %v469_v22 = vld [vmem:[%s2934_s9 + $0x230] sm:$0xf]  ;;  %v471_v23 = vld [vmem:[%s2934_s9 + $0x238] sm:$0xf] }
  0x6b   : > { %468 = vst [vmem:[%s2939_s17 + $0x114] sm:$0xf] %v467_v21  ;;  %470 = vst [vmem:[%s2939_s17 + $0x118] sm:$0xf] %v469_v22  ;;  %v473_v24 = vld [vmem:[%s2934_s9 + $0x240] sm:$0xf] }
  0x6c   : > { %472 = vst [vmem:[%s2939_s17 + $0x11c] sm:$0xf] %v471_v23  ;;  %v475_v25 = vld [vmem:[%s2934_s9 + $0x248] sm:$0xf]  ;;  %v477_v26 = vld [vmem:[%s2934_s9 + $0x250] sm:$0xf] }
  0x6d   : > { %474 = vst [vmem:[%s2939_s17 + $0x120] sm:$0xf] %v473_v24  ;;  %476 = vst [vmem:[%s2939_s17 + $0x124] sm:$0xf] %v475_v25  ;;  %v479_v27 = vld [vmem:[%s2934_s9 + $0x258] sm:$0xf] }
  0x6e   : > { %478 = vst [vmem:[%s2939_s17 + $0x128] sm:$0xf] %v477_v26  ;;  %v481_v28 = vld [vmem:[%s2934_s9 + $0x260] sm:$0xf]  ;;  %v483_v29 = vld [vmem:[%s2934_s9 + $0x268] sm:$0xf] }
  0x6f   : > { %480 = vst [vmem:[%s2939_s17 + $0x12c] sm:$0xf] %v479_v27  ;;  %482 = vst [vmem:[%s2939_s17 + $0x130] sm:$0xf] %v481_v28  ;;  %v485_v30 = vld [vmem:[%s2934_s9 + $0x270] sm:$0xf] }
  0x70   : > { %484 = vst [vmem:[%s2939_s17 + $0x134] sm:$0xf] %v483_v29  ;;  %v487_v31 = vld [vmem:[%s2934_s9 + $0x278] sm:$0xf]  ;;  %v489_v32 = vld [vmem:[%s2934_s9 + $0x280] sm:$0xf] }
  0x71   : > { %486 = vst [vmem:[%s2939_s17 + $0x138] sm:$0xf] %v485_v30  ;;  %488 = vst [vmem:[%s2939_s17 + $0x13c] sm:$0xf] %v487_v31  ;;  %v491_v33 = vld [vmem:[%s2934_s9 + $0x288] sm:$0xf] }
  0x72   : > { %490 = vst [vmem:[%s2939_s17 + $0x140] sm:$0xf] %v489_v32  ;;  %v493_v34 = vld [vmem:[%s2934_s9 + $0x290] sm:$0xf]  ;;  %v495_v35 = vld [vmem:[%s2934_s9 + $0x298] sm:$0xf] }
  0x73   : > { %492 = vst [vmem:[%s2939_s17 + $0x144] sm:$0xf] %v491_v33  ;;  %494 = vst [vmem:[%s2939_s17 + $0x148] sm:$0xf] %v493_v34  ;;  %v497_v36 = vld [vmem:[%s2934_s9 + $0x2a0] sm:$0xf] }
  0x74   : > { %496 = vst [vmem:[%s2939_s17 + $0x14c] sm:$0xf] %v495_v35  ;;  %v499_v37 = vld [vmem:[%s2934_s9 + $0x2a8] sm:$0xf]  ;;  %v501_v38 = vld [vmem:[%s2934_s9 + $0x2b0] sm:$0xf] }
  0x75   : > { %498 = vst [vmem:[%s2939_s17 + $0x150] sm:$0xf] %v497_v36  ;;  %500 = vst [vmem:[%s2939_s17 + $0x154] sm:$0xf] %v499_v37  ;;  %v503_v39 = vld [vmem:[%s2934_s9 + $0x2b8] sm:$0xf] }
  0x76   : > { %502 = vst [vmem:[%s2939_s17 + $0x158] sm:$0xf] %v501_v38  ;;  %v505_v40 = vld [vmem:[%s2934_s9 + $0x2c0] sm:$0xf]  ;;  %v507_v41 = vld [vmem:[%s2934_s9 + $0x2c8] sm:$0xf] }
  0x77   : > { %504 = vst [vmem:[%s2939_s17 + $0x15c] sm:$0xf] %v503_v39  ;;  %506 = vst [vmem:[%s2939_s17 + $0x160] sm:$0xf] %v505_v40  ;;  %v509_v42 = vld [vmem:[%s2934_s9 + $0x2d0] sm:$0xf] }
  0x78   : > { %508 = vst [vmem:[%s2939_s17 + $0x164] sm:$0xf] %v507_v41  ;;  %v511_v43 = vld [vmem:[%s2934_s9 + $0x2d8] sm:$0xf]  ;;  %v513_v44 = vld [vmem:[%s2934_s9 + $0x2e0] sm:$0xf] }
  0x79   : > { %510 = vst [vmem:[%s2939_s17 + $0x168] sm:$0xf] %v509_v42  ;;  %512 = vst [vmem:[%s2939_s17 + $0x16c] sm:$0xf] %v511_v43  ;;  %v515_v45 = vld [vmem:[%s2934_s9 + $0x2e8] sm:$0xf] }
  0x7a   : > { %514 = vst [vmem:[%s2939_s17 + $0x170] sm:$0xf] %v513_v44  ;;  %v517_v46 = vld [vmem:[%s2934_s9 + $0x2f0] sm:$0xf]  ;;  %v519_v47 = vld [vmem:[%s2934_s9 + $0x2f8] sm:$0xf] }
  0x7b   : > { %516 = vst [vmem:[%s2939_s17 + $0x174] sm:$0xf] %v515_v45  ;;  %518 = vst [vmem:[%s2939_s17 + $0x178] sm:$0xf] %v517_v46  ;;  %v521_v48 = vld [vmem:[%s2934_s9 + $0x300] sm:$0xf] }
  0x7c   : > { %520 = vst [vmem:[%s2939_s17 + $0x17c] sm:$0xf] %v519_v47  ;;  %v523_v49 = vld [vmem:[%s2934_s9 + $0x308] sm:$0xf]  ;;  %v525_v50 = vld [vmem:[%s2934_s9 + $0x310] sm:$0xf] }
  0x7d   : > { %522 = vst [vmem:[%s2939_s17 + $0x180] sm:$0xf] %v521_v48  ;;  %524 = vst [vmem:[%s2939_s17 + $0x184] sm:$0xf] %v523_v49  ;;  %v527_v51 = vld [vmem:[%s2934_s9 + $0x318] sm:$0xf] }
  0x7e   : > { %526 = vst [vmem:[%s2939_s17 + $0x188] sm:$0xf] %v525_v50  ;;  %v529_v52 = vld [vmem:[%s2934_s9 + $0x320] sm:$0xf]  ;;  %v531_v53 = vld [vmem:[%s2934_s9 + $0x328] sm:$0xf] }
  0x7f   : > { %528 = vst [vmem:[%s2939_s17 + $0x18c] sm:$0xf] %v527_v51  ;;  %530 = vst [vmem:[%s2939_s17 + $0x190] sm:$0xf] %v529_v52  ;;  %v533_v54 = vld [vmem:[%s2934_s9 + $0x330] sm:$0xf] }
  0x80   : > { %532 = vst [vmem:[%s2939_s17 + $0x194] sm:$0xf] %v531_v53  ;;  %v535_v55 = vld [vmem:[%s2934_s9 + $0x338] sm:$0xf]  ;;  %v537_v56 = vld [vmem:[%s2934_s9 + $0x340] sm:$0xf] }
  0x81   : > { %534 = vst [vmem:[%s2939_s17 + $0x198] sm:$0xf] %v533_v54  ;;  %536 = vst [vmem:[%s2939_s17 + $0x19c] sm:$0xf] %v535_v55  ;;  %v539_v57 = vld [vmem:[%s2934_s9 + $0x348] sm:$0xf] }
  0x82   : > { %538 = vst [vmem:[%s2939_s17 + $0x1a0] sm:$0xf] %v537_v56  ;;  %v541_v58 = vld [vmem:[%s2934_s9 + $0x350] sm:$0xf]  ;;  %v543_v59 = vld [vmem:[%s2934_s9 + $0x358] sm:$0xf] }
  0x83   : > { %540 = vst [vmem:[%s2939_s17 + $0x1a4] sm:$0xf] %v539_v57  ;;  %542 = vst [vmem:[%s2939_s17 + $0x1a8] sm:$0xf] %v541_v58  ;;  %v545_v60 = vld [vmem:[%s2934_s9 + $0x360] sm:$0xf] }
  0x84   : > { %544 = vst [vmem:[%s2939_s17 + $0x1ac] sm:$0xf] %v543_v59  ;;  %v547_v61 = vld [vmem:[%s2934_s9 + $0x368] sm:$0xf]  ;;  %v549_v62 = vld [vmem:[%s2934_s9 + $0x370] sm:$0xf] }
  0x85   : > { %546 = vst [vmem:[%s2939_s17 + $0x1b0] sm:$0xf] %v545_v60  ;;  %548 = vst [vmem:[%s2939_s17 + $0x1b4] sm:$0xf] %v547_v61  ;;  %v551_v63 = vld [vmem:[%s2934_s9 + $0x378] sm:$0xf] }
  0x86   : > { %550 = vst [vmem:[%s2939_s17 + $0x1b8] sm:$0xf] %v549_v62  ;;  %v553_v0 = vld [vmem:[%s2934_s9 + $0x380] sm:$0xf]  ;;  %v555_v1 = vld [vmem:[%s2934_s9 + $0x388] sm:$0xf] }
  0x87   : > { %552 = vst [vmem:[%s2939_s17 + $0x1bc] sm:$0xf] %v551_v63  ;;  %554 = vst [vmem:[%s2939_s17 + $0x1c0] sm:$0xf] %v553_v0  ;;  %v557_v2 = vld [vmem:[%s2934_s9 + $0x390] sm:$0xf] }
  0x88   : > { %556 = vst [vmem:[%s2939_s17 + $0x1c4] sm:$0xf] %v555_v1  ;;  %v559_v3 = vld [vmem:[%s2934_s9 + $0x398] sm:$0xf]  ;;  %v561_v4 = vld [vmem:[%s2934_s9 + $0x3a0] sm:$0xf] }
  0x89   : > { %558 = vst [vmem:[%s2939_s17 + $0x1c8] sm:$0xf] %v557_v2  ;;  %560 = vst [vmem:[%s2939_s17 + $0x1cc] sm:$0xf] %v559_v3  ;;  %v563_v5 = vld [vmem:[%s2934_s9 + $0x3a8] sm:$0xf] }
  0x8a   : > { %562 = vst [vmem:[%s2939_s17 + $0x1d0] sm:$0xf] %v561_v4  ;;  %v565_v6 = vld [vmem:[%s2934_s9 + $0x3b0] sm:$0xf]  ;;  %v567_v7 = vld [vmem:[%s2934_s9 + $0x3b8] sm:$0xf] }
  0x8b   : > { %564 = vst [vmem:[%s2939_s17 + $0x1d4] sm:$0xf] %v563_v5  ;;  %566 = vst [vmem:[%s2939_s17 + $0x1d8] sm:$0xf] %v565_v6  ;;  %v569_v8 = vld [vmem:[%s2934_s9 + $0x3c0] sm:$0xf] }
  0x8c   : > { %568 = vst [vmem:[%s2939_s17 + $0x1dc] sm:$0xf] %v567_v7  ;;  %v571_v9 = vld [vmem:[%s2934_s9 + $0x3c8] sm:$0xf]  ;;  %v573_v10 = vld [vmem:[%s2934_s9 + $0x3d0] sm:$0xf] }
  0x8d   : > { %570 = vst [vmem:[%s2939_s17 + $0x1e0] sm:$0xf] %v569_v8  ;;  %572 = vst [vmem:[%s2939_s17 + $0x1e4] sm:$0xf] %v571_v9  ;;  %v575_v11 = vld [vmem:[%s2934_s9 + $0x3d8] sm:$0xf] }
  0x8e   : > { %574 = vst [vmem:[%s2939_s17 + $0x1e8] sm:$0xf] %v573_v10  ;;  %v577_v12 = vld [vmem:[%s2934_s9 + $0x3e0] sm:$0xf]  ;;  %v579_v13 = vld [vmem:[%s2934_s9 + $0x3e8] sm:$0xf] }
  0x8f   : > { %576 = vst [vmem:[%s2939_s17 + $0x1ec] sm:$0xf] %v575_v11  ;;  %578 = vst [vmem:[%s2939_s17 + $0x1f0] sm:$0xf] %v577_v12  ;;  %v581_v14 = vld [vmem:[%s2934_s9 + $0x3f0] sm:$0xf] }
  0x90   : > { %580 = vst [vmem:[%s2939_s17 + $0x1f4] sm:$0xf] %v579_v13  ;;  %v583_v15 = vld [vmem:[%s2934_s9 + $0x3f8] sm:$0xf]  ;;  %582 = vst [vmem:[%s2939_s17 + $0x1f8] sm:$0xf] %v581_v14 }
  0x91   : > { %584 = vst [vmem:[%s2939_s17 + $0x1fc] sm:$0xf] %v583_v15 }
  0x92 PF: > { %p2315_p0 = scmp.ge.s32.totalorder %s2764_s30, 1  ;;  %p885_p1 = scmp.lt.s32.totalorder %s2764_s30, 5 }
  0x94   : > { %p886_p2 = pnand %p2315_p0, %p885_p1 }
  0x95   : > { %s892_s0 = sand.u32 (!%p886_p2), 1, %s2740_s25   ;;  %s899_s18 = sand.u32 (!%p886_p2), 1, %s2732_s23  }
  0x96   : > { %889 = sbr.rel (%p886_p2) target bundleno = 482 (0x1e2), region = 96  ;;  %s2316_s7 = sshll.u32 (!%p886_p2), %s892_s0, 7 }
  0x97   : > { %s2317_s9 = sshll.u32 (!%p886_p2), %s899_s18, 9  ;;  %s937_s12 = sand.u32 (!%p886_p2), 1, %s2724_s21  }
  0x98   : > { %s2319_s10 = sshll.u32 (!%p886_p2), %s2748_s27, 3  ;;  %s2318_s11 = sshll.u32 (!%p886_p2), %s937_s12, 4 }
  0x99   : > { %p954_p3 = scmp.lt.s32.totalorder (!%p886_p2), %s2319_s10, 15  ;;  %p969_p4 = scmp.lt.s32.totalorder (!%p886_p2), %s2752_s4, 1 }
  0x9a   : > { %s3217_s12 = scalar_lea.vmem (!%p886_p2), [#allocation3], %s2316_s7  ;;  %s3219_s28 = scalar_lea.vmem (!%p886_p2), [#allocation4], %s2317_s9 }
  0x9b   : > { %s3551_s10 = smov (!%p954_p3, %s2319_s10), 15  ;;  %s3221_s14 = scalar_lea.vmem [#allocation5], %s2318_s11 }
  0x9c   : > { %s970_s15 = scalar_select %p969_p4, %s2752_s4, 1 }
  0x9d   : > { %s956_s17 = scalar_lea.vmem %s3511_s2, %s3551_s10  ;;  %s961_s23 = scalar_lea.vmem %s3512_s3, %s3551_s10 }
  0x9e   : > { %s2321_s25 = sshll.u32 %s970_s15, 3  ;;  %p2322_p5 = scmp.ne.s32.totalorder %s2748_s27, 0 }
  0x9f   : > { %s3215_s18 = scalar_lea.vmem %s3515_s6, %s2321_s25 }
  0xa0   : > { %979 = sbr.rel (%p2322_p5) target bundleno = 168 (0xa8), region = 108 }
  0xa5   : > { %v2766_v16 = vmov 0.0  }
  0xa6   : > { %980 = vst [vmem:[#allocation2 + $0x10] sm:$0xff] %v2766_v16  ;;  %981 = vst [vmem:[#allocation2] sm:$0xff] %v2766_v16 }
  0xa7   : > { %982 = vst [vmem:[#allocation2 + $0x18] sm:$0xff] %v2766_v16  ;;  %983 = vst [vmem:[#allocation2 + $0x8] sm:$0xff] %v2766_v16 }
  0xa8 PF: > { %v2614_v17 = vld [vmem:[%s3219_s28 + $0x78] sm:$0xff]   ;;  %v2618_v21 = vld [vmem:[%s3219_s28 + $0x70] sm:$0xff]   ;;  %v2622_v25 = vld [vmem:[%s3219_s28 + $0x68] sm:$0xff]   ;;  %v1034_v40 = vlaneseq  ;;  %p2387_p6 = scmp.ne.s32.totalorder %s2748_s27, 1 }
  0xa9   : > { %v2615_v18 = vld [vmem:[%s3219_s28 + $0xf8] sm:$0xff]   ;;  %2413 = vmatprep.subr.bf16.mxu0 %v2614_v17  ;;  %v2619_v22 = vld [vmem:[%s3219_s28 + $0xf0] sm:$0xff]   ;;  %v2623_v26 = vld [vmem:[%s3219_s28 + $0xe8] sm:$0xff]  }
  0xaa   : > { %v2616_v19 = vld [vmem:[%s3219_s28 + $0x38] sm:$0xff]   ;;  %2441 = vmatprep.subr.bf16.mxu1 %v2615_v18  ;;  %v2620_v23 = vld [vmem:[%s3219_s28 + $0x30] sm:$0xff]   ;;  %v2624_v27 = vld [vmem:[%s3219_s28 + $0x28] sm:$0xff]   ;;  %v3251_v45 = vshrl.u32 %v1034_v40, 7 }
  0xab   : > { %v2617_v20 = vld [vmem:[%s3219_s28 + $0xb8] sm:$0xff]   ;;  %2414 = vmatpush3.bf16.msra.mxu0 %v2616_v19  ;;  %v2621_v24 = vld [vmem:[%s3219_s28 + $0xb0] sm:$0xff]   ;;  %v2625_v28 = vld [vmem:[%s3219_s28 + $0xa8] sm:$0xff]  }
  0xac   : > { %2442 = vmatpush3.bf16.msra.mxu1 %v2617_v20  ;;  %2415 = vmatprep.subr.bf16.mxu0 %v2618_v21  ;;  %v2626_v29 = vld [vmem:[%s3219_s28 + $0x60] sm:$0xff]   ;;  %v2630_v33 = vld [vmem:[%s3219_s28 + $0x58] sm:$0xff]   ;;  %v2634_v37 = vld [vmem:[%s3219_s28 + $0x50] sm:$0xff]   ;;  %v1040_v50 = vsub.s32 1, %v3251_v45  ;;  %v1048_v52 = vsub.s32 3, %v3251_v45  ;;  %v1036_v56 = vsub.s32 0, %v3251_v45 }
  0xad   : > { %2443 = vmatprep.subr.bf16.mxu1 %v2619_v22  ;;  %v2627_v30 = vld [vmem:[%s3219_s28 + $0xe0] sm:$0xff]   ;;  %v2631_v34 = vld [vmem:[%s3219_s28 + $0xd8] sm:$0xff]   ;;  %v2635_v38 = vld [vmem:[%s3219_s28 + $0xd0] sm:$0xff]   ;;  %v1044_v57 = vsub.s32 2, %v3251_v45 }
  0xae   : > { %v2628_v31 = vld [vmem:[%s3219_s28 + $0x20] sm:$0xff]   ;;  %v2632_v35 = vld [vmem:[%s3219_s28 + $0x18] sm:$0xff]   ;;  %v2636_v39 = vld [vmem:[%s3219_s28 + $0x10] sm:$0xff]  }
  0xaf   : > { %2416 = vmatpush3.bf16.msra.mxu0 %v2620_v23  ;;  %v2629_v32 = vld [vmem:[%s3219_s28 + $0xa0] sm:$0xff]   ;;  %v2633_v36 = vld [vmem:[%s3219_s28 + $0x98] sm:$0xff]   ;;  %v2637_v41 = vld [vmem:[%s3219_s28 + $0x90] sm:$0xff]  }
  0xb0   : > { %2444 = vmatpush3.bf16.msra.mxu1 %v2621_v24  ;;  %2417 = vmatprep.subr.bf16.mxu0 %v2622_v25  ;;  %v2638_v42 = vld [vmem:[%s3219_s28 + $0x48] sm:$0xff]   ;;  %v2642_v47 = vld [vmem:[%s3219_s28 + $0x40] sm:$0xff]   ;;  %v2646_v5 = vld [vmem:[%s3219_s28 + $0x178] sm:$0xff]  }
  0xb1   : > { %2445 = vmatprep.subr.bf16.mxu1 %v2623_v26  ;;  %v2639_v43 = vld [vmem:[%s3219_s28 + $0xc8] sm:$0xff]   ;;  %v2643_v48 = vld [vmem:[%s3219_s28 + $0xc0] sm:$0xff]   ;;  %v2647_v10 = vld [vmem:[%s3219_s28 + $0x1f8] sm:$0xff]  }
  0xb2   : > { %v2640_v44 = vld [vmem:[%s3219_s28 + $0x8] sm:$0xff]   ;;  %v2644_v49 = vld [vmem:[%s3219_s28] sm:$0xff]  }
  0xb3   : > { %2418 = vmatpush3.bf16.msra.mxu0 %v2624_v27  ;;  %v2641_v46 = vld [vmem:[%s3219_s28 + $0x88] sm:$0xff]   ;;  %v2645_v51 = vld [vmem:[%s3219_s28 + $0x80] sm:$0xff]  }
  0xb4   : > { %2446 = vmatpush3.bf16.msra.mxu1 %v2625_v28  ;;  %2419 = vmatprep.subr.bf16.mxu0 %v2626_v29  ;;  %v984_v53 = vld [vmem:[%s3217_s12] sm:$0xff]  ;;  %v985_v63 = vld [vmem:[%s3217_s12 + $0x8] sm:$0xff] }
  0xb5   : > { %2447 = vmatprep.subr.bf16.mxu1 %v2627_v30  ;;  %v988_v54 = vld [vmem:[%s3217_s12 + $0x20] sm:$0xff]  ;;  %v1000_v58 = vunpack.c.l.bf16 %v984_v53  ;;  %v1001_v59 = vunpack.c.h.bf16 %v984_v53  ;;  %v989_v0 = vld [vmem:[%s3217_s12 + $0x28] sm:$0xff]  ;;  %v1002_v3 = vunpack.c.l.bf16 %v985_v63  ;;  %v1003_v4 = vunpack.c.h.bf16 %v985_v63 }
  0xb6   : > { %v3267_v55 = vld [vmem:[%s956_s17] sm:$0xff]  ;;  %v1008_v60 = vunpack.c.l.bf16 %v988_v54  ;;  %v1009_v61 = vunpack.c.h.bf16 %v988_v54  ;;  %v1010_v6 = vunpack.c.l.bf16 %v989_v0  ;;  %v1011_v7 = vunpack.c.h.bf16 %v989_v0  ;;  %v2651_v54 = vld [vmem:[%s3219_s28 + $0x1f0] sm:$0xff]   ;;  %v2657_v63 = vld [vmem:[%s3219_s28 + $0x1a8] sm:$0xff]  }
  0xb7   : > { %2420 = vmatpush3.bf16.msra.mxu0 %v2628_v31  ;;  %v3276_v62 = vld [vmem:[%s961_s23] sm:$0xff]  ;;  %v3281_v1 = vrot.slane %v3267_v55, %v1040_v50  ;;  %v3288_v8 = vrot.slane %v3267_v55, %v1048_v52  ;;  %v3297_v13 = vrot.slane %v3267_v55, %v1036_v56  ;;  %v3305_v17 = vrot.slane %v3267_v55, %v1044_v57 }
  0xb8   : > { %2448 = vmatpush3.bf16.msra.mxu1 %v2629_v32  ;;  %2421 = vmatprep.subr.bf16.mxu0 %v2630_v33  ;;  %v3284_v2 = vrot.slane %v3276_v62, %v1040_v50  ;;  %v3291_v9 = vrot.slane %v3276_v62, %v1048_v52  ;;  %v3300_v14 = vrot.slane %v3276_v62, %v1036_v56  ;;  %v2649_v50 = vld [vmem:[%s3219_s28 + $0x1b8] sm:$0xff]   ;;  %v2650_v52 = vld [vmem:[%s3219_s28 + $0x170] sm:$0xff]   ;;  %v2658_v0 = vld [vmem:[%s3219_s28 + $0x160] sm:$0xff]  }
  0xb9   : > { %2449 = vmatprep.subr.bf16.mxu1 %v2631_v34  ;;  %v1075_v11 = vmul.f32 %v3281_v1, %v1001_v59  ;;  %v1083_v12 = vmul.f32 %v3281_v1, %v1009_v61  ;;  %v1077_v15 = vmul.f32 %v3288_v8, %v1003_v4  ;;  %v1085_v16 = vmul.f32 %v3288_v8, %v1011_v7  ;;  %v2654_v59 = vld [vmem:[%s3219_s28 + $0x168] sm:$0xff]  }
  0xba   : > { %v3308_v18 = vrot.slane %v3276_v62, %v1044_v57  ;;  %v1074_v21 = vmul.f32 %v3297_v13, %v1000_v58  ;;  %v1082_v22 = vmul.f32 %v3297_v13, %v1008_v60  ;;  %v1076_v25 = vmul.f32 %v3305_v17, %v1002_v3  ;;  %v2652_v57 = vld [vmem:[%s3219_s28 + $0x130] sm:$0xff]   ;;  %v2655_v60 = vld [vmem:[%s3219_s28 + $0x1e8] sm:$0xff]   ;;  %v992_v3 = vld [vmem:[%s3217_s12 + $0x40] sm:$0xff] }
  0xbb   : > { %2422 = vmatpush3.bf16.msra.mxu0 %v2632_v35  ;;  %v1149_v19 = vadd.f32 %v3284_v2, %v1075_v11  ;;  %v1157_v20 = vadd.f32 %v3284_v2, %v1083_v12  ;;  %v1151_v23 = vadd.f32 %v3291_v9, %v1077_v15  ;;  %v1159_v24 = vadd.f32 %v3291_v9, %v1085_v16  ;;  %v2653_v58 = vld [vmem:[%s3219_s28 + $0x1b0] sm:$0xff]   ;;  %v2656_v61 = vld [vmem:[%s3219_s28 + $0x128] sm:$0xff]   ;;  %v2659_v16 = vld [vmem:[%s3219_s28 + $0x1e0] sm:$0xff]  }
  0xbc   : > { %2450 = vmatpush3.bf16.msra.mxu1 %v2633_v36  ;;  %2423 = vmatprep.subr.bf16.mxu0 %v2634_v37  ;;  %v1084_v26 = vmul.f32 %v3305_v17, %v1010_v6  ;;  %v1148_v33 = vadd.f32 %v3300_v14, %v1074_v21  ;;  %v1156_v34 = vadd.f32 %v3300_v14, %v1082_v22  ;;  %v1052_v4 = vsub.s32 4, %v3251_v45  ;;  %v993_v7 = vld [vmem:[%s3217_s12 + $0x48] sm:$0xff] }
  0xbd   : > { %2451 = vmatprep.subr.bf16.mxu1 %v2635_v38  ;;  %vm1181_vm0 = vcmp.gt.f32.partialorder %v1149_v19, 0.0  ;;  %vm1189_vm1 = vcmp.gt.f32.partialorder %v1157_v20, 0.0  ;;  %v1213_v27 = vmul.f32 0.2, %v1149_v19  ;;  %v1221_v28 = vmul.f32 0.2, %v1157_v20 }
  0xbe   : > { %vm1183_vm2 = vcmp.gt.f32.partialorder %v1151_v23, 0.0  ;;  %vm1191_vm3 = vcmp.gt.f32.partialorder %v1159_v24, 0.0  ;;  %v1215_v29 = vmul.f32 0.2, %v1151_v23  ;;  %v1223_v30 = vmul.f32 0.2, %v1159_v24 }
  0xbf   : > { %2424 = vmatpush3.bf16.msra.mxu0 %v2636_v39  ;;  %v1245_v31 = vsel %vm1181_vm0, %v1149_v19, %v1213_v27  ;;  %v1253_v32 = vsel %vm1189_vm1, %v1157_v20, %v1221_v28  ;;  %v1150_v38 = vadd.f32 %v3308_v18, %v1076_v25  ;;  %vm1180_vm4 = vcmp.gt.f32.partialorder %v1148_v33, 0.0  ;;  %v2661_v28 = vld [vmem:[%s3219_s28 + $0x1a0] sm:$0xff]  }
  0xc0   : > { %2452 = vmatpush3.bf16.msra.mxu1 %v2637_v41  ;;  %2425 = vmatprep.subr.bf16.mxu0 %v2638_v42  ;;  %v1277_v35 = vpack.c.bf16 %v1253_v32, %v1245_v31  ;;  %v1247_v36 = vsel %vm1183_vm2, %v1151_v23, %v1215_v29  ;;  %v1255_v37 = vsel %vm1191_vm3, %v1159_v24, %v1223_v30  ;;  %vm1188_vm5 = vcmp.gt.f32.partialorder %v1156_v34, 0.0  ;;  %v2660_v23 = vld [vmem:[%s3219_s28 + $0x120] sm:$0xff]   ;;  %v2662_v29 = vld [vmem:[%s3219_s28 + $0x158] sm:$0xff]  }
  0xc1   : > { %2453 = vmatprep.subr.bf16.mxu1 %v2639_v43  ;;  %v1279_v39 = vpack.c.bf16 %v1255_v37, %v1247_v36  ;;  %v1212_v40 = vmul.f32 0.2, %v1148_v33  ;;  %v1220_v41 = vmul.f32 0.2, %v1156_v34  ;;  %v1158_v42 = vadd.f32 %v3308_v18, %v1084_v26 }
  0xc2   : > { %1840 = vmatprep.mubr.bf16.mxu0 %v1277_v35  ;;  %vm1182_vm6 = vcmp.gt.f32.partialorder %v1150_v38, 0.0  ;;  %v1214_v43 = vmul.f32 0.2, %v1150_v38  ;;  %v1017_v6 = vunpack.c.h.bf16 %v992_v3  ;;  %v1016_v11 = vunpack.c.l.bf16 %v992_v3 }
  0xc3   : > { %2426 = vmatpush3.bf16.msra.mxu0 %v2640_v44  ;;  %v2648_v44 = vld [vmem:[%s3219_s28 + $0x138] sm:$0xff]   ;;  %1889 = vmatprep.mubr.bf16.mxu1 %v1279_v39  ;;  %vm1190_vm7 = vcmp.gt.f32.partialorder %v1158_v42, 0.0  ;;  %v1056_v12 = vsub.s32 5, %v3251_v45  ;;  %v1060_v15 = vsub.s32 6, %v3251_v45  ;;  %v1019_v20 = vunpack.c.h.bf16 %v993_v7 }
  0xc4   : > { %2454 = vmatpush3.bf16.msra.mxu1 %v2641_v46  ;;  %2427 = vmatprep.subr.bf16.mxu0 %v2642_v47  ;;  %v1244_v46 = vsel %vm1180_vm4, %v1148_v33, %v1212_v40  ;;  %v1252_v47 = vsel %vm1188_vm5, %v1156_v34, %v1220_v41  ;;  %v1091_v24 = vmul.f32 %v3281_v1, %v1017_v6  ;;  %v1018_v26 = vunpack.c.l.bf16 %v993_v7  ;;  %v2663_v34 = vld [vmem:[%s3219_s28 + $0x1d8] sm:$0xff]  }
  0xc5   : > { %2455 = vmatprep.subr.bf16.mxu1 %v2643_v48  ;;  %v1222_v48 = vmul.f32 0.2, %v1158_v42  ;;  %v1090_v25 = vmul.f32 %v3297_v13, %v1016_v11  ;;  %v1093_v31 = vmul.f32 %v3288_v8, %v1019_v20  ;;  %v1064_v6 = vsub.s32 7, %v3251_v45  ;;  %v2674_v11 = vld [vmem:[%s3219_s28 + $0x140] sm:$0xff]  }
  0xc6   : > { %v1165_v35 = vadd.f32 %v3284_v2, %v1091_v24  ;;  %v1092_v37 = vmul.f32 %v3305_v17, %v1018_v26  ;;  %v3384_v20 = vrot.slane %v3267_v55, %v1056_v12  ;;  %v986_v24 = vld [vmem:[%s3217_s12 + $0x10] sm:$0xff] }
  0xc7   : > { %2428 = vmatpush3.bf16.msra.mxu0 %v2644_v49  ;;  %v1246_v49 = vsel %vm1182_vm6, %v1150_v38, %v1214_v43  ;;  %v1254_v53 = vsel %vm1190_vm7, %v1158_v42, %v1222_v48  ;;  %v1164_v36 = vadd.f32 %v3300_v14, %v1090_v25  ;;  %v1167_v39 = vadd.f32 %v3291_v9, %v1093_v31  ;;  %v2666_v43 = vld [vmem:[%s3219_s28 + $0x150] sm:$0xff]  }
  0xc8   : > { %2456 = vmatpush3.bf16.msra.mxu1 %v2645_v51  ;;  %2469 = vmatprep.subr.bf16.mxu0 %v2646_v5  ;;  %v1276_v51 = vpack.c.bf16 %v1252_v47, %v1244_v46  ;;  %v1278_v56 = vpack.c.bf16 %v1254_v53, %v1246_v49  ;;  %v996_v5 = vld [vmem:[%s3217_s12 + $0x60] sm:$0xff]  ;;  %vm1197_vm8 = vcmp.gt.f32.partialorder %v1165_v35, 0.0  ;;  %v1229_v41 = vmul.f32 0.2, %v1165_v35  ;;  %v2667_v47 = vld [vmem:[%s3219_s28 + $0x1d0] sm:$0xff]  }
  0xc9   : > { %2497 = vmatprep.subr.bf16.mxu1 %v2647_v10  ;;  %v997_v10 = vld [vmem:[%s3217_s12 + $0x68] sm:$0xff]  ;;  %v1025_v19 = vunpack.c.h.bf16 %v996_v5  ;;  %v1024_v22 = vunpack.c.l.bf16 %v996_v5  ;;  %vm1196_vm9 = vcmp.gt.f32.partialorder %v1164_v36, 0.0  ;;  %v1228_v42 = vmul.f32 0.2, %v1164_v36  ;;  %v990_v25 = vld [vmem:[%s3217_s12 + $0x30] sm:$0xff] }
  0xca   : > { %1841 = vmatmul.mubr.bf16.vlgmr.msra.gmra.mxu0 %v1276_v51  ;;  %v1027_v21 = vunpack.c.h.bf16 %v997_v10  ;;  %v1026_v27 = vunpack.c.l.bf16 %v997_v10  ;;  %vm1199_vm11 = vcmp.gt.f32.partialorder %v1167_v39, 0.0  ;;  %v1231_v46 = vmul.f32 0.2, %v1167_v39  ;;  %v2671_v5 = vld [vmem:[%s3219_s28 + $0x1c8] sm:$0xff]  }
  0xcb   : > { %2470 = vmatpush3.bf16.msra.mxu0 %v2648_v44  ;;  %1890 = vmatmul.mubr.bf16.vlgmr.msra.gmra.mxu1 %v1278_v56  ;;  %v1099_v30 = vmul.f32 %v3281_v1, %v1025_v19  ;;  %v1098_v33 = vmul.f32 %v3297_v13, %v1024_v22  ;;  %v2664_v13 = vld [vmem:[%s3219_s28 + $0x118] sm:$0xff]   ;;  %v1261_v44 = vsel %vm1197_vm8, %v1165_v35, %v1229_v41  ;;  %v2672_v10 = vld [vmem:[%s3219_s28 + $0x108] sm:$0xff]   ;;  %v1012_v31 = vunpack.c.l.bf16 %v990_v25 }
  0xcc   : > { %2471 = vmatprep.subr.bf16.mxu0 %v2650_v52  ;;  %2498 = vmatpush3.bf16.msra.mxu1 %v2649_v50  ;;  %v1101_v32 = vmul.f32 %v3288_v8, %v1027_v21  ;;  %v1100_v38 = vmul.f32 %v3305_v17, %v1026_v27  ;;  %v1260_v49 = vsel %vm1196_vm9, %v1164_v36, %v1228_v42 }
  0xcd   : > { %2499 = vmatprep.subr.bf16.mxu1 %v2651_v54  ;;  %v1173_v1 = vadd.f32 %v3284_v2, %v1099_v30  ;;  %v1172_v40 = vadd.f32 %v3300_v14, %v1098_v33  ;;  %v2665_v2 = vld [vmem:[%s3219_s28 + $0x198] sm:$0xff]   ;;  %v1166_v50 = vadd.f32 %v3308_v18, %v1092_v37  ;;  %v1263_v52 = vsel %vm1199_vm11, %v1167_v39, %v1231_v46 }
  0xce   : > { %v1175_v8 = vadd.f32 %v3291_v9, %v1101_v32  ;;  %v1174_v54 = vadd.f32 %v3308_v18, %v1100_v38  ;;  %v3379_v19 = vrot.slane %v3267_v55, %v1052_v4  ;;  %v3389_v21 = vrot.slane %v3276_v62, %v1056_v12  ;;  %v987_v33 = vld [vmem:[%s3217_s12 + $0x18] sm:$0xff]  ;;  %v3419_v38 = vld [vmem:[%s3217_s12 + $0x50] sm:$0xff] }
  0xcf   : > { %2472 = vmatpush3.bf16.msra.mxu0 %v2652_v57  ;;  %vm1205_vm10 = vcmp.gt.f32.partialorder %v1173_v1, 0.0  ;;  %v1237_v17 = vmul.f32 0.2, %v1173_v1  ;;  %vm1204_vm13 = vcmp.gt.f32.partialorder %v1172_v40, 0.0  ;;  %v1236_v48 = vmul.f32 0.2, %v1172_v40 }
  0xd0   : > { %2473 = vmatprep.subr.bf16.mxu0 %v2654_v59  ;;  %2500 = vmatpush3.bf16.msra.mxu1 %v2653_v58  ;;  %vm1207_vm12 = vcmp.gt.f32.partialorder %v1175_v8, 0.0  ;;  %v1239_v9 = vmul.f32 0.2, %v1175_v8  ;;  %vm1198_vm14 = vcmp.gt.f32.partialorder %v1166_v50, 0.0  ;;  %v1230_v58 = vmul.f32 0.2, %v1166_v50 }
  0xd1   : > { %2501 = vmatprep.subr.bf16.mxu1 %v2655_v60  ;;  %v1269_v14 = vsel %vm1205_vm10, %v1173_v1, %v1237_v17  ;;  %v1268_v57 = vsel %vm1204_vm13, %v1172_v40, %v1236_v48  ;;  %v2668_v59 = vld [vmem:[%s3219_s28 + $0x110] sm:$0xff]   ;;  %vm1206_vm15 = vcmp.gt.f32.partialorder %v1174_v54, 0.0  ;;  %v3394_v22 = vrot.slane %v3267_v55, %v1060_v15 }
  0xd2   : > { %v1285_v51 = vpack.c.bf16 %v1269_v14, %v1261_v44  ;;  %v1271_v53 = vsel %vm1207_vm12, %v1175_v8, %v1239_v9  ;;  %v1284_v60 = vpack.c.bf16 %v1268_v57, %v1260_v49  ;;  %v1262_v18 = vsel %vm1198_vm14, %v1166_v50, %v1230_v58  ;;  %v2677_v8 = vld [vmem:[%s3219_s28 + $0x180] sm:$0xff]  }
  0xd3   : > { %2474 = vmatpush3.bf16.msra.mxu0 %v2656_v61  ;;  %v1287_v56 = vpack.c.bf16 %v1271_v53, %v1263_v52  ;;  %v1238_v61 = vmul.f32 0.2, %v1174_v54  ;;  %v3400_v26 = vrot.slane %v3267_v55, %v1064_v6  ;;  %v3403_v27 = vrot.slane %v3276_v62, %v1064_v6 }
  0xd4   : > { %2475 = vmatprep.subr.bf16.mxu0 %v2658_v0  ;;  %2502 = vmatpush3.bf16.msra.mxu1 %v2657_v63  ;;  %v2669_v63 = vld [vmem:[%s3219_s28 + $0x190] sm:$0xff]   ;;  %v2670_v0 = vld [vmem:[%s3219_s28 + $0x148] sm:$0xff]   ;;  %v3408_v12 = vrot.slane %v3276_v62, %v1052_v4  ;;  %v1004_v30 = vunpack.c.l.bf16 %v986_v24  ;;  %v1005_v55 = vunpack.c.h.bf16 %v986_v24  ;;  %v1013_v32 = vunpack.c.h.bf16 %v990_v25 }
  0xd5   : > { %2503 = vmatprep.subr.bf16.mxu1 %v2659_v16  ;;  %1848 = vmatprep.mubr.bf16.mxu0 %v1285_v51  ;;  %v1270_v3 = vsel %vm1206_vm15, %v1174_v54, %v1238_v61  ;;  %v2673_v16 = vld [vmem:[%s3219_s28 + $0x188] sm:$0xff]   ;;  %v1006_v35 = vunpack.c.l.bf16 %v987_v33  ;;  %v1007_v4 = vunpack.c.h.bf16 %v987_v33  ;;  %v1086_v1 = vmul.f32 %v3379_v19, %v1012_v31  ;;  %v998_v54 = vld [vmem:[%s3217_s12 + $0x70] sm:$0xff] }
  0xd6   : > { %1897 = vmatprep.mubr.bf16.mxu1 %v1287_v56  ;;  %1849 = vmatmul.mubr.bf16.gmra.mxu0 %v1284_v60  ;;  %v1286_v7 = vpack.c.bf16 %v1270_v3, %v1262_v18  ;;  %v1087_v39 = vmul.f32 %v3384_v20, %v1013_v32  ;;  %v1021_v44 = vunpack.c.h.bf16 %v3419_v38  ;;  %v995_v60 = vld [vmem:[%s3217_s12 + $0x58] sm:$0xff]  ;;  %v1020_v32 = vunpack.c.l.bf16 %v3419_v38 }
  0xd7   : > { %2476 = vmatpush3.bf16.msra.mxu0 %v2660_v23  ;;  %v2675_v23 = vld [vmem:[%s3219_s28 + $0x1c0] sm:$0xff]   ;;  %v1081_v40 = vmul.f32 %v3400_v26, %v1007_v4 }
  0xd8   : > { %2477 = vmatprep.subr.bf16.mxu0 %v2662_v29  ;;  %2504 = vmatpush3.bf16.msra.mxu1 %v2661_v28  ;;  %v3413_v28 = vrot.slane %v3276_v62, %v1060_v15  ;;  %v2676_v29 = vld [vmem:[%s3219_s28 + $0x100] sm:$0xff]   ;;  %v1078_v62 = vmul.f32 %v3379_v19, %v1004_v30  ;;  %v1079_v15 = vmul.f32 %v3384_v20, %v1005_v55 }
  0xd9   : > { %2505 = vmatprep.subr.bf16.mxu1 %v2663_v34  ;;  %1898 = vmatmul.mubr.bf16.gmra.mxu1 %v1286_v7  ;;  %v991_v34 = vld [vmem:[%s3217_s12 + $0x38] sm:$0xff]  ;;  %v1155_v46 = vadd.f32 %v3403_v27, %v1081_v40  ;;  %v1095_v6 = vmul.f32 %v3384_v20, %v1021_v44 }
  0xda   : > { %v1014_v36 = vunpack.c.l.bf16 %v991_v34  ;;  %v1015_v37 = vunpack.c.h.bf16 %v991_v34  ;;  %v1153_v17 = vadd.f32 %v3389_v21, %v1079_v15  ;;  %v999_v7 = vld [vmem:[%s3217_s12 + $0x78] sm:$0xff] }
  0xdb   : > { %2478 = vmatpush3.bf16.msra.mxu0 %v2664_v13  ;;  %v1080_v13 = vmul.f32 %v3394_v22, %v1006_v35  ;;  %vm1187_vm2 = vcmp.gt.f32.partialorder %v1155_v46, 0.0  ;;  %v1219_v50 = vmul.f32 0.2, %v1155_v46  ;;  %v1031_v55 = vunpack.c.h.bf16 %v999_v7 }
  0xdc   : > { %2479 = vmatprep.subr.bf16.mxu0 %v2666_v43  ;;  %2506 = vmatpush3.bf16.msra.mxu1 %v2665_v2  ;;  %v1088_v41 = vmul.f32 %v3394_v22, %v1014_v36  ;;  %v1089_v42 = vmul.f32 %v3400_v26, %v1015_v37  ;;  %v1161_v2 = vadd.f32 %v3389_v21, %v1087_v39  ;;  %vm1185_vm0 = vcmp.gt.f32.partialorder %v1153_v17, 0.0 }
  0xdd   : > { %2507 = vmatprep.subr.bf16.mxu1 %v2667_v47  ;;  %v1152_v43 = vadd.f32 %v3408_v12, %v1078_v62  ;;  %v1160_v47 = vadd.f32 %v3408_v12, %v1086_v1  ;;  %v1154_v14 = vadd.f32 %v3413_v28, %v1080_v13  ;;  %v1217_v48 = vmul.f32 0.2, %v1153_v17 }
  0xde   : > { %v1163_v9 = vadd.f32 %v3403_v27, %v1089_v42  ;;  %vm1193_vm1 = vcmp.gt.f32.partialorder %v1161_v2, 0.0  ;;  %v1225_v49 = vmul.f32 0.2, %v1161_v2  ;;  %v1251_v57 = vsel %vm1187_vm2, %v1155_v46, %v1219_v50 }
  0xdf   : > { %2480 = vmatpush3.bf16.msra.mxu0 %v2668_v59  ;;  %v1249_v52 = vsel %vm1185_vm0, %v1153_v17, %v1217_v48  ;;  %vm1184_vm4 = vcmp.gt.f32.partialorder %v1152_v43, 0.0  ;;  %vm1192_vm5 = vcmp.gt.f32.partialorder %v1160_v47, 0.0  ;;  %v1216_v59 = vmul.f32 0.2, %v1152_v43 }
  0xe0   : > { %2481 = vmatprep.subr.bf16.mxu0 %v2670_v0  ;;  %2508 = vmatpush3.bf16.msra.mxu1 %v2669_v63  ;;  %vm1195_vm3 = vcmp.gt.f32.partialorder %v1163_v9, 0.0  ;;  %v1227_v51 = vmul.f32 0.2, %v1163_v9  ;;  %v1257_v53 = vsel %vm1193_vm1, %v1161_v2, %v1225_v49  ;;  %v1224_v63 = vmul.f32 0.2, %v1160_v47 }
  0xe1   : > { %2509 = vmatprep.subr.bf16.mxu1 %v2671_v5  ;;  %v1281_v56 = vpack.c.bf16 %v1257_v53, %v1249_v52  ;;  %v1162_v0 = vadd.f32 %v3413_v28, %v1088_v41  ;;  %vm1186_vm6 = vcmp.gt.f32.partialorder %v1154_v14, 0.0  ;;  %v1248_v18 = vsel %vm1184_vm4, %v1152_v43, %v1216_v59 }
  0xe2   : > { %v1259_v58 = vsel %vm1195_vm3, %v1163_v9, %v1227_v51  ;;  %v1218_v3 = vmul.f32 0.2, %v1154_v14  ;;  %v1029_v5 = vunpack.c.h.bf16 %v998_v54  ;;  %v1105_v4 = vmul.f32 %v3400_v26, %v1031_v55 }
  0xe3   : > { %2482 = vmatpush3.bf16.msra.mxu0 %v2672_v10  ;;  %v1283_v61 = vpack.c.bf16 %v1259_v58, %v1251_v57  ;;  %1938 = vmatprep.mubr.bf16.mxu0 %v1281_v56  ;;  %v1256_v10 = vsel %vm1192_vm5, %v1160_v47, %v1224_v63  ;;  %vm1194_vm7 = vcmp.gt.f32.partialorder %v1162_v0, 0.0  ;;  %v1028_v37 = vunpack.c.l.bf16 %v998_v54 }
  0xe4   : > { %2483 = vmatprep.subr.bf16.mxu0 %v2674_v11  ;;  %2510 = vmatpush3.bf16.msra.mxu1 %v2673_v16  ;;  %v1226_v11 = vmul.f32 0.2, %v1162_v0  ;;  %v1023_v16 = vunpack.c.h.bf16 %v995_v60  ;;  %v1250_v24 = vsel %vm1186_vm6, %v1154_v14, %v1218_v3  ;;  %v1103_v25 = vmul.f32 %v3384_v20, %v1029_v5 }
  0xe5   : > { %2511 = vmatprep.subr.bf16.mxu1 %v2675_v23  ;;  %1987 = vmatprep.mubr.bf16.mxu1 %v1283_v61  ;;  %v1280_v23 = vpack.c.bf16 %v1256_v10, %v1248_v18  ;;  %v1094_v20 = vmul.f32 %v3379_v19, %v1020_v32  ;;  %v1022_v1 = vunpack.c.l.bf16 %v995_v60  ;;  %v1179_v38 = vadd.f32 %v3403_v27, %v1105_v4 }
  0xe6   : > { %v1258_v30 = vsel %vm1194_vm7, %v1162_v0, %v1226_v11  ;;  %v1097_v31 = vmul.f32 %v3400_v26, %v1023_v16  ;;  %v1177_v34 = vadd.f32 %v3389_v21, %v1103_v25  ;;  %v1030_v26 = vunpack.c.l.bf16 %v999_v7 }
  0xe7   : > { %2484 = vmatpush3.bf16.msra.mxu0 %v2676_v29  ;;  %v1169_v29 = vadd.f32 %v3389_v21, %v1095_v6  ;;  %v1282_v33 = vpack.c.bf16 %v1258_v30, %v1250_v24  ;;  %v1102_v21 = vmul.f32 %v3379_v19, %v1028_v37  ;;  %v1168_v13 = vadd.f32 %v3408_v12, %v1094_v20 }
  0xe8   : > { %2512 = vmatpush3.bf16.msra.mxu1 %v2677_v8  ;;  %v1171_v36 = vadd.f32 %v3403_v27, %v1097_v31  ;;  %vm1209_vm9 = vcmp.gt.f32.partialorder %v1177_v34, 0.0  ;;  %v1241_v62 = vmul.f32 0.2, %v1177_v34  ;;  %v1096_v40 = vmul.f32 %v3394_v22, %v1022_v1 }
  0xe9   : > { %vm1201_vm8 = vcmp.gt.f32.partialorder %v1169_v29, 0.0  ;;  %v1233_v35 = vmul.f32 0.2, %v1169_v29  ;;  %vm1211_vm11 = vcmp.gt.f32.partialorder %v1179_v38, 0.0  ;;  %v1243_v42 = vmul.f32 0.2, %v1179_v38 }
  0xea   : > { %1939 = vmatmul.mubr.bf16.vlgmr.msra.gmra.mxu0 %v1280_v23  ;;  %vm1203_vm10 = vcmp.gt.f32.partialorder %v1171_v36, 0.0  ;;  %v1235_v39 = vmul.f32 0.2, %v1171_v36  ;;  %v1273_v8 = vsel %vm1209_vm9, %v1177_v34, %v1241_v62  ;;  %v1176_v2 = vadd.f32 %v3408_v12, %v1102_v21  ;;  %v1293_v21 = vld [vmem:[#allocation2] sm:$0xff] }
  0xeb   : > { %1988 = vmatmul.mubr.bf16.vlgmr.msra.gmra.mxu1 %v1282_v33  ;;  %v1265_v15 = vsel %vm1201_vm8, %v1169_v29, %v1233_v35  ;;  %vm1200_vm12 = vcmp.gt.f32.partialorder %v1168_v13, 0.0  ;;  %v1232_v43 = vmul.f32 0.2, %v1168_v13  ;;  %v1104_v27 = vmul.f32 %v3394_v22, %v1030_v26  ;;  %v1292_v35 = vld [vmem:[#allocation2 + $0x10] sm:$0xff] }
  0xec   : > { %v1289_v41 = vpack.c.bf16 %v1273_v8, %v1265_v15  ;;  %v1267_v17 = vsel %vm1203_vm10, %v1171_v36, %v1235_v39  ;;  %v1275_v44 = vsel %vm1211_vm11, %v1179_v38, %v1243_v42  ;;  %v1170_v19 = vadd.f32 %v3413_v28, %v1096_v40 }
  0xed   : > { %v1291_v46 = vpack.c.bf16 %v1275_v44, %v1267_v17  ;;  %vm1208_vm13 = vcmp.gt.f32.partialorder %v1176_v2, 0.0  ;;  %v1240_v9 = vmul.f32 0.2, %v1176_v2  ;;  %v1264_v47 = vsel %vm1200_vm12, %v1168_v13, %v1232_v43 }
  0xee   : > { %1946 = vmatprep.mubr.bf16.mxu0 %v1289_v41  ;;  %v1178_v14 = vadd.f32 %v3413_v28, %v1104_v27  ;;  %vm1202_vm14 = vcmp.gt.f32.partialorder %v1170_v19, 0.0  ;;  %v1234_v48 = vmul.f32 0.2, %v1170_v19 }
  0xef   : > { %1995 = vmatprep.mubr.bf16.mxu1 %v1291_v46  ;;  %v1272_v49 = vsel %vm1208_vm13, %v1176_v2, %v1240_v9 }
  0xf0   : > { %v1288_v50 = vpack.c.bf16 %v1272_v49, %v1264_v47  ;;  %vm1210_vm15 = vcmp.gt.f32.partialorder %v1178_v14, 0.0  ;;  %v1242_v12 = vmul.f32 0.2, %v1178_v14  ;;  %v1266_v51 = vsel %vm1202_vm14, %v1170_v19, %v1234_v48  ;;  %v1294_v49 = vld [vmem:[#allocation2 + $0x18] sm:$0xff] }
  0xf2   : > { %1947 = vmatmul.mubr.bf16.gmra.mxu0 %v1288_v50  ;;  %v1274_v22 = vsel %vm1210_vm15, %v1178_v14, %v1242_v12 }
  0xf3   : > { %v1290_v52 = vpack.c.bf16 %v1274_v22, %v1266_v51 }
  0xf5   : > { %1996 = vmatmul.mubr.bf16.gmra.mxu1 %v1290_v52 }
 0x18a   : > { %v2429_v53 = vpop.f32.mrf.mxu0 }
 0x18b   : > { %v2457_v54 = vpop.f32.mrf.mxu1 }
 0x18c   : > { %v2430_v56 = vpop.f32.mrf.mxu0 }
 0x18d   : > { %v2458_v57 = vpop.f32.mrf.mxu1  ;;  %v2431_v7 = vadd.f32 %v2430_v56, %v2429_v53  ;;  %v1295_v56 = vld [vmem:[#allocation2 + $0x8] sm:$0xff] }
 0x18e   : > { %v2432_v58 = vpop.f32.mrf.mxu0  ;;  %v2459_v10 = vadd.f32 %v2458_v57, %v2457_v54 }
 0x18f   : > { %v2460_v59 = vpop.f32.mrf.mxu1 }
 0x190   : > { %v2433_v60 = vpop.f32.mrf.mxu0  ;;  %v1892_v25 = vadd.f32 %v2459_v10, %v2431_v7 }
 0x191   : > { %v2461_v28 = vpop.f32.mrf.mxu1  ;;  %v2434_v29 = vadd.f32 %v2433_v60, %v2432_v58 }
 0x192   : > { %v2462_v30 = vadd.f32 %v2461_v28, %v2460_v59 }
 0x194   : > { %v1895_v37 = vadd.f32 %v2462_v30, %v2434_v29 }
 0x196   : > { %v2435_v61 = vpop.f32.mrf.mxu0 }
 0x198   : > { %v2436_v0 = vpop.f32.mrf.mxu0 }
 0x199   : > { %v2463_v63 = vpop.f32.mrf.mxu1  ;;  %v2437_v13 = vadd.f32 %v2436_v0, %v2435_v61 }
 0x19a   : > { %v2438_v3 = vpop.f32.mrf.mxu0 }
 0x19b   : > { %v2464_v18 = vpop.f32.mrf.mxu1 }
 0x19c   : > { %v2439_v6 = vpop.f32.mrf.mxu0  ;;  %v2465_v26 = vadd.f32 %v2464_v18, %v2463_v63 }
 0x19d   : > { %v2466_v5 = vpop.f32.mrf.mxu1  ;;  %v2440_v2 = vadd.f32 %v2439_v6, %v2438_v3 }
 0x19e   : > { %v1900_v17 = vadd.f32 %v2465_v26, %v2437_v13 }
 0x19f   : > { %v2467_v11 = vpop.f32.mrf.mxu1 }
 0x1a0   : > { %v2468_v43 = vadd.f32 %v2467_v11, %v2466_v5 }
 0x1a2   : > { %v1903_v48 = vadd.f32 %v2468_v43, %v2440_v2 }
 0x1aa   : > { %v2485_v16 = vpop.f32.mrf.mxu0 }
 0x1ab   : > { %v2513_v23 = vpop.f32.mrf.mxu1 }
 0x1ac   : > { %v2486_v24 = vpop.f32.mrf.mxu0 }
 0x1ad   : > { %v2487_v55 = vadd.f32 %v2486_v24, %v2485_v16  ;;  %v2514_v31 = vpop.f32.mrf.mxu1 }
 0x1ae   : > { %v2488_v32 = vpop.f32.mrf.mxu0  ;;  %v2515_v34 = vadd.f32 %v2514_v31, %v2513_v23 }
 0x1af   : > { %v1941_v33 = vadd.f32 %v2487_v55, %v1892_v25  ;;  %v2516_v4 = vpop.f32.mrf.mxu1 }
 0x1b0   : > { %v2489_v36 = vpop.f32.mrf.mxu0 }
 0x1b1   : > { %v1990_v20 = vadd.f32 %v2515_v34, %v1941_v33  ;;  %v2490_v62 = vadd.f32 %v2489_v36, %v2488_v32  ;;  %v2517_v15 = vpop.f32.mrf.mxu1 }
 0x1b2   : > { %v2518_v39 = vadd.f32 %v2517_v15, %v2516_v4  ;;  %v2491_v41 = vpop.f32.mrf.mxu0 }
 0x1b3   : > { %v2004_v1 = vadd.f32 %v1990_v20, %v1292_v35  ;;  %v1944_v38 = vadd.f32 %v2490_v62, %v1895_v37 }
 0x1b4   : > { %v2492_v42 = vpop.f32.mrf.mxu0 }
 0x1b5   : > { %2008 = vst [vmem:[#allocation2 + $0x10] sm:$0xff] %v2004_v1  ;;  %v1993_v8 = vadd.f32 %v2518_v39, %v1944_v38  ;;  %v2519_v27 = vpop.f32.mrf.mxu1  ;;  %v2493_v44 = vadd.f32 %v2492_v42, %v2491_v41 }
 0x1b6   : > { %v2494_v19 = vpop.f32.mrf.mxu0 }
 0x1b7   : > { %v2005_v40 = vadd.f32 %v1993_v8, %v1293_v21  ;;  %v1949_v46 = vadd.f32 %v2493_v44, %v1900_v17  ;;  %v2520_v9 = vpop.f32.mrf.mxu1 }
 0x1b8   : > { %v2521_v47 = vadd.f32 %v2520_v9, %v2519_v27  ;;  %v2495_v14 = vpop.f32.mrf.mxu0 }
 0x1b9   : > { %2009 = vst [vmem:[#allocation2] sm:$0xff] %v2005_v40  ;;  %v2522_v50 = vpop.f32.mrf.mxu1  ;;  %v2496_v12 = vadd.f32 %v2495_v14, %v2494_v19 }
 0x1ba   : > { %v1998_v51 = vadd.f32 %v2521_v47, %v1949_v46 }
 0x1bb   : > { %v1952_v22 = vadd.f32 %v2496_v12, %v1903_v48  ;;  %v2523_v52 = vpop.f32.mrf.mxu1 }
 0x1bc   : > { %v2006_v53 = vadd.f32 %v1998_v51, %v1294_v49  ;;  %v2524_v54 = vadd.f32 %v2523_v52, %v2522_v50 }
 0x1be   : > { %2010 = vst [vmem:[#allocation2 + $0x18] sm:$0xff] %v2006_v53  ;;  %v2001_v57 = vadd.f32 %v2524_v54, %v1952_v22  ;;  %2015 = sbr.rel (%p2387_p6) target bundleno = 477 (0x1dd), region = 112 }
 0x1c0   : > { %v2007_v58 = vadd.f32 %v2001_v57, %v1295_v56 }
 0x1c2   : > { %2011 = vst [vmem:[#allocation2 + $0x8] sm:$0xff] %v2007_v58 }
 0x1c3   : > { %v2016_v59 = vld [vmem:[#allocation2 + $0x10] sm:$0xff]  ;;  %v2017_v60 = vld [vmem:[#allocation2] sm:$0xff]  ;;  %vm2045_vm0 = vcmp.eq.s32.totalorder %v3251_v45, 1  ;;  %vm2044_vm1 = vcmp.eq.s32.totalorder %v3251_v45, 0 }
 0x1c4   : > { %v2020_v63 = vadd.f32 %v2017_v60, %v2016_v59  ;;  %v2029_v0 = vmul.f32 %v2016_v59, %v2016_v59  ;;  %v2030_v18 = vmul.f32 %v2017_v60, %v2017_v60  ;;  %v2405_v5 = vpack.c.bf16 %v2017_v60, %v2016_v59 }
 0x1c5   : > { %v2018_v28 = vld [vmem:[#allocation2 + $0x18] sm:$0xff] }
 0x1c6   : > { %v2031_v3 = vmul.f32 %v2018_v28, %v2018_v28  ;;  %v2021_v7 = vadd.f32 %v2020_v63, %v2018_v28  ;;  %v2033_v11 = vadd.f32 %v2030_v18, %v2029_v0  ;;  %2406 = vst [vmem:[%s3221_s14] sm:$0xff] %v2405_v5  }
 0x1c8   : > { %v2034_v23 = vadd.f32 %v2033_v11, %v2031_v3 }
 0x1c9   : > { %v2019_v61 = vld [vmem:[#allocation2 + $0x8] sm:$0xff] }
 0x1ca   : > { %v2410_v6 = vpack.c.bf16 %v2019_v61, %v2018_v28  ;;  %v2032_v10 = vmul.f32 %v2019_v61, %v2019_v61  ;;  %v2022_v16 = vadd.f32 %v2021_v7, %v2019_v61 }
 0x1cc   : > { %2412 = vst [vmem:[%s3221_s14 + $0x8] sm:$0xff] %v2410_v6   ;;  %v2023_v24 = vrot.slane %v2022_v16, 4  ;;  %v2035_v25 = vadd.f32 %v2034_v23, %v2032_v10 }
 0x1ce   : > { %v2024_v29 = vadd.f32 %v2023_v24, %v2022_v16  ;;  %v2036_v30 = vrot.slane %v2035_v25, 4 }
 0x1d0   : > { %v2025_v55 = vrot.slane %v2024_v29, 2  ;;  %v2037_v31 = vadd.f32 %v2036_v30, %v2035_v25 }
 0x1d2   : > { %v2026_v32 = vadd.f32 %v2025_v55, %v2024_v29  ;;  %v2038_v33 = vrot.slane %v2037_v31, 2 }
 0x1d4   : > { %v2027_v34 = vrot.slane %v2026_v32, 1  ;;  %v2039_v35 = vadd.f32 %v2038_v33, %v2037_v31 }
 0x1d6   : > { %v2040_v4 = vrot.slane %v2039_v35, 1  ;;  %v2028_v36 = vadd.f32 %v2027_v34, %v2026_v32 }
 0x1d8   : > { %v2041_v37 = vadd.f32 %v2040_v4, %v2039_v35 }
 0x1da   : > { %v2046_v20 = vsel %vm2045_vm0, %v2041_v37, 0.0 }
 0x1db   : > { %v2047_v62 = vsel %vm2044_vm1, %v2028_v36, %v2046_v20 }
 0x1dc   : > { %2048 = vst [vmem:[%s3215_s18] sm:$0xff] %v2047_v62 }
 0x1dd PF: > { %2083 = sbr.rel (!%p2896_p12) target bundleno = 482 (0x1e2), region = 116  ;;  %s2393_s27 = sshll.u32 (%p2896_p12), %s2752_s4, 2  ;;  %v2105_v15 = vld [vmem:[%s3221_s14] sm:$0xf] (%p2896_p12)  ;;  %v2107_v1 = vld [vmem:[%s3221_s14 + $0x4] sm:$0xf] (%p2896_p12) }
 0x1de   : > { %s2088_s11 = scalar_lea.vmem (%p2896_p12), %s3514_s5, %s2393_s27  ;;  %v2109_v45 = vld [vmem:[%s3221_s14 + $0x8] sm:$0xf] (%p2896_p12)  ;;  %v2111_v38 = vld [vmem:[%s3221_s14 + $0xc] sm:$0xf] (%p2896_p12) }
 0x1df   : > { %2106 = vst [vmem:[%s2088_s11] sm:$0xf] (%p2896_p12), %v2105_v15  ;;  %2108 = vst [vmem:[%s2088_s11 + $0x8] sm:$0xf] (%p2896_p12), %v2107_v1 }
 0x1e0   : > { %2110 = vst [vmem:[%s2088_s11 + $0x10] sm:$0xf] (%p2896_p12), %v2109_v45  ;;  %2112 = vst [vmem:[%s2088_s11 + $0x18] sm:$0xf] (%p2896_p12), %v2111_v38 }
 0x1e2 PF: > { %s17_s30 = sadd.s32 1, %s2764_s30   ;;  %s3532_s4 = sld [smem:[#allocation10_spill]] }
 0x1e3   : > { %p14_p7 = scmp.ge.s32.totalorder %s17_s30, 6   ;;  %s3533_s27 = sld [smem:[#allocation6_spill]] }
 0x1e4   : > { %s3534_s8 = sld [smem:[#allocation7_spill]]  ;;  %s3537_s21 = smov %s2728_s22 }
 0x1e5   : > { %s3535_s28 = sld [smem:[#allocation8_spill]]  ;;  %s3538_s22 = smov %s2894_s20 }
 0x1e6   : > { %s3536_s29 = sld [smem:[#allocation9_spill]]  ;;  %s3539_s23 = smov %s2736_s24 }
 0x1e7   : > { %s3540_s24 = smov %s2891_s19  ;;  %s3541_s25 = smov %s2744_s26 }
 0x1e8   : > { %s3542_s26 = smov %s3532_s4  ;;  %16 = sbr.rel (!%p14_p7) target bundleno = 9 (0x9), region = 217 }
 0x1ea   : > { %s3543_s4 = smov %s3534_s8 }

// kernel: patchgan_forward.8
= control target key start
LH: loop header
LB: loop body
LE: loop exit
PB: predicated region body
PF: predicated region fallthrough
CT: control target
= control target key end

     0   :  { %s3580_s0 = inlined_call_operand.vmem [shape: bf16[32,4096], index: 0, kind: input, shape index: {}]   ;;  %s3581_s1 = inlined_call_operand.vmem [shape: bf16[4096,512], index: 1, kind: input, shape index: {}]   ;;  %s3582_s2 = inlined_call_operand.vmem [shape: f32[1,4096], index: 2, kind: input, shape index: {}]   ;;  %s3583_s3 = inlined_call_operand.vmem [shape: f32[1,4096], index: 3, kind: input, shape index: {}]   ;;  %s3584_s4 = inlined_call_operand.vmem [shape: f32[1,512], index: 4, kind: input, shape index: {}]   ;;  %s3585_s5 = inlined_call_operand.vmem [shape: bf16[32,512], index: 5, kind: output, shape index: {0}]   ;;  %s3586_s6 = inlined_call_operand.vmem [shape: f32[8,512], index: 6, kind: output, shape index: {1}]  }
   0x1   :  { %3591 = sst [smem:[#allocation11_spill]] %s3580_s0 }
   0x2   :  { %3592 = sst [smem:[#allocation12_spill]] %s3581_s1 }
   0x3   :  { %s2883_s21 = smov 0   ;;  %s2885_s22 = smov 0  }
   0x4   :  { %s2887_s23 = smov 0   ;;  %s2889_s24 = smov 0  }
   0x5   :  { %s2891_s25 = smov 0   ;;  %s2893_s26 = smov 0  }
   0x6   :  { %s2895_s27 = smov 0   ;;  %s2897_s4 = smov 0  }
   0x7   :  { %s2899_s28 = smov 0   ;;  %s2901_s29 = smov 0  }
   0x8   :  { %s2903_s30 = smov 0  }
   0x9 LB: > { %3593 = sst [smem:[#allocation6_spill]] %s2835_s28  ;;  %s2357_s7 = sadd.s32 4294967295, %s2843_s30   ;;  %s2843_s30 = sphi %s2903_s30, %s17_s30   ;;  %s2839_s29 = sphi %s2901_s29, %s3609_s29   ;;  %s2835_s28 = sphi %s2899_s28, %s3608_s28   ;;  %s2831_s4 = sphi %s2897_s4, %s3616_s4   ;;  %s2827_s27 = sphi %s2895_s27, %s3606_s27   ;;  %s2823_s26 = sphi %s2893_s26, %s3615_s26   ;;  %s2819_s25 = sphi %s2891_s25, %s3614_s25   ;;  %s2815_s24 = sphi %s2889_s24, %s3613_s24   ;;  %s2811_s23 = sphi %s2887_s23, %s3612_s23   ;;  %s2807_s22 = sphi %s2885_s22, %s3611_s22   ;;  %s2803_s21 = sphi %s2883_s21, %s3610_s21  }
   0xa   : > { %3594 = sst [smem:[#allocation7_spill]] %s2839_s29  ;;  %s29_s8 = sadd.s32 1, %s2835_s28 }
   0xb   : > { %p30_p0 = scmp.ge.s32.totalorder %s29_s8, 4  ;;  %s32_s9 = sadd.s32 1, %s2839_s29 }
   0xc   : > { %s45_s10 = sadd.s32 1, %s2823_s26  ;;  %p52_p1 = scmp.ne.s32.totalorder %s2823_s26, %s2819_s25 }
   0xd   : > { %s3618_s8 = smov (%p30_p0, %s29_s8), 0  ;;  %s3620_s9 = smov (!%p30_p0, %s32_s9), %s2839_s29 }
   0xe   : > { %3595 = sst [smem:[#allocation8_spill]] %s3618_s8  ;;  %s41_s11 = ssub.s32 %s2835_s28, %s3618_s8 }
   0xf   : > { %p53_p2 = scmp.eq.s32.totalorder %s2843_s30, 0  ;;  %p34_p3 = scmp.ge.s32.totalorder %s3620_s9, 4 }
  0x10   : > { %p43_p4 = scmp.eq.s32.totalorder %s41_s11, 0  ;;  %s73_s13 = sadd.s32 1, %s2815_s24 }
  0x11   : > { %p2950_p5 = por %p53_p2, %p52_p1  ;;  %s3622_s9 = smov (%p34_p3, %s3620_s9), 0 }
  0x12   : > { %3597 = sst [smem:[#allocation9_spill]] %s3622_s9  ;;  %s69_s15 = ssub.s32 %s2839_s29, %s3622_s9 }
  0x13   : > { %s2958_s14 = scalar_select %p43_p4, %s2823_s26, %s45_s10  }
  0x14   : > { %p80_p6 = scmp.ne.s32.totalorder %s2815_s24, %s2811_s23  ;;  %s70_s16 = sor.u32 %s69_s15, %s41_s11 }
  0x15   : > { %3598 = sst [smem:[#allocation10_spill]] %s2958_s14  ;;  %p177_p7 = scmp.eq.s32.totalorder %s69_s15, 0 }
  0x16   : > { %p71_p8 = scmp.eq.s32.totalorder %s70_s16, 0  ;;  %p2964_p9 = por %p80_p6, %p53_p2 }
  0x17   : > { %s179_s18 = sadd.s32 1, %s2807_s22  ;;  %p189_p10 = scmp.ne.s32.totalorder %s2807_s22, %s2803_s21 }
  0x18   : > { %s2972_s19 = scalar_select %p71_p8, %s2815_s24, %s73_s13  }
  0x19   : > { %s2975_s20 = scalar_select %p177_p7, %s2807_s22, %s179_s18  }
  0x1a   : > { %p190_p11 = scmp.eq.s32.totalorder %s2357_s7, 15  ;;  %p2360_p13 = scmp.ge.s32.totalorder %s2843_s30, 16 }
  0x1c   : > { %p2977_p12 = por %p190_p11, %p189_p10  ;;  %240 = sbr.rel (%p2360_p13) target bundleno = 146 (0x92), region = 16 }
  0x21   : > { %243 = sbr.rel (!%p2950_p5) target bundleno = 51 (0x33), region = 20  ;;  %s245_s10 = sand.u32 (%p2950_p5), 1, %s2823_s26  }
  0x22   : > { %s2473_s11 = sshll.u32 (%p2950_p5), %s2835_s28, 5  ;;  %s2361_s15 = sshll.u32 (%p2950_p5), %s245_s10, 7 }
  0x23   : > { %s3601_s0 = sld [smem:[#allocation11_spill]] (%p2950_p5)  ;;  %s247_s7 = scalar_lea.vmem (%p2950_p5), [#allocation3], %s2361_s15 }
  0x29   : > { %s2989_s18 = scalar_lea.vmem %s3601_s0, %s2473_s11 }
  0x2a   : > { %v266_v0 = vld [vmem:[%s2989_s18] sm:$0xff]  ;;  %v268_v1 = vld [vmem:[%s2989_s18 + $0x8] sm:$0xff]  ;;  %v270_v2 = vld [vmem:[%s2989_s18 + $0x10] sm:$0xff] }
  0x2b   : > { %267 = vst [vmem:[%s247_s7] sm:$0xff] %v266_v0  ;;  %269 = vst [vmem:[%s247_s7 + $0x8] sm:$0xff] %v268_v1  ;;  %v272_v3 = vld [vmem:[%s2989_s18 + $0x18] sm:$0xff]  ;;  %v274_v4 = vld [vmem:[%s2989_s18 + $0x80] sm:$0xff] }
  0x2c   : > { %271 = vst [vmem:[%s247_s7 + $0x10] sm:$0xff] %v270_v2  ;;  %v276_v5 = vld [vmem:[%s2989_s18 + $0x88] sm:$0xff]  ;;  %273 = vst [vmem:[%s247_s7 + $0x18] sm:$0xff] %v272_v3  ;;  %v278_v6 = vld [vmem:[%s2989_s18 + $0x90] sm:$0xff] }
  0x2d   : > { %275 = vst [vmem:[%s247_s7 + $0x20] sm:$0xff] %v274_v4  ;;  %277 = vst [vmem:[%s247_s7 + $0x28] sm:$0xff] %v276_v5  ;;  %v280_v7 = vld [vmem:[%s2989_s18 + $0x98] sm:$0xff]  ;;  %v282_v8 = vld [vmem:[%s2989_s18 + $0x100] sm:$0xff] }
  0x2e   : > { %279 = vst [vmem:[%s247_s7 + $0x30] sm:$0xff] %v278_v6  ;;  %281 = vst [vmem:[%s247_s7 + $0x38] sm:$0xff] %v280_v7  ;;  %v284_v9 = vld [vmem:[%s2989_s18 + $0x108] sm:$0xff]  ;;  %v286_v10 = vld [vmem:[%s2989_s18 + $0x110] sm:$0xff] }
  0x2f   : > { %283 = vst [vmem:[%s247_s7 + $0x40] sm:$0xff] %v282_v8  ;;  %v288_v11 = vld [vmem:[%s2989_s18 + $0x118] sm:$0xff]  ;;  %285 = vst [vmem:[%s247_s7 + $0x48] sm:$0xff] %v284_v9  ;;  %v290_v12 = vld [vmem:[%s2989_s18 + $0x180] sm:$0xff] }
  0x30   : > { %287 = vst [vmem:[%s247_s7 + $0x50] sm:$0xff] %v286_v10  ;;  %289 = vst [vmem:[%s247_s7 + $0x58] sm:$0xff] %v288_v11  ;;  %v292_v13 = vld [vmem:[%s2989_s18 + $0x188] sm:$0xff]  ;;  %v294_v14 = vld [vmem:[%s2989_s18 + $0x190] sm:$0xff] }
  0x31   : > { %291 = vst [vmem:[%s247_s7 + $0x60] sm:$0xff] %v290_v12  ;;  %293 = vst [vmem:[%s247_s7 + $0x68] sm:$0xff] %v292_v13  ;;  %v296_v15 = vld [vmem:[%s2989_s18 + $0x198] sm:$0xff] }
  0x32   : > { %295 = vst [vmem:[%s247_s7 + $0x70] sm:$0xff] %v294_v14  ;;  %297 = vst [vmem:[%s247_s7 + $0x78] sm:$0xff] %v296_v15 }
  0x33 PF: > { %303 = sbr.rel (!%p2964_p9) target bundleno = 146 (0x92), region = 43  ;;  %s305_s12 = sand.u32 (%p2964_p9), 1, %s2815_s24  }
  0x34   : > { %s2474_s10 = sshll.u32 (%p2964_p9), %s2835_s28, 9  ;;  %s2364_s11 = sshll.u32 (%p2964_p9), %s305_s12, 9 }
  0x35   : > { %s310_s15 = sadd.s32 (%p2964_p9), %s2839_s29, %s2474_s10  ;;  %s3602_s1 = sld [smem:[#allocation12_spill]] (%p2964_p9) }
  0x36   : > { %s2367_s13 = sshll.u32 (%p2964_p9), %s310_s15, 2  ;;  %s3020_s17 = scalar_lea.vmem (%p2964_p9), [#allocation4], %s2364_s11 }
  0x3b   : > { %s3015_s9 = scalar_lea.vmem %s3602_s1, %s2367_s13 }
  0x3c   : > { %v329_v16 = vld [vmem:[%s3015_s9] sm:$0xf]  ;;  %v331_v17 = vld [vmem:[%s3015_s9 + $0x10] sm:$0xf] }
  0x3d   : > { %v333_v18 = vld [vmem:[%s3015_s9 + $0x20] sm:$0xf]  ;;  %330 = vst [vmem:[%s3020_s17] sm:$0xf] %v329_v16  ;;  %332 = vst [vmem:[%s3020_s17 + $0x4] sm:$0xf] %v331_v17 }
  0x3e   : > { %334 = vst [vmem:[%s3020_s17 + $0x8] sm:$0xf] %v333_v18  ;;  %v335_v19 = vld [vmem:[%s3015_s9 + $0x30] sm:$0xf]  ;;  %v337_v20 = vld [vmem:[%s3015_s9 + $0x40] sm:$0xf] }
  0x3f   : > { %v339_v21 = vld [vmem:[%s3015_s9 + $0x50] sm:$0xf]  ;;  %336 = vst [vmem:[%s3020_s17 + $0xc] sm:$0xf] %v335_v19  ;;  %338 = vst [vmem:[%s3020_s17 + $0x10] sm:$0xf] %v337_v20 }
  0x40   : > { %340 = vst [vmem:[%s3020_s17 + $0x14] sm:$0xf] %v339_v21  ;;  %v341_v22 = vld [vmem:[%s3015_s9 + $0x60] sm:$0xf]  ;;  %v343_v23 = vld [vmem:[%s3015_s9 + $0x70] sm:$0xf] }
  0x41   : > { %v345_v24 = vld [vmem:[%s3015_s9 + $0x80] sm:$0xf]  ;;  %342 = vst [vmem:[%s3020_s17 + $0x18] sm:$0xf] %v341_v22  ;;  %344 = vst [vmem:[%s3020_s17 + $0x1c] sm:$0xf] %v343_v23 }
  0x42   : > { %346 = vst [vmem:[%s3020_s17 + $0x20] sm:$0xf] %v345_v24  ;;  %v347_v25 = vld [vmem:[%s3015_s9 + $0x90] sm:$0xf]  ;;  %v349_v26 = vld [vmem:[%s3015_s9 + $0xa0] sm:$0xf] }
  0x43   : > { %v351_v27 = vld [vmem:[%s3015_s9 + $0xb0] sm:$0xf]  ;;  %348 = vst [vmem:[%s3020_s17 + $0x24] sm:$0xf] %v347_v25  ;;  %350 = vst [vmem:[%s3020_s17 + $0x28] sm:$0xf] %v349_v26 }
  0x44   : > { %352 = vst [vmem:[%s3020_s17 + $0x2c] sm:$0xf] %v351_v27  ;;  %v353_v28 = vld [vmem:[%s3015_s9 + $0xc0] sm:$0xf]  ;;  %v355_v29 = vld [vmem:[%s3015_s9 + $0xd0] sm:$0xf] }
  0x45   : > { %v357_v30 = vld [vmem:[%s3015_s9 + $0xe0] sm:$0xf]  ;;  %354 = vst [vmem:[%s3020_s17 + $0x30] sm:$0xf] %v353_v28  ;;  %356 = vst [vmem:[%s3020_s17 + $0x34] sm:$0xf] %v355_v29 }
  0x46   : > { %358 = vst [vmem:[%s3020_s17 + $0x38] sm:$0xf] %v357_v30  ;;  %v359_v31 = vld [vmem:[%s3015_s9 + $0xf0] sm:$0xf]  ;;  %v361_v32 = vld [vmem:[%s3015_s9 + $0x100] sm:$0xf] }
  0x47   : > { %v363_v33 = vld [vmem:[%s3015_s9 + $0x110] sm:$0xf]  ;;  %360 = vst [vmem:[%s3020_s17 + $0x3c] sm:$0xf] %v359_v31  ;;  %362 = vst [vmem:[%s3020_s17 + $0x40] sm:$0xf] %v361_v32 }
  0x48   : > { %364 = vst [vmem:[%s3020_s17 + $0x44] sm:$0xf] %v363_v33  ;;  %v365_v34 = vld [vmem:[%s3015_s9 + $0x120] sm:$0xf]  ;;  %v367_v35 = vld [vmem:[%s3015_s9 + $0x130] sm:$0xf] }
  0x49   : > { %v369_v36 = vld [vmem:[%s3015_s9 + $0x140] sm:$0xf]  ;;  %366 = vst [vmem:[%s3020_s17 + $0x48] sm:$0xf] %v365_v34  ;;  %368 = vst [vmem:[%s3020_s17 + $0x4c] sm:$0xf] %v367_v35 }
  0x4a   : > { %370 = vst [vmem:[%s3020_s17 + $0x50] sm:$0xf] %v369_v36  ;;  %v371_v37 = vld [vmem:[%s3015_s9 + $0x150] sm:$0xf]  ;;  %v373_v38 = vld [vmem:[%s3015_s9 + $0x160] sm:$0xf] }
  0x4b   : > { %v375_v39 = vld [vmem:[%s3015_s9 + $0x170] sm:$0xf]  ;;  %372 = vst [vmem:[%s3020_s17 + $0x54] sm:$0xf] %v371_v37  ;;  %374 = vst [vmem:[%s3020_s17 + $0x58] sm:$0xf] %v373_v38 }
  0x4c   : > { %376 = vst [vmem:[%s3020_s17 + $0x5c] sm:$0xf] %v375_v39  ;;  %v377_v40 = vld [vmem:[%s3015_s9 + $0x180] sm:$0xf]  ;;  %v379_v41 = vld [vmem:[%s3015_s9 + $0x190] sm:$0xf] }
  0x4d   : > { %v381_v42 = vld [vmem:[%s3015_s9 + $0x1a0] sm:$0xf]  ;;  %378 = vst [vmem:[%s3020_s17 + $0x60] sm:$0xf] %v377_v40  ;;  %380 = vst [vmem:[%s3020_s17 + $0x64] sm:$0xf] %v379_v41 }
  0x4e   : > { %382 = vst [vmem:[%s3020_s17 + $0x68] sm:$0xf] %v381_v42  ;;  %v383_v43 = vld [vmem:[%s3015_s9 + $0x1b0] sm:$0xf]  ;;  %v385_v44 = vld [vmem:[%s3015_s9 + $0x1c0] sm:$0xf] }
  0x4f   : > { %v387_v45 = vld [vmem:[%s3015_s9 + $0x1d0] sm:$0xf]  ;;  %384 = vst [vmem:[%s3020_s17 + $0x6c] sm:$0xf] %v383_v43  ;;  %386 = vst [vmem:[%s3020_s17 + $0x70] sm:$0xf] %v385_v44 }
  0x50   : > { %388 = vst [vmem:[%s3020_s17 + $0x74] sm:$0xf] %v387_v45  ;;  %v389_v46 = vld [vmem:[%s3015_s9 + $0x1e0] sm:$0xf]  ;;  %v391_v47 = vld [vmem:[%s3015_s9 + $0x1f0] sm:$0xf] }
  0x51   : > { %v393_v48 = vld [vmem:[%s3015_s9 + $0x200] sm:$0xf]  ;;  %390 = vst [vmem:[%s3020_s17 + $0x78] sm:$0xf] %v389_v46  ;;  %392 = vst [vmem:[%s3020_s17 + $0x7c] sm:$0xf] %v391_v47 }
  0x52   : > { %394 = vst [vmem:[%s3020_s17 + $0x80] sm:$0xf] %v393_v48  ;;  %v395_v49 = vld [vmem:[%s3015_s9 + $0x210] sm:$0xf]  ;;  %v397_v50 = vld [vmem:[%s3015_s9 + $0x220] sm:$0xf] }
  0x53   : > { %v399_v51 = vld [vmem:[%s3015_s9 + $0x230] sm:$0xf]  ;;  %396 = vst [vmem:[%s3020_s17 + $0x84] sm:$0xf] %v395_v49  ;;  %398 = vst [vmem:[%s3020_s17 + $0x88] sm:$0xf] %v397_v50 }
  0x54   : > { %400 = vst [vmem:[%s3020_s17 + $0x8c] sm:$0xf] %v399_v51  ;;  %v401_v52 = vld [vmem:[%s3015_s9 + $0x240] sm:$0xf]  ;;  %v403_v53 = vld [vmem:[%s3015_s9 + $0x250] sm:$0xf] }
  0x55   : > { %v405_v54 = vld [vmem:[%s3015_s9 + $0x260] sm:$0xf]  ;;  %402 = vst [vmem:[%s3020_s17 + $0x90] sm:$0xf] %v401_v52  ;;  %404 = vst [vmem:[%s3020_s17 + $0x94] sm:$0xf] %v403_v53 }
  0x56   : > { %406 = vst [vmem:[%s3020_s17 + $0x98] sm:$0xf] %v405_v54  ;;  %v407_v55 = vld [vmem:[%s3015_s9 + $0x270] sm:$0xf]  ;;  %v409_v56 = vld [vmem:[%s3015_s9 + $0x280] sm:$0xf] }
  0x57   : > { %v411_v57 = vld [vmem:[%s3015_s9 + $0x290] sm:$0xf]  ;;  %408 = vst [vmem:[%s3020_s17 + $0x9c] sm:$0xf] %v407_v55  ;;  %410 = vst [vmem:[%s3020_s17 + $0xa0] sm:$0xf] %v409_v56 }
  0x58   : > { %412 = vst [vmem:[%s3020_s17 + $0xa4] sm:$0xf] %v411_v57  ;;  %v413_v58 = vld [vmem:[%s3015_s9 + $0x2a0] sm:$0xf]  ;;  %v415_v59 = vld [vmem:[%s3015_s9 + $0x2b0] sm:$0xf] }
  0x59   : > { %v417_v60 = vld [vmem:[%s3015_s9 + $0x2c0] sm:$0xf]  ;;  %414 = vst [vmem:[%s3020_s17 + $0xa8] sm:$0xf] %v413_v58  ;;  %416 = vst [vmem:[%s3020_s17 + $0xac] sm:$0xf] %v415_v59 }
  0x5a   : > { %418 = vst [vmem:[%s3020_s17 + $0xb0] sm:$0xf] %v417_v60  ;;  %v419_v61 = vld [vmem:[%s3015_s9 + $0x2d0] sm:$0xf]  ;;  %v421_v62 = vld [vmem:[%s3015_s9 + $0x2e0] sm:$0xf] }
  0x5b   : > { %v423_v63 = vld [vmem:[%s3015_s9 + $0x2f0] sm:$0xf]  ;;  %420 = vst [vmem:[%s3020_s17 + $0xb4] sm:$0xf] %v419_v61  ;;  %422 = vst [vmem:[%s3020_s17 + $0xb8] sm:$0xf] %v421_v62 }
  0x5c   : > { %424 = vst [vmem:[%s3020_s17 + $0xbc] sm:$0xf] %v423_v63  ;;  %v425_v0 = vld [vmem:[%s3015_s9 + $0x300] sm:$0xf]  ;;  %v427_v1 = vld [vmem:[%s3015_s9 + $0x310] sm:$0xf] }
  0x5d   : > { %v429_v2 = vld [vmem:[%s3015_s9 + $0x320] sm:$0xf]  ;;  %426 = vst [vmem:[%s3020_s17 + $0xc0] sm:$0xf] %v425_v0  ;;  %428 = vst [vmem:[%s3020_s17 + $0xc4] sm:$0xf] %v427_v1 }
  0x5e   : > { %430 = vst [vmem:[%s3020_s17 + $0xc8] sm:$0xf] %v429_v2  ;;  %v431_v3 = vld [vmem:[%s3015_s9 + $0x330] sm:$0xf]  ;;  %v433_v4 = vld [vmem:[%s3015_s9 + $0x340] sm:$0xf] }
  0x5f   : > { %v435_v5 = vld [vmem:[%s3015_s9 + $0x350] sm:$0xf]  ;;  %432 = vst [vmem:[%s3020_s17 + $0xcc] sm:$0xf] %v431_v3  ;;  %434 = vst [vmem:[%s3020_s17 + $0xd0] sm:$0xf] %v433_v4 }
  0x60   : > { %436 = vst [vmem:[%s3020_s17 + $0xd4] sm:$0xf] %v435_v5  ;;  %v437_v6 = vld [vmem:[%s3015_s9 + $0x360] sm:$0xf]  ;;  %v439_v7 = vld [vmem:[%s3015_s9 + $0x370] sm:$0xf] }
  0x61   : > { %v441_v8 = vld [vmem:[%s3015_s9 + $0x380] sm:$0xf]  ;;  %438 = vst [vmem:[%s3020_s17 + $0xd8] sm:$0xf] %v437_v6  ;;  %440 = vst [vmem:[%s3020_s17 + $0xdc] sm:$0xf] %v439_v7 }
  0x62   : > { %442 = vst [vmem:[%s3020_s17 + $0xe0] sm:$0xf] %v441_v8  ;;  %v443_v9 = vld [vmem:[%s3015_s9 + $0x390] sm:$0xf]  ;;  %v445_v10 = vld [vmem:[%s3015_s9 + $0x3a0] sm:$0xf] }
  0x63   : > { %v447_v11 = vld [vmem:[%s3015_s9 + $0x3b0] sm:$0xf]  ;;  %444 = vst [vmem:[%s3020_s17 + $0xe4] sm:$0xf] %v443_v9  ;;  %446 = vst [vmem:[%s3020_s17 + $0xe8] sm:$0xf] %v445_v10 }
  0x64   : > { %448 = vst [vmem:[%s3020_s17 + $0xec] sm:$0xf] %v447_v11  ;;  %v449_v12 = vld [vmem:[%s3015_s9 + $0x3c0] sm:$0xf]  ;;  %v451_v13 = vld [vmem:[%s3015_s9 + $0x3d0] sm:$0xf] }
  0x65   : > { %v453_v14 = vld [vmem:[%s3015_s9 + $0x3e0] sm:$0xf]  ;;  %450 = vst [vmem:[%s3020_s17 + $0xf0] sm:$0xf] %v449_v12  ;;  %452 = vst [vmem:[%s3020_s17 + $0xf4] sm:$0xf] %v451_v13 }
  0x66   : > { %454 = vst [vmem:[%s3020_s17 + $0xf8] sm:$0xf] %v453_v14  ;;  %v455_v15 = vld [vmem:[%s3015_s9 + $0x3f0] sm:$0xf]  ;;  %v457_v16 = vld [vmem:[%s3015_s9 + $0x400] sm:$0xf] }
  0x67   : > { %v459_v17 = vld [vmem:[%s3015_s9 + $0x410] sm:$0xf]  ;;  %456 = vst [vmem:[%s3020_s17 + $0xfc] sm:$0xf] %v455_v15  ;;  %458 = vst [vmem:[%s3020_s17 + $0x100] sm:$0xf] %v457_v16 }
  0x68   : > { %460 = vst [vmem:[%s3020_s17 + $0x104] sm:$0xf] %v459_v17  ;;  %v461_v18 = vld [vmem:[%s3015_s9 + $0x420] sm:$0xf]  ;;  %v463_v19 = vld [vmem:[%s3015_s9 + $0x430] sm:$0xf] }
  0x69   : > { %v465_v20 = vld [vmem:[%s3015_s9 + $0x440] sm:$0xf]  ;;  %462 = vst [vmem:[%s3020_s17 + $0x108] sm:$0xf] %v461_v18  ;;  %464 = vst [vmem:[%s3020_s17 + $0x10c] sm:$0xf] %v463_v19 }
  0x6a   : > { %466 = vst [vmem:[%s3020_s17 + $0x110] sm:$0xf] %v465_v20  ;;  %v467_v21 = vld [vmem:[%s3015_s9 + $0x450] sm:$0xf]  ;;  %v469_v22 = vld [vmem:[%s3015_s9 + $0x460] sm:$0xf] }
  0x6b   : > { %v471_v23 = vld [vmem:[%s3015_s9 + $0x470] sm:$0xf]  ;;  %468 = vst [vmem:[%s3020_s17 + $0x114] sm:$0xf] %v467_v21  ;;  %470 = vst [vmem:[%s3020_s17 + $0x118] sm:$0xf] %v469_v22 }
  0x6c   : > { %472 = vst [vmem:[%s3020_s17 + $0x11c] sm:$0xf] %v471_v23  ;;  %v473_v24 = vld [vmem:[%s3015_s9 + $0x480] sm:$0xf]  ;;  %v475_v25 = vld [vmem:[%s3015_s9 + $0x490] sm:$0xf] }
  0x6d   : > { %v477_v26 = vld [vmem:[%s3015_s9 + $0x4a0] sm:$0xf]  ;;  %474 = vst [vmem:[%s3020_s17 + $0x120] sm:$0xf] %v473_v24  ;;  %476 = vst [vmem:[%s3020_s17 + $0x124] sm:$0xf] %v475_v25 }
  0x6e   : > { %478 = vst [vmem:[%s3020_s17 + $0x128] sm:$0xf] %v477_v26  ;;  %v479_v27 = vld [vmem:[%s3015_s9 + $0x4b0] sm:$0xf]  ;;  %v481_v28 = vld [vmem:[%s3015_s9 + $0x4c0] sm:$0xf] }
  0x6f   : > { %v483_v29 = vld [vmem:[%s3015_s9 + $0x4d0] sm:$0xf]  ;;  %480 = vst [vmem:[%s3020_s17 + $0x12c] sm:$0xf] %v479_v27  ;;  %482 = vst [vmem:[%s3020_s17 + $0x130] sm:$0xf] %v481_v28 }
  0x70   : > { %484 = vst [vmem:[%s3020_s17 + $0x134] sm:$0xf] %v483_v29  ;;  %v485_v30 = vld [vmem:[%s3015_s9 + $0x4e0] sm:$0xf]  ;;  %v487_v31 = vld [vmem:[%s3015_s9 + $0x4f0] sm:$0xf] }
  0x71   : > { %v489_v32 = vld [vmem:[%s3015_s9 + $0x500] sm:$0xf]  ;;  %486 = vst [vmem:[%s3020_s17 + $0x138] sm:$0xf] %v485_v30  ;;  %488 = vst [vmem:[%s3020_s17 + $0x13c] sm:$0xf] %v487_v31 }
  0x72   : > { %490 = vst [vmem:[%s3020_s17 + $0x140] sm:$0xf] %v489_v32  ;;  %v491_v33 = vld [vmem:[%s3015_s9 + $0x510] sm:$0xf]  ;;  %v493_v34 = vld [vmem:[%s3015_s9 + $0x520] sm:$0xf] }
  0x73   : > { %v495_v35 = vld [vmem:[%s3015_s9 + $0x530] sm:$0xf]  ;;  %492 = vst [vmem:[%s3020_s17 + $0x144] sm:$0xf] %v491_v33  ;;  %494 = vst [vmem:[%s3020_s17 + $0x148] sm:$0xf] %v493_v34 }
  0x74   : > { %496 = vst [vmem:[%s3020_s17 + $0x14c] sm:$0xf] %v495_v35  ;;  %v497_v36 = vld [vmem:[%s3015_s9 + $0x540] sm:$0xf]  ;;  %v499_v37 = vld [vmem:[%s3015_s9 + $0x550] sm:$0xf] }
  0x75   : > { %v501_v38 = vld [vmem:[%s3015_s9 + $0x560] sm:$0xf]  ;;  %498 = vst [vmem:[%s3020_s17 + $0x150] sm:$0xf] %v497_v36  ;;  %500 = vst [vmem:[%s3020_s17 + $0x154] sm:$0xf] %v499_v37 }
  0x76   : > { %502 = vst [vmem:[%s3020_s17 + $0x158] sm:$0xf] %v501_v38  ;;  %v503_v39 = vld [vmem:[%s3015_s9 + $0x570] sm:$0xf]  ;;  %v505_v40 = vld [vmem:[%s3015_s9 + $0x580] sm:$0xf] }
  0x77   : > { %v507_v41 = vld [vmem:[%s3015_s9 + $0x590] sm:$0xf]  ;;  %504 = vst [vmem:[%s3020_s17 + $0x15c] sm:$0xf] %v503_v39  ;;  %506 = vst [vmem:[%s3020_s17 + $0x160] sm:$0xf] %v505_v40 }
  0x78   : > { %508 = vst [vmem:[%s3020_s17 + $0x164] sm:$0xf] %v507_v41  ;;  %v509_v42 = vld [vmem:[%s3015_s9 + $0x5a0] sm:$0xf]  ;;  %v511_v43 = vld [vmem:[%s3015_s9 + $0x5b0] sm:$0xf] }
  0x79   : > { %v513_v44 = vld [vmem:[%s3015_s9 + $0x5c0] sm:$0xf]  ;;  %510 = vst [vmem:[%s3020_s17 + $0x168] sm:$0xf] %v509_v42  ;;  %512 = vst [vmem:[%s3020_s17 + $0x16c] sm:$0xf] %v511_v43 }
  0x7a   : > { %514 = vst [vmem:[%s3020_s17 + $0x170] sm:$0xf] %v513_v44  ;;  %v515_v45 = vld [vmem:[%s3015_s9 + $0x5d0] sm:$0xf]  ;;  %v517_v46 = vld [vmem:[%s3015_s9 + $0x5e0] sm:$0xf] }
  0x7b   : > { %v519_v47 = vld [vmem:[%s3015_s9 + $0x5f0] sm:$0xf]  ;;  %516 = vst [vmem:[%s3020_s17 + $0x174] sm:$0xf] %v515_v45  ;;  %518 = vst [vmem:[%s3020_s17 + $0x178] sm:$0xf] %v517_v46 }
  0x7c   : > { %520 = vst [vmem:[%s3020_s17 + $0x17c] sm:$0xf] %v519_v47  ;;  %v521_v48 = vld [vmem:[%s3015_s9 + $0x600] sm:$0xf]  ;;  %v523_v49 = vld [vmem:[%s3015_s9 + $0x610] sm:$0xf] }
  0x7d   : > { %v525_v50 = vld [vmem:[%s3015_s9 + $0x620] sm:$0xf]  ;;  %522 = vst [vmem:[%s3020_s17 + $0x180] sm:$0xf] %v521_v48  ;;  %524 = vst [vmem:[%s3020_s17 + $0x184] sm:$0xf] %v523_v49 }
  0x7e   : > { %526 = vst [vmem:[%s3020_s17 + $0x188] sm:$0xf] %v525_v50  ;;  %v527_v51 = vld [vmem:[%s3015_s9 + $0x630] sm:$0xf]  ;;  %v529_v52 = vld [vmem:[%s3015_s9 + $0x640] sm:$0xf] }
  0x7f   : > { %v531_v53 = vld [vmem:[%s3015_s9 + $0x650] sm:$0xf]  ;;  %528 = vst [vmem:[%s3020_s17 + $0x18c] sm:$0xf] %v527_v51  ;;  %530 = vst [vmem:[%s3020_s17 + $0x190] sm:$0xf] %v529_v52 }
  0x80   : > { %532 = vst [vmem:[%s3020_s17 + $0x194] sm:$0xf] %v531_v53  ;;  %v533_v54 = vld [vmem:[%s3015_s9 + $0x660] sm:$0xf]  ;;  %v535_v55 = vld [vmem:[%s3015_s9 + $0x670] sm:$0xf] }
  0x81   : > { %v537_v56 = vld [vmem:[%s3015_s9 + $0x680] sm:$0xf]  ;;  %534 = vst [vmem:[%s3020_s17 + $0x198] sm:$0xf] %v533_v54  ;;  %536 = vst [vmem:[%s3020_s17 + $0x19c] sm:$0xf] %v535_v55 }
  0x82   : > { %538 = vst [vmem:[%s3020_s17 + $0x1a0] sm:$0xf] %v537_v56  ;;  %v539_v57 = vld [vmem:[%s3015_s9 + $0x690] sm:$0xf]  ;;  %v541_v58 = vld [vmem:[%s3015_s9 + $0x6a0] sm:$0xf] }
  0x83   : > { %v543_v59 = vld [vmem:[%s3015_s9 + $0x6b0] sm:$0xf]  ;;  %540 = vst [vmem:[%s3020_s17 + $0x1a4] sm:$0xf] %v539_v57  ;;  %542 = vst [vmem:[%s3020_s17 + $0x1a8] sm:$0xf] %v541_v58 }
  0x84   : > { %544 = vst [vmem:[%s3020_s17 + $0x1ac] sm:$0xf] %v543_v59  ;;  %v545_v60 = vld [vmem:[%s3015_s9 + $0x6c0] sm:$0xf]  ;;  %v547_v61 = vld [vmem:[%s3015_s9 + $0x6d0] sm:$0xf] }
  0x85   : > { %v549_v62 = vld [vmem:[%s3015_s9 + $0x6e0] sm:$0xf]  ;;  %546 = vst [vmem:[%s3020_s17 + $0x1b0] sm:$0xf] %v545_v60  ;;  %548 = vst [vmem:[%s3020_s17 + $0x1b4] sm:$0xf] %v547_v61 }
  0x86   : > { %550 = vst [vmem:[%s3020_s17 + $0x1b8] sm:$0xf] %v549_v62  ;;  %v551_v63 = vld [vmem:[%s3015_s9 + $0x6f0] sm:$0xf]  ;;  %v553_v0 = vld [vmem:[%s3015_s9 + $0x700] sm:$0xf] }
  0x87   : > { %v555_v1 = vld [vmem:[%s3015_s9 + $0x710] sm:$0xf]  ;;  %552 = vst [vmem:[%s3020_s17 + $0x1bc] sm:$0xf] %v551_v63  ;;  %554 = vst [vmem:[%s3020_s17 + $0x1c0] sm:$0xf] %v553_v0 }
  0x88   : > { %556 = vst [vmem:[%s3020_s17 + $0x1c4] sm:$0xf] %v555_v1  ;;  %v557_v2 = vld [vmem:[%s3015_s9 + $0x720] sm:$0xf]  ;;  %v559_v3 = vld [vmem:[%s3015_s9 + $0x730] sm:$0xf] }
  0x89   : > { %v561_v4 = vld [vmem:[%s3015_s9 + $0x740] sm:$0xf]  ;;  %558 = vst [vmem:[%s3020_s17 + $0x1c8] sm:$0xf] %v557_v2  ;;  %560 = vst [vmem:[%s3020_s17 + $0x1cc] sm:$0xf] %v559_v3 }
  0x8a   : > { %562 = vst [vmem:[%s3020_s17 + $0x1d0] sm:$0xf] %v561_v4  ;;  %v563_v5 = vld [vmem:[%s3015_s9 + $0x750] sm:$0xf]  ;;  %v565_v6 = vld [vmem:[%s3015_s9 + $0x760] sm:$0xf] }
  0x8b   : > { %v567_v7 = vld [vmem:[%s3015_s9 + $0x770] sm:$0xf]  ;;  %564 = vst [vmem:[%s3020_s17 + $0x1d4] sm:$0xf] %v563_v5  ;;  %566 = vst [vmem:[%s3020_s17 + $0x1d8] sm:$0xf] %v565_v6 }
  0x8c   : > { %568 = vst [vmem:[%s3020_s17 + $0x1dc] sm:$0xf] %v567_v7  ;;  %v569_v8 = vld [vmem:[%s3015_s9 + $0x780] sm:$0xf]  ;;  %v571_v9 = vld [vmem:[%s3015_s9 + $0x790] sm:$0xf] }
  0x8d   : > { %v573_v10 = vld [vmem:[%s3015_s9 + $0x7a0] sm:$0xf]  ;;  %570 = vst [vmem:[%s3020_s17 + $0x1e0] sm:$0xf] %v569_v8  ;;  %572 = vst [vmem:[%s3020_s17 + $0x1e4] sm:$0xf] %v571_v9 }
  0x8e   : > { %574 = vst [vmem:[%s3020_s17 + $0x1e8] sm:$0xf] %v573_v10  ;;  %v575_v11 = vld [vmem:[%s3015_s9 + $0x7b0] sm:$0xf]  ;;  %v577_v12 = vld [vmem:[%s3015_s9 + $0x7c0] sm:$0xf] }
  0x8f   : > { %v579_v13 = vld [vmem:[%s3015_s9 + $0x7d0] sm:$0xf]  ;;  %576 = vst [vmem:[%s3020_s17 + $0x1ec] sm:$0xf] %v575_v11  ;;  %578 = vst [vmem:[%s3020_s17 + $0x1f0] sm:$0xf] %v577_v12 }
  0x90   : > { %580 = vst [vmem:[%s3020_s17 + $0x1f4] sm:$0xf] %v579_v13  ;;  %v581_v14 = vld [vmem:[%s3015_s9 + $0x7e0] sm:$0xf]  ;;  %v583_v15 = vld [vmem:[%s3015_s9 + $0x7f0] sm:$0xf] }
  0x91   : > { %582 = vst [vmem:[%s3020_s17 + $0x1f8] sm:$0xf] %v581_v14  ;;  %584 = vst [vmem:[%s3020_s17 + $0x1fc] sm:$0xf] %v583_v15 }
  0x92 PF: > { %p2368_p0 = scmp.ge.s32.totalorder %s2843_s30, 1  ;;  %p885_p1 = scmp.lt.s32.totalorder %s2843_s30, 17 }
  0x94   : > { %p886_p2 = pnand %p2368_p0, %p885_p1 }
  0x95   : > { %s892_s0 = sand.u32 (!%p886_p2), 1, %s2819_s25   ;;  %s899_s18 = sand.u32 (!%p886_p2), 1, %s2811_s23  }
  0x96   : > { %889 = sbr.rel (%p886_p2) target bundleno = 481 (0x1e1), region = 96  ;;  %s2369_s7 = sshll.u32 (!%p886_p2), %s892_s0, 7 }
  0x97   : > { %s2370_s9 = sshll.u32 (!%p886_p2), %s899_s18, 9  ;;  %s937_s12 = sand.u32 (!%p886_p2), 1, %s2803_s21  }
  0x98   : > { %s2372_s10 = sshll.u32 (!%p886_p2), %s2827_s27, 3  ;;  %s2371_s11 = sshll.u32 (!%p886_p2), %s937_s12, 4 }
  0x99   : > { %p954_p3 = scmp.lt.s32.totalorder (!%p886_p2), %s2372_s10, 31  ;;  %p969_p4 = scmp.lt.s32.totalorder (!%p886_p2), %s2831_s4, 3 }
  0x9a   : > { %s3298_s12 = scalar_lea.vmem (!%p886_p2), [#allocation3], %s2369_s7  ;;  %s3300_s28 = scalar_lea.vmem (!%p886_p2), [#allocation4], %s2370_s9 }
  0x9b   : > { %s3624_s10 = smov (!%p954_p3, %s2372_s10), 31  ;;  %s3302_s14 = scalar_lea.vmem [#allocation5], %s2371_s11 }
  0x9c   : > { %s970_s15 = scalar_select %p969_p4, %s2831_s4, 3 }
  0x9d   : > { %s956_s17 = scalar_lea.vmem %s3582_s2, %s3624_s10  ;;  %s961_s23 = scalar_lea.vmem %s3583_s3, %s3624_s10 }
  0x9e   : > { %s2374_s25 = sshll.u32 %s970_s15, 3  ;;  %p2375_p5 = scmp.ne.s32.totalorder %s2827_s27, 0 }
  0x9f   : > { %s3296_s18 = scalar_lea.vmem %s3586_s6, %s2374_s25 }
  0xa0   : > { %979 = sbr.rel (%p2375_p5) target bundleno = 168 (0xa8), region = 108 }
  0xa5   : > { %v2845_v16 = vmov 0.0  }
  0xa6   : > { %980 = vst [vmem:[#allocation2 + $0x10] sm:$0xff] %v2845_v16  ;;  %981 = vst [vmem:[#allocation2] sm:$0xff] %v2845_v16 }
  0xa7   : > { %982 = vst [vmem:[#allocation2 + $0x18] sm:$0xff] %v2845_v16  ;;  %983 = vst [vmem:[#allocation2 + $0x8] sm:$0xff] %v2845_v16 }
  0xa8 PF: > { %v2693_v17 = vld [vmem:[%s3300_s28 + $0x78] sm:$0xff]   ;;  %v2697_v21 = vld [vmem:[%s3300_s28 + $0x70] sm:$0xff]   ;;  %v2701_v25 = vld [vmem:[%s3300_s28 + $0x68] sm:$0xff]   ;;  %v1034_v40 = vlaneseq  ;;  %vm2846_vm11 = vmmov 1   ;;  %p2464_p6 = scmp.ne.s32.totalorder %s2827_s27, 3 }
  0xa9   : > { %v2694_v18 = vld [vmem:[%s3300_s28 + $0xf8] sm:$0xff]   ;;  %2490 = vmatprep.subr.bf16.mxu0 %v2693_v17  ;;  %v2698_v22 = vld [vmem:[%s3300_s28 + $0xf0] sm:$0xff]   ;;  %v2702_v26 = vld [vmem:[%s3300_s28 + $0xe8] sm:$0xff]  }
  0xaa   : > { %v2695_v19 = vld [vmem:[%s3300_s28 + $0x38] sm:$0xff]   ;;  %2518 = vmatprep.subr.bf16.mxu1 %v2694_v18  ;;  %v2699_v23 = vld [vmem:[%s3300_s28 + $0x30] sm:$0xff]   ;;  %v2703_v27 = vld [vmem:[%s3300_s28 + $0x28] sm:$0xff]   ;;  %v3332_v45 = vshrl.u32 %v1034_v40, 7 }
  0xab   : > { %v2696_v20 = vld [vmem:[%s3300_s28 + $0xb8] sm:$0xff]   ;;  %2491 = vmatpush3.bf16.msra.mxu0 %v2695_v19  ;;  %v2700_v24 = vld [vmem:[%s3300_s28 + $0xb0] sm:$0xff]   ;;  %v2704_v28 = vld [vmem:[%s3300_s28 + $0xa8] sm:$0xff]  }
  0xac   : > { %2519 = vmatpush3.bf16.msra.mxu1 %v2696_v20  ;;  %2492 = vmatprep.subr.bf16.mxu0 %v2697_v21  ;;  %v2705_v29 = vld [vmem:[%s3300_s28 + $0x60] sm:$0xff]   ;;  %v2709_v33 = vld [vmem:[%s3300_s28 + $0x58] sm:$0xff]   ;;  %v2713_v37 = vld [vmem:[%s3300_s28 + $0x50] sm:$0xff]   ;;  %v1040_v50 = vsub.s32 1, %v3332_v45  ;;  %v1048_v52 = vsub.s32 3, %v3332_v45  ;;  %v1036_v56 = vsub.s32 0, %v3332_v45 }
  0xad   : > { %2520 = vmatprep.subr.bf16.mxu1 %v2698_v22  ;;  %v2706_v30 = vld [vmem:[%s3300_s28 + $0xe0] sm:$0xff]   ;;  %v2710_v34 = vld [vmem:[%s3300_s28 + $0xd8] sm:$0xff]   ;;  %v2714_v38 = vld [vmem:[%s3300_s28 + $0xd0] sm:$0xff]   ;;  %v1044_v57 = vsub.s32 2, %v3332_v45 }
  0xae   : > { %v2707_v31 = vld [vmem:[%s3300_s28 + $0x20] sm:$0xff]   ;;  %v2711_v35 = vld [vmem:[%s3300_s28 + $0x18] sm:$0xff]   ;;  %v2715_v39 = vld [vmem:[%s3300_s28 + $0x10] sm:$0xff]  }
  0xaf   : > { %2493 = vmatpush3.bf16.msra.mxu0 %v2699_v23  ;;  %v2708_v32 = vld [vmem:[%s3300_s28 + $0xa0] sm:$0xff]   ;;  %v2712_v36 = vld [vmem:[%s3300_s28 + $0x98] sm:$0xff]   ;;  %v2716_v41 = vld [vmem:[%s3300_s28 + $0x90] sm:$0xff]  }
  0xb0   : > { %2521 = vmatpush3.bf16.msra.mxu1 %v2700_v24  ;;  %2494 = vmatprep.subr.bf16.mxu0 %v2701_v25  ;;  %v2717_v42 = vld [vmem:[%s3300_s28 + $0x48] sm:$0xff]   ;;  %v2721_v47 = vld [vmem:[%s3300_s28 + $0x40] sm:$0xff]   ;;  %v2725_v5 = vld [vmem:[%s3300_s28 + $0x178] sm:$0xff]  }
  0xb1   : > { %2522 = vmatprep.subr.bf16.mxu1 %v2702_v26  ;;  %v2718_v43 = vld [vmem:[%s3300_s28 + $0xc8] sm:$0xff]   ;;  %v2722_v48 = vld [vmem:[%s3300_s28 + $0xc0] sm:$0xff]   ;;  %v2726_v10 = vld [vmem:[%s3300_s28 + $0x1f8] sm:$0xff]  }
  0xb2   : > { %v2719_v44 = vld [vmem:[%s3300_s28 + $0x8] sm:$0xff]   ;;  %v2723_v49 = vld [vmem:[%s3300_s28] sm:$0xff]  }
  0xb3   : > { %2495 = vmatpush3.bf16.msra.mxu0 %v2703_v27  ;;  %v2720_v46 = vld [vmem:[%s3300_s28 + $0x88] sm:$0xff]   ;;  %v2724_v51 = vld [vmem:[%s3300_s28 + $0x80] sm:$0xff]  }
  0xb4   : > { %2523 = vmatpush3.bf16.msra.mxu1 %v2704_v28  ;;  %2496 = vmatprep.subr.bf16.mxu0 %v2705_v29  ;;  %v984_v53 = vld [vmem:[%s3298_s12] sm:$0xff]  ;;  %v985_v63 = vld [vmem:[%s3298_s12 + $0x8] sm:$0xff] }
  0xb5   : > { %2524 = vmatprep.subr.bf16.mxu1 %v2706_v30  ;;  %v988_v54 = vld [vmem:[%s3298_s12 + $0x20] sm:$0xff]  ;;  %v1000_v58 = vunpack.c.l.bf16 %v984_v53  ;;  %v1001_v59 = vunpack.c.h.bf16 %v984_v53  ;;  %v989_v0 = vld [vmem:[%s3298_s12 + $0x28] sm:$0xff]  ;;  %v1002_v3 = vunpack.c.l.bf16 %v985_v63  ;;  %v1003_v4 = vunpack.c.h.bf16 %v985_v63 }
  0xb6   : > { %v3348_v55 = vld [vmem:[%s956_s17] sm:$0xff]  ;;  %v1008_v60 = vunpack.c.l.bf16 %v988_v54  ;;  %v1009_v61 = vunpack.c.h.bf16 %v988_v54  ;;  %v1010_v6 = vunpack.c.l.bf16 %v989_v0  ;;  %v1011_v7 = vunpack.c.h.bf16 %v989_v0  ;;  %v2730_v54 = vld [vmem:[%s3300_s28 + $0x1f0] sm:$0xff]   ;;  %v2736_v63 = vld [vmem:[%s3300_s28 + $0x1a8] sm:$0xff]  }
  0xb7   : > { %2497 = vmatpush3.bf16.msra.mxu0 %v2707_v31  ;;  %v3357_v62 = vld [vmem:[%s961_s23] sm:$0xff]  ;;  %v3362_v1 = vrot.slane %v3348_v55, %v1040_v50  ;;  %v3369_v8 = vrot.slane %v3348_v55, %v1048_v52  ;;  %v3378_v13 = vrot.slane %v3348_v55, %v1036_v56  ;;  %v3386_v17 = vrot.slane %v3348_v55, %v1044_v57 }
  0xb8   : > { %2525 = vmatpush3.bf16.msra.mxu1 %v2708_v32  ;;  %2498 = vmatprep.subr.bf16.mxu0 %v2709_v33  ;;  %v3365_v2 = vrot.slane %v3357_v62, %v1040_v50  ;;  %v3372_v9 = vrot.slane %v3357_v62, %v1048_v52  ;;  %v3381_v14 = vrot.slane %v3357_v62, %v1036_v56  ;;  %v2728_v50 = vld [vmem:[%s3300_s28 + $0x1b8] sm:$0xff]   ;;  %v2729_v52 = vld [vmem:[%s3300_s28 + $0x170] sm:$0xff]   ;;  %v2737_v0 = vld [vmem:[%s3300_s28 + $0x160] sm:$0xff]  }
  0xb9   : > { %2526 = vmatprep.subr.bf16.mxu1 %v2710_v34  ;;  %v1075_v11 = vmul.f32 %v3362_v1, %v1001_v59  ;;  %v1083_v12 = vmul.f32 %v3362_v1, %v1009_v61  ;;  %v1077_v15 = vmul.f32 %v3369_v8, %v1003_v4  ;;  %v1085_v16 = vmul.f32 %v3369_v8, %v1011_v7  ;;  %v2733_v59 = vld [vmem:[%s3300_s28 + $0x168] sm:$0xff]  }
  0xba   : > { %v3389_v18 = vrot.slane %v3357_v62, %v1044_v57  ;;  %v1074_v21 = vmul.f32 %v3378_v13, %v1000_v58  ;;  %v1082_v22 = vmul.f32 %v3378_v13, %v1008_v60  ;;  %v1076_v25 = vmul.f32 %v3386_v17, %v1002_v3  ;;  %v2731_v57 = vld [vmem:[%s3300_s28 + $0x130] sm:$0xff]   ;;  %v2734_v60 = vld [vmem:[%s3300_s28 + $0x1e8] sm:$0xff]   ;;  %v992_v3 = vld [vmem:[%s3298_s12 + $0x40] sm:$0xff] }
  0xbb   : > { %2499 = vmatpush3.bf16.msra.mxu0 %v2711_v35  ;;  %v1149_v19 = vadd.f32 %v3365_v2, %v1075_v11  ;;  %v1157_v20 = vadd.f32 %v3365_v2, %v1083_v12  ;;  %v1151_v23 = vadd.f32 %v3372_v9, %v1077_v15  ;;  %v1159_v24 = vadd.f32 %v3372_v9, %v1085_v16  ;;  %v2732_v58 = vld [vmem:[%s3300_s28 + $0x1b0] sm:$0xff]   ;;  %v2735_v61 = vld [vmem:[%s3300_s28 + $0x128] sm:$0xff]   ;;  %v2739_v15 = vld [vmem:[%s3300_s28 + $0x120] sm:$0xff]  }
  0xbc   : > { %2527 = vmatpush3.bf16.msra.mxu1 %v2712_v36  ;;  %2500 = vmatprep.subr.bf16.mxu0 %v2713_v37  ;;  %v1084_v26 = vmul.f32 %v3386_v17, %v1010_v6  ;;  %v1148_v33 = vadd.f32 %v3381_v14, %v1074_v21  ;;  %v1156_v34 = vadd.f32 %v3381_v14, %v1082_v22  ;;  %v1017_v4 = vunpack.c.h.bf16 %v992_v3  ;;  %v993_v6 = vld [vmem:[%s3298_s12 + $0x48] sm:$0xff]  ;;  %v2741_v21 = vld [vmem:[%s3300_s28 + $0x158] sm:$0xff]  }
  0xbd   : > { %2528 = vmatprep.subr.bf16.mxu1 %v2714_v38  ;;  %vm1181_vm0 = vcmp.gt.f32.partialorder %v1149_v19, 0.0  ;;  %vm1189_vm1 = vcmp.gt.f32.partialorder %v1157_v20, 0.0  ;;  %v1213_v27 = vmul.f32 0.2, %v1149_v19  ;;  %v1221_v28 = vmul.f32 0.2, %v1157_v20 }
  0xbe   : > { %vm1183_vm2 = vcmp.gt.f32.partialorder %v1151_v23, 0.0  ;;  %vm1191_vm3 = vcmp.gt.f32.partialorder %v1159_v24, 0.0  ;;  %v1215_v29 = vmul.f32 0.2, %v1151_v23  ;;  %v1223_v30 = vmul.f32 0.2, %v1159_v24 }
  0xbf   : > { %2501 = vmatpush3.bf16.msra.mxu0 %v2715_v39  ;;  %v1245_v31 = vsel %vm1181_vm0, %v1149_v19, %v1213_v27  ;;  %v1253_v32 = vsel %vm1189_vm1, %v1157_v20, %v1221_v28  ;;  %v1150_v38 = vadd.f32 %v3389_v18, %v1076_v25  ;;  %vm1180_vm4 = vcmp.gt.f32.partialorder %v1148_v33, 0.0  ;;  %v2740_v20 = vld [vmem:[%s3300_s28 + $0x1a0] sm:$0xff]  }
  0xc0   : > { %2529 = vmatpush3.bf16.msra.mxu1 %v2716_v41  ;;  %2502 = vmatprep.subr.bf16.mxu0 %v2717_v42  ;;  %v1332_v35 = vpack.c.bf16 %v1253_v32, %v1245_v31  ;;  %v1247_v36 = vsel %vm1183_vm2, %v1151_v23, %v1215_v29  ;;  %v1255_v37 = vsel %vm1191_vm3, %v1159_v24, %v1223_v30  ;;  %vm1188_vm5 = vcmp.gt.f32.partialorder %v1156_v34, 0.0  ;;  %v2742_v24 = vld [vmem:[%s3300_s28 + $0x1d8] sm:$0xff]  }
  0xc1   : > { %2530 = vmatprep.subr.bf16.mxu1 %v2718_v43  ;;  %v1334_v39 = vpack.c.bf16 %v1255_v37, %v1247_v36  ;;  %v1212_v40 = vmul.f32 0.2, %v1148_v33  ;;  %v1220_v41 = vmul.f32 0.2, %v1156_v34  ;;  %v1158_v42 = vadd.f32 %v3389_v18, %v1084_v26  ;;  %v2745_v36 = vld [vmem:[%s3300_s28 + $0x150] sm:$0xff]  }
  0xc2   : > { %1895 = vmatprep.mubr.bf16.mxu0 %v1332_v35  ;;  %vm1182_vm6 = vcmp.gt.f32.partialorder %v1150_v38, 0.0  ;;  %v1214_v43 = vmul.f32 0.2, %v1150_v38  ;;  %v1016_v7 = vunpack.c.l.bf16 %v992_v3  ;;  %v1019_v11 = vunpack.c.h.bf16 %v993_v6 }
  0xc3   : > { %2503 = vmatpush3.bf16.msra.mxu0 %v2719_v44  ;;  %v2727_v44 = vld [vmem:[%s3300_s28 + $0x138] sm:$0xff]   ;;  %1944 = vmatprep.mubr.bf16.mxu1 %v1334_v39  ;;  %vm1190_vm7 = vcmp.gt.f32.partialorder %v1158_v42, 0.0  ;;  %v1018_v12 = vunpack.c.l.bf16 %v993_v6  ;;  %v1091_v16 = vmul.f32 %v3362_v1, %v1017_v4  ;;  %v1052_v30 = vsub.s32 4, %v3332_v45  ;;  %v2746_v39 = vld [vmem:[%s3300_s28 + $0x1d0] sm:$0xff]  }
  0xc4   : > { %2531 = vmatpush3.bf16.msra.mxu1 %v2720_v46  ;;  %2504 = vmatprep.subr.bf16.mxu0 %v2721_v47  ;;  %v1244_v46 = vsel %vm1180_vm4, %v1148_v33, %v1212_v40  ;;  %v1252_v47 = vsel %vm1188_vm5, %v1156_v34, %v1220_v41  ;;  %v1090_v19 = vmul.f32 %v3378_v13, %v1016_v7  ;;  %v2743_v1 = vld [vmem:[%s3300_s28 + $0x118] sm:$0xff]   ;;  %v2847_v31 = vmov 0.0   ;;  %v2747_v41 = vld [vmem:[%s3300_s28 + $0x110] sm:$0xff]  }
  0xc5   : > { %2532 = vmatprep.subr.bf16.mxu1 %v2722_v48  ;;  %v1222_v48 = vmul.f32 0.2, %v1158_v42  ;;  %v1093_v22 = vmul.f32 %v3369_v8, %v1019_v11  ;;  %v1092_v23 = vmul.f32 %v3386_v17, %v1018_v12  ;;  %v1165_v25 = vadd.f32 %v3365_v2, %v1091_v16  ;;  %v991_v6 = vld [vmem:[%s3298_s12 + $0x38] sm:$0xff] }
  0xc6   : > { %v1164_v26 = vadd.f32 %v3381_v14, %v1090_v19  ;;  %v1056_v40 = vsub.s32 5, %v3332_v45  ;;  %v1014_v11 = vunpack.c.l.bf16 %v991_v6  ;;  %v1015_v12 = vunpack.c.h.bf16 %v991_v6 }
  0xc7   : > { %2505 = vmatpush3.bf16.msra.mxu0 %v2723_v49  ;;  %v1246_v49 = vsel %vm1182_vm6, %v1150_v38, %v1214_v43  ;;  %v1254_v53 = vsel %vm1190_vm7, %v1158_v42, %v1222_v48  ;;  %v1167_v27 = vadd.f32 %v3372_v9, %v1093_v22  ;;  %v1166_v13 = vadd.f32 %v3389_v18, %v1092_v23  ;;  %v2744_v18 = vld [vmem:[%s3300_s28 + $0x198] sm:$0xff]   ;;  %v2749_v43 = vld [vmem:[%s3300_s28 + $0x148] sm:$0xff]  }
  0xc8   : > { %2533 = vmatpush3.bf16.msra.mxu1 %v2724_v51  ;;  %2546 = vmatprep.subr.bf16.mxu0 %v2725_v5  ;;  %v1331_v51 = vpack.c.bf16 %v1252_v47, %v1244_v46  ;;  %v1333_v56 = vpack.c.bf16 %v1254_v53, %v1246_v49  ;;  %v1279_v5 = vadd.s32 16, %v3332_v45  ;;  %vm1197_vm9 = vcmp.gt.f32.partialorder %v1165_v25, 0.0  ;;  %v2748_v46 = vld [vmem:[%s3300_s28 + $0x190] sm:$0xff]   ;;  %v2750_v47 = vld [vmem:[%s3300_s28 + $0x1c8] sm:$0xff]   ;;  %v2753_v53 = vld [vmem:[%s3300_s28 + $0x140] sm:$0xff]  }
  0xc9   : > { %2574 = vmatprep.subr.bf16.mxu1 %v2726_v10  ;;  %v2738_v10 = vld [vmem:[%s3300_s28 + $0x1e0] sm:$0xff]   ;;  %v1229_v28 = vmul.f32 0.2, %v1165_v25  ;;  %vm1196_vm10 = vcmp.gt.f32.partialorder %v1164_v26, 0.0  ;;  %v1228_v8 = vmul.f32 0.2, %v1164_v26  ;;  %v3460_v49 = vrot.slane %v3348_v55, %v1052_v30 }
  0xca   : > { %1896 = vmatmul.mubr.bf16.vlgmr.msra.gmra.mxu0 %v1331_v51  ;;  %vm1289_vm8 = vcmp.lt.s32.totalorder %v1279_v5, 18  ;;  %vm1199_vm13 = vcmp.gt.f32.partialorder %v1167_v27, 0.0  ;;  %v1231_v2 = vmul.f32 0.2, %v1167_v27  ;;  %vm1198_vm14 = vcmp.gt.f32.partialorder %v1166_v13, 0.0  ;;  %v2751_v48 = vld [vmem:[%s3300_s28 + $0x108] sm:$0xff]  }
  0xcb   : > { %2547 = vmatpush3.bf16.msra.mxu0 %v2727_v44  ;;  %1945 = vmatmul.mubr.bf16.vlgmr.msra.gmra.mxu1 %v1333_v56  ;;  %vm3431_vm12 = vmpackc.low %vm2846_vm11, %vm1289_vm8  ;;  %v1230_v9 = vmul.f32 0.2, %v1166_v13  ;;  %v1261_v14 = vsel %vm1197_vm9, %v1165_v25, %v1229_v28  ;;  %v1260_v29 = vsel %vm1196_vm10, %v1164_v26, %v1228_v8  ;;  %v1060_v42 = vsub.s32 6, %v3332_v45  ;;  %v990_v56 = vld [vmem:[%s3298_s12 + $0x30] sm:$0xff]  ;;  %v987_v5 = vld [vmem:[%s3298_s12 + $0x18] sm:$0xff] }
  0xcc   : > { %2548 = vmatprep.subr.bf16.mxu0 %v2729_v52  ;;  %2575 = vmatpush3.bf16.msra.mxu1 %v2728_v50  ;;  %v2441_v32 = vpack.c.bf16 %v2847_v31, %v1261_v14  ;;  %v1263_v33 = vsel %vm1199_vm13, %v1167_v27, %v1231_v2  ;;  %v2444_v34 = vpack.c.bf16 %v2847_v31, %v1260_v29  ;;  %v1064_v44 = vsub.s32 7, %v3332_v45  ;;  %v2756_v25 = vld [vmem:[%s3300_s28 + $0x180] sm:$0xff]  }
  0xcd   : > { %2576 = vmatprep.subr.bf16.mxu1 %v2730_v54  ;;  %v1262_v35 = vsel %vm1198_vm14, %v1166_v13, %v1230_v9  ;;  %v2447_v37 = vpack.c.bf16 %v2847_v31, %v1263_v33  ;;  %v3463_v50 = vrot.slane %v3348_v55, %v1056_v40  ;;  %v3466_v51 = vrot.slane %v3357_v62, %v1056_v40  ;;  %v986_v54 = vld [vmem:[%s3298_s12 + $0x10] sm:$0xff] }
  0xce   : > { %v2450_v38 = vpack.c.bf16 %v2847_v31, %v1262_v35  ;;  %2442 = vmatprep.mubr.msk.bf16.mxu0 %vm3431_vm12, %v2441_v32  ;;  %v3469_v52 = vrot.slane %v3348_v55, %v1060_v42  ;;  %v1012_v3 = vunpack.c.l.bf16 %v990_v56  ;;  %v1013_v4 = vunpack.c.h.bf16 %v990_v56 }
  0xcf   : > { %2549 = vmatpush3.bf16.msra.mxu0 %v2731_v57  ;;  %2448 = vmatprep.mubr.msk.bf16.mxu1 %vm3431_vm12, %v2447_v37  ;;  %v3475_v57 = vrot.slane %v3348_v55, %v1064_v44  ;;  %v2754_v55 = vld [vmem:[%s3300_s28 + $0x1c0] sm:$0xff]   ;;  %v1006_v7 = vunpack.c.l.bf16 %v987_v5 }
  0xd0   : > { %2550 = vmatprep.subr.bf16.mxu0 %v2733_v59  ;;  %2577 = vmatpush3.bf16.msra.mxu1 %v2732_v58  ;;  %v3478_v58 = vrot.slane %v3357_v62, %v1064_v44  ;;  %v3481_v59 = vrot.slane %v3357_v62, %v1052_v30  ;;  %v1086_v19 = vmul.f32 %v3460_v49, %v1012_v3 }
  0xd1   : > { %2578 = vmatprep.subr.bf16.mxu1 %v2734_v60  ;;  %v3484_v60 = vrot.slane %v3357_v62, %v1060_v42  ;;  %v1088_v23 = vmul.f32 %v3469_v52, %v1014_v11 }
  0xd2   : > { %2445 = vmatmul.mubr.msk.bf16.gmra.mxu0 %vm3431_vm12, %v2444_v34  ;;  %v1160_v13 = vadd.f32 %v3481_v59, %v1086_v19  ;;  %v994_v34 = vld [vmem:[%s3298_s12 + $0x50] sm:$0xff] }
  0xd3   : > { %2551 = vmatpush3.bf16.msra.mxu0 %v2735_v61  ;;  %2451 = vmatmul.mubr.msk.bf16.gmra.mxu1 %vm3431_vm12, %v2450_v38  ;;  %v2752_v61 = vld [vmem:[%s3300_s28 + $0x188] sm:$0xff]   ;;  %v1162_v9 = vadd.f32 %v3484_v60, %v1088_v23 }
  0xd4   : > { %2552 = vmatprep.subr.bf16.mxu0 %v2737_v0  ;;  %2579 = vmatpush3.bf16.msra.mxu1 %v2736_v63  ;;  %v1004_v63 = vunpack.c.l.bf16 %v986_v54  ;;  %v1005_v0 = vunpack.c.h.bf16 %v986_v54  ;;  %vm1192_vm4 = vcmp.gt.f32.partialorder %v1160_v13, 0.0 }
  0xd5   : > { %2580 = vmatprep.subr.bf16.mxu1 %v2738_v10  ;;  %v1007_v10 = vunpack.c.h.bf16 %v987_v5  ;;  %vm1194_vm6 = vcmp.gt.f32.partialorder %v1162_v9, 0.0  ;;  %v1226_v44 = vmul.f32 0.2, %v1162_v9 }
  0xd6   : > { %v1078_v62 = vmul.f32 %v3460_v49, %v1004_v63  ;;  %v1079_v16 = vmul.f32 %v3463_v50, %v1005_v0 }
  0xd7   : > { %2553 = vmatpush3.bf16.msra.mxu0 %v2739_v15  ;;  %v2755_v15 = vld [vmem:[%s3300_s28 + $0x100] sm:$0xff]   ;;  %v1081_v22 = vmul.f32 %v3475_v57, %v1007_v10  ;;  %v1258_v63 = vsel %vm1194_vm6, %v1162_v9, %v1226_v44 }
  0xd8   : > { %2554 = vmatprep.subr.bf16.mxu0 %v2741_v21  ;;  %2581 = vmatpush3.bf16.msra.mxu1 %v2740_v20  ;;  %v1087_v20 = vmul.f32 %v3463_v50, %v1013_v4  ;;  %v1080_v21 = vmul.f32 %v3469_v52, %v1006_v7  ;;  %v1153_v26 = vadd.f32 %v3466_v51, %v1079_v16 }
  0xd9   : > { %2582 = vmatprep.subr.bf16.mxu1 %v2742_v24  ;;  %v1089_v24 = vmul.f32 %v3475_v57, %v1015_v12  ;;  %v1155_v28 = vadd.f32 %v3478_v58, %v1081_v22 }
  0xda   : > { %v1161_v27 = vadd.f32 %v3466_v51, %v1087_v20  ;;  %v1154_v2 = vadd.f32 %v3484_v60, %v1080_v21  ;;  %vm1185_vm15 = vcmp.gt.f32.partialorder %v1153_v26, 0.0  ;;  %v1217_v14 = vmul.f32 0.2, %v1153_v26 }
  0xdb   : > { %2555 = vmatpush3.bf16.msra.mxu0 %v2743_v1  ;;  %v1152_v1 = vadd.f32 %v3481_v59, %v1078_v62  ;;  %v1163_v8 = vadd.f32 %v3478_v58, %v1089_v24  ;;  %vm1187_vm1 = vcmp.gt.f32.partialorder %v1155_v28, 0.0  ;;  %v1219_v29 = vmul.f32 0.2, %v1155_v28 }
  0xdc   : > { %2583 = vmatpush3.bf16.msra.mxu1 %v2744_v18  ;;  %2556 = vmatprep.subr.bf16.mxu0 %v2745_v36  ;;  %vm1193_vm0 = vcmp.gt.f32.partialorder %v1161_v27, 0.0  ;;  %v1225_v18 = vmul.f32 0.2, %v1161_v27  ;;  %v1249_v32 = vsel %vm1185_vm15, %v1153_v26, %v1217_v14  ;;  %vm1186_vm5 = vcmp.gt.f32.partialorder %v1154_v2, 0.0 }
  0xdd   : > { %2584 = vmatprep.subr.bf16.mxu1 %v2746_v39  ;;  %vm1195_vm2 = vcmp.gt.f32.partialorder %v1163_v8, 0.0  ;;  %v1227_v30 = vmul.f32 0.2, %v1163_v8  ;;  %vm1184_vm3 = vcmp.gt.f32.partialorder %v1152_v1, 0.0  ;;  %v1251_v36 = vsel %vm1187_vm1, %v1155_v28, %v1219_v29  ;;  %v995_v39 = vld [vmem:[%s3298_s12 + $0x58] sm:$0xff] }
  0xde   : > { %v1257_v33 = vsel %vm1193_vm0, %v1161_v27, %v1225_v18  ;;  %v1216_v38 = vmul.f32 0.2, %v1152_v1  ;;  %v1022_v54 = vunpack.c.l.bf16 %v995_v39 }
  0xdf   : > { %2557 = vmatpush3.bf16.msra.mxu0 %v2747_v41  ;;  %v1336_v35 = vpack.c.bf16 %v1257_v33, %v1249_v32  ;;  %v1259_v37 = vsel %vm1195_vm2, %v1163_v8, %v1227_v30  ;;  %v1224_v41 = vmul.f32 0.2, %v1160_v13 }
  0xe0   : > { %2558 = vmatprep.subr.bf16.mxu0 %v2749_v43  ;;  %2585 = vmatpush3.bf16.msra.mxu1 %v2748_v46  ;;  %v1338_v40 = vpack.c.bf16 %v1259_v37, %v1251_v36  ;;  %v1248_v42 = vsel %vm1184_vm3, %v1152_v1, %v1216_v38  ;;  %v1218_v43 = vmul.f32 0.2, %v1154_v2  ;;  %v1021_v46 = vunpack.c.h.bf16 %v994_v34 }
  0xe1   : > { %2586 = vmatprep.subr.bf16.mxu1 %v2750_v47  ;;  %1993 = vmatprep.mubr.bf16.mxu0 %v1336_v35  ;;  %v1256_v47 = vsel %vm1192_vm4, %v1160_v13, %v1224_v41  ;;  %v1096_v6 = vmul.f32 %v3469_v52, %v1022_v54 }
  0xe2   : > { %2042 = vmatprep.mubr.bf16.mxu1 %v1338_v40  ;;  %v1335_v56 = vpack.c.bf16 %v1256_v47, %v1248_v42  ;;  %v1095_v0 = vmul.f32 %v3463_v50, %v1021_v46 }
  0xe3   : > { %2559 = vmatpush3.bf16.msra.mxu0 %v2751_v48  ;;  %v1023_v48 = vunpack.c.h.bf16 %v995_v39  ;;  %v1170_v11 = vadd.f32 %v3484_v60, %v1096_v6 }
  0xe4   : > { %2560 = vmatprep.subr.bf16.mxu0 %v2753_v53  ;;  %2587 = vmatpush3.bf16.msra.mxu1 %v2752_v61  ;;  %v1020_v53 = vunpack.c.l.bf16 %v994_v34  ;;  %v1250_v61 = vsel %vm1186_vm5, %v1154_v2, %v1218_v43  ;;  %v1347_v43 = vld [vmem:[#allocation2 + $0x10] sm:$0xff] }
  0xe5   : > { %2588 = vmatprep.subr.bf16.mxu1 %v2754_v55  ;;  %v1337_v3 = vpack.c.bf16 %v1258_v63, %v1250_v61  ;;  %v1097_v4 = vmul.f32 %v3475_v57, %v1023_v48  ;;  %v1169_v55 = vadd.f32 %v3466_v51, %v1095_v0  ;;  %vm1202_vm10 = vcmp.gt.f32.partialorder %v1170_v11, 0.0 }
  0xe6   : > { %v1094_v5 = vmul.f32 %v3460_v49, %v1020_v53  ;;  %v1234_v49 = vmul.f32 0.2, %v1170_v11 }
  0xe7   : > { %2561 = vmatpush3.bf16.msra.mxu0 %v2755_v15  ;;  %v1171_v7 = vadd.f32 %v3478_v58, %v1097_v4  ;;  %vm1201_vm7 = vcmp.gt.f32.partialorder %v1169_v55, 0.0  ;;  %v1233_v12 = vmul.f32 0.2, %v1169_v55  ;;  %v1348_v4 = vld [vmem:[#allocation2] sm:$0xff] }
  0xe8   : > { %2589 = vmatpush3.bf16.msra.mxu1 %v2756_v25  ;;  %v1168_v10 = vadd.f32 %v3481_v59, %v1094_v5  ;;  %v1266_v59 = vsel %vm1202_vm10, %v1170_v11, %v1234_v49 }
  0xe9   : > { %vm1203_vm8 = vcmp.gt.f32.partialorder %v1171_v7, 0.0  ;;  %v1235_v50 = vmul.f32 0.2, %v1171_v7  ;;  %v1265_v15 = vsel %vm1201_vm7, %v1169_v55, %v1233_v12  ;;  %v2462_v60 = vpack.c.bf16 %v2847_v31, %v1266_v59 }
  0xea   : > { %1994 = vmatmul.mubr.bf16.vlgmr.msra.gmra.mxu0 %v1335_v56  ;;  %vm1200_vm9 = vcmp.gt.f32.partialorder %v1168_v10, 0.0  ;;  %v1232_v57 = vmul.f32 0.2, %v1168_v10  ;;  %v2453_v52 = vpack.c.bf16 %v2847_v31, %v1265_v15 }
  0xeb   : > { %2043 = vmatmul.mubr.bf16.vlgmr.msra.gmra.mxu1 %v1337_v3  ;;  %v1267_v62 = vsel %vm1203_vm8, %v1171_v7, %v1235_v50 }
  0xec   : > { %v1264_v51 = vsel %vm1200_vm9, %v1168_v10, %v1232_v57  ;;  %v2459_v16 = vpack.c.bf16 %v2847_v31, %v1267_v62  ;;  %2454 = vmatprep.mubr.msk.bf16.mxu0 %vm3431_vm12, %v2453_v52  ;;  %v1349_v52 = vld [vmem:[#allocation2 + $0x18] sm:$0xff] }
  0xed   : > { %v2456_v58 = vpack.c.bf16 %v2847_v31, %v1264_v51 }
  0xee   : > { %2460 = vmatprep.mubr.msk.bf16.mxu1 %vm3431_vm12, %v2459_v16 }
  0xf2   : > { %2457 = vmatmul.mubr.msk.bf16.gmra.mxu0 %vm3431_vm12, %v2456_v58 }
  0xf3   : > { %2463 = vmatmul.mubr.msk.bf16.gmra.mxu1 %vm3431_vm12, %v2462_v60 }
 0x18a   : > { %v2506_v19 = vpop.f32.mrf.mxu0 }
 0x18b   : > { %v2534_v20 = vpop.f32.mrf.mxu1 }
 0x18c   : > { %v2507_v21 = vpop.f32.mrf.mxu0 }
 0x18d   : > { %v2535_v22 = vpop.f32.mrf.mxu1  ;;  %v2508_v9 = vadd.f32 %v2507_v21, %v2506_v19  ;;  %v1350_v21 = vld [vmem:[#allocation2 + $0x8] sm:$0xff] }
 0x18e   : > { %v2509_v23 = vpop.f32.mrf.mxu0  ;;  %v2536_v14 = vadd.f32 %v2535_v22, %v2534_v20 }
 0x18f   : > { %v2537_v24 = vpop.f32.mrf.mxu1 }
 0x190   : > { %v2510_v25 = vpop.f32.mrf.mxu0  ;;  %v1947_v32 = vadd.f32 %v2536_v14, %v2508_v9 }
 0x191   : > { %v2538_v26 = vpop.f32.mrf.mxu1  ;;  %v2511_v33 = vadd.f32 %v2510_v25, %v2509_v23 }
 0x192   : > { %v2512_v27 = vpop.f32.mrf.mxu0  ;;  %v2539_v34 = vadd.f32 %v2538_v26, %v2537_v24 }
 0x193   : > { %v2540_v1 = vpop.f32.mrf.mxu1 }
 0x194   : > { %v2513_v31 = vpop.f32.mrf.mxu0  ;;  %v1950_v46 = vadd.f32 %v2539_v34, %v2511_v33 }
 0x195   : > { %v2541_v13 = vpop.f32.mrf.mxu1  ;;  %v2514_v41 = vadd.f32 %v2513_v31, %v2512_v27 }
 0x196   : > { %v2515_v28 = vpop.f32.mrf.mxu0  ;;  %v2542_v42 = vadd.f32 %v2541_v13, %v2540_v1 }
 0x197   : > { %v2543_v8 = vpop.f32.mrf.mxu1 }
 0x198   : > { %v2516_v2 = vpop.f32.mrf.mxu0  ;;  %v1955_v3 = vadd.f32 %v2542_v42, %v2514_v41 }
 0x199   : > { %v2544_v18 = vpop.f32.mrf.mxu1  ;;  %v2517_v6 = vadd.f32 %v2516_v2, %v2515_v28 }
 0x19a   : > { %v2545_v55 = vadd.f32 %v2544_v18, %v2543_v8 }
 0x19c   : > { %v1958_v51 = vadd.f32 %v2545_v55, %v2517_v6 }
 0x1aa   : > { %v2562_v17 = vpop.f32.mrf.mxu0 }
 0x1ab   : > { %v2590_v29 = vpop.f32.mrf.mxu1 }
 0x1ac   : > { %v2563_v30 = vpop.f32.mrf.mxu0 }
 0x1ad   : > { %v2564_v35 = vadd.f32 %v2563_v30, %v2562_v17  ;;  %v2591_v36 = vpop.f32.mrf.mxu1 }
 0x1ae   : > { %v2565_v37 = vpop.f32.mrf.mxu0  ;;  %v2592_v39 = vadd.f32 %v2591_v36, %v2590_v29 }
 0x1af   : > { %v1996_v38 = vadd.f32 %v2564_v35, %v1947_v32  ;;  %v2593_v40 = vpop.f32.mrf.mxu1 }
 0x1b0   : > { %v2566_v44 = vpop.f32.mrf.mxu0 }
 0x1b1   : > { %v2045_v47 = vadd.f32 %v2592_v39, %v1996_v38  ;;  %v2567_v48 = vadd.f32 %v2566_v44, %v2565_v37  ;;  %v2594_v53 = vpop.f32.mrf.mxu1 }
 0x1b2   : > { %v2568_v54 = vpop.f32.mrf.mxu0  ;;  %v2595_v63 = vadd.f32 %v2594_v53, %v2593_v40 }
 0x1b3   : > { %v2059_v56 = vadd.f32 %v2045_v47, %v1347_v43  ;;  %v1999_v61 = vadd.f32 %v2567_v48, %v1950_v46  ;;  %v2596_v0 = vpop.f32.mrf.mxu1 }
 0x1b4   : > { %v2569_v5 = vpop.f32.mrf.mxu0 }
 0x1b5   : > { %2063 = vst [vmem:[#allocation2 + $0x10] sm:$0xff] %v2059_v56  ;;  %v2048_v7 = vadd.f32 %v2595_v63, %v1999_v61  ;;  %v2570_v10 = vadd.f32 %v2569_v5, %v2568_v54  ;;  %v2597_v11 = vpop.f32.mrf.mxu1 }
 0x1b6   : > { %v2571_v12 = vpop.f32.mrf.mxu0  ;;  %v2598_v15 = vadd.f32 %v2597_v11, %v2596_v0 }
 0x1b7   : > { %v2060_v50 = vadd.f32 %v2048_v7, %v1348_v4  ;;  %v2004_v57 = vadd.f32 %v2570_v10, %v1955_v3  ;;  %v2599_v49 = vpop.f32.mrf.mxu1 }
 0x1b8   : > { %v2572_v62 = vpop.f32.mrf.mxu0 }
 0x1b9   : > { %2064 = vst [vmem:[#allocation2] sm:$0xff] %v2060_v50  ;;  %v2053_v16 = vadd.f32 %v2598_v15, %v2004_v57  ;;  %v2573_v58 = vadd.f32 %v2572_v62, %v2571_v12  ;;  %v2600_v59 = vpop.f32.mrf.mxu1 }
 0x1ba   : > { %v2601_v20 = vadd.f32 %v2600_v59, %v2599_v49 }
 0x1bb   : > { %v2061_v60 = vadd.f32 %v2053_v16, %v1349_v52  ;;  %v2007_v19 = vadd.f32 %v2573_v58, %v1958_v51 }
 0x1bd   : > { %2065 = vst [vmem:[#allocation2 + $0x18] sm:$0xff] %v2061_v60  ;;  %v2056_v22 = vadd.f32 %v2601_v20, %v2007_v19  ;;  %2070 = sbr.rel (%p2464_p6) target bundleno = 476 (0x1dc), region = 112 }
 0x1bf   : > { %v2062_v23 = vadd.f32 %v2056_v22, %v1350_v21 }
 0x1c1   : > { %2066 = vst [vmem:[#allocation2 + $0x8] sm:$0xff] %v2062_v23 }
 0x1c2   : > { %v2071_v24 = vld [vmem:[#allocation2 + $0x10] sm:$0xff]  ;;  %v2072_v25 = vld [vmem:[#allocation2] sm:$0xff]  ;;  %vm2098_vm11 = vcmp.eq.s32.totalorder %v3332_v45, 1  ;;  %vm2097_vm12 = vcmp.eq.s32.totalorder %v3332_v45, 0 }
 0x1c3   : > { %v2075_v1 = vadd.f32 %v2072_v25, %v2071_v24  ;;  %v2084_v31 = vmul.f32 %v2071_v24, %v2071_v24  ;;  %v2085_v13 = vmul.f32 %v2072_v25, %v2072_v25  ;;  %v2482_v8 = vpack.c.bf16 %v2072_v25, %v2071_v24 }
 0x1c4   : > { %v2073_v26 = vld [vmem:[#allocation2 + $0x18] sm:$0xff] }
 0x1c5   : > { %v2086_v28 = vmul.f32 %v2073_v26, %v2073_v26  ;;  %v2076_v9 = vadd.f32 %v2075_v1, %v2073_v26  ;;  %v2088_v18 = vadd.f32 %v2085_v13, %v2084_v31  ;;  %2483 = vst [vmem:[%s3302_s14] sm:$0xff] %v2482_v8  }
 0x1c7   : > { %v2089_v29 = vadd.f32 %v2088_v18, %v2086_v28 }
 0x1c8   : > { %v2074_v27 = vld [vmem:[#allocation2 + $0x8] sm:$0xff] }
 0x1c9   : > { %v2487_v2 = vpack.c.bf16 %v2074_v27, %v2073_v26  ;;  %v2087_v14 = vmul.f32 %v2074_v27, %v2074_v27  ;;  %v2077_v17 = vadd.f32 %v2076_v9, %v2074_v27 }
 0x1cb   : > { %2489 = vst [vmem:[%s3302_s14 + $0x8] sm:$0xff] %v2487_v2   ;;  %v2078_v30 = vrot.slane %v2077_v17, 4  ;;  %v2090_v32 = vadd.f32 %v2089_v29, %v2087_v14 }
 0x1cd   : > { %v2079_v33 = vadd.f32 %v2078_v30, %v2077_v17  ;;  %v2091_v34 = vrot.slane %v2090_v32, 4 }
 0x1cf   : > { %v2080_v35 = vrot.slane %v2079_v33, 2  ;;  %v2092_v36 = vadd.f32 %v2091_v34, %v2090_v32 }
 0x1d1   : > { %v2081_v37 = vadd.f32 %v2080_v35, %v2079_v33  ;;  %v2093_v38 = vrot.slane %v2092_v36, 2 }
 0x1d3   : > { %v2082_v39 = vrot.slane %v2081_v37, 1  ;;  %v2094_v40 = vadd.f32 %v2093_v38, %v2092_v36 }
 0x1d5   : > { %v2095_v41 = vrot.slane %v2094_v40, 1  ;;  %v2083_v42 = vadd.f32 %v2082_v39, %v2081_v37 }
 0x1d7   : > { %v2096_v43 = vadd.f32 %v2095_v41, %v2094_v40 }
 0x1d9   : > { %v2099_v44 = vsel %vm2098_vm11, %v2096_v43, 0.0 }
 0x1da   : > { %v2100_v46 = vsel %vm2097_vm12, %v2083_v42, %v2099_v44 }
 0x1db   : > { %2101 = vst [vmem:[%s3296_s18] sm:$0xff] %v2100_v46 }
 0x1dc PF: > { %2136 = sbr.rel (!%p2977_p12) target bundleno = 481 (0x1e1), region = 116  ;;  %s2470_s27 = sshll.u32 (%p2977_p12), %s2831_s4, 2  ;;  %v2158_v47 = vld [vmem:[%s3302_s14] sm:$0xf] (%p2977_p12)  ;;  %v2160_v48 = vld [vmem:[%s3302_s14 + $0x4] sm:$0xf] (%p2977_p12) }
 0x1dd   : > { %s2141_s11 = scalar_lea.vmem (%p2977_p12), %s3585_s5, %s2470_s27  ;;  %v2162_v45 = vld [vmem:[%s3302_s14 + $0x8] sm:$0xf] (%p2977_p12)  ;;  %v2164_v53 = vld [vmem:[%s3302_s14 + $0xc] sm:$0xf] (%p2977_p12) }
 0x1de   : > { %2159 = vst [vmem:[%s2141_s11] sm:$0xf] (%p2977_p12), %v2158_v47  ;;  %2161 = vst [vmem:[%s2141_s11 + $0x10] sm:$0xf] (%p2977_p12), %v2160_v48 }
 0x1df   : > { %2163 = vst [vmem:[%s2141_s11 + $0x20] sm:$0xf] (%p2977_p12), %v2162_v45  ;;  %2165 = vst [vmem:[%s2141_s11 + $0x30] sm:$0xf] (%p2977_p12), %v2164_v53 }
 0x1e1 PF: > { %s17_s30 = sadd.s32 1, %s2843_s30   ;;  %s3605_s4 = sld [smem:[#allocation10_spill]] }
 0x1e2   : > { %p14_p7 = scmp.ge.s32.totalorder %s17_s30, 18   ;;  %s3606_s27 = sld [smem:[#allocation6_spill]] }
 0x1e3   : > { %s3607_s8 = sld [smem:[#allocation7_spill]]  ;;  %s3610_s21 = smov %s2807_s22 }
 0x1e4   : > { %s3608_s28 = sld [smem:[#allocation8_spill]]  ;;  %s3611_s22 = smov %s2975_s20 }
 0x1e5   : > { %s3609_s29 = sld [smem:[#allocation9_spill]]  ;;  %s3612_s23 = smov %s2815_s24 }
 0x1e6   : > { %s3613_s24 = smov %s2972_s19  ;;  %s3614_s25 = smov %s2823_s26 }
 0x1e7   : > { %s3615_s26 = smov %s3605_s4  ;;  %16 = sbr.rel (!%p14_p7) target bundleno = 9 (0x9), region = 217 }
 0x1e9   : > { %s3616_s4 = smov %s3607_s8 }

// kernel: patchgan_forward.9
= control target key start
LH: loop header
LB: loop body
LE: loop exit
PB: predicated region body
PF: predicated region fallthrough
CT: control target
= control target key end

     0   :  { %s1759_s18 = smov 0   ;;  %s1761_s19 = smov 0   ;;  %s1963_s0 = inlined_call_operand.vmem [shape: bf16[16,8192], index: 0, kind: input, shape index: {}]   ;;  %s1964_s1 = inlined_call_operand.vmem [shape: bf16[8192,128], index: 1, kind: input, shape index: {}]   ;;  %s1965_s2 = inlined_call_operand.vmem [shape: f32[1,8192], index: 2, kind: input, shape index: {}]   ;;  %s1966_s3 = inlined_call_operand.vmem [shape: f32[1,8192], index: 3, kind: input, shape index: {}]   ;;  %s1967_s4 = inlined_call_operand.vmem [shape: f32[1,128], index: 4, kind: input, shape index: {}]   ;;  %s1968_s5 = inlined_call_operand.vmem [shape: f32[16,128], index: 5, kind: output, shape index: {}]  }
   0x1   :  { %s1763_s20 = smov 0   ;;  %s1765_s21 = smov 0  }
   0x2   :  { %s1767_s22 = smov 0  }
   0x3 LB: > { %s27_s23 = sadd.s32 1, %s1722_s21  ;;  %p50_p1 = scmp.ne.s32.totalorder %s1714_s19, %s1710_s18  ;;  %s1726_s22 = sphi %s1767_s22, %s15_s22   ;;  %s1722_s21 = sphi %s1765_s21, %s1972_s21   ;;  %s1718_s20 = sphi %s1763_s20, %s1971_s20   ;;  %s1714_s19 = sphi %s1761_s19, %s1970_s19   ;;  %s1710_s18 = sphi %s1759_s18, %s1969_s18  }
   0x4   : > { %p28_p0 = scmp.ge.s32.totalorder %s27_s23, 8  ;;  %p51_p2 = scmp.eq.s32.totalorder %s1726_s22, 0 }
   0x5   : > { %s43_s25 = sadd.s32 1, %s1714_s19  ;;  %p1413_p5 = scmp.ge.s32.totalorder %s1726_s22, 8 }
   0x6   : > { %s1974_s23 = smov (%p28_p0, %s27_s23), 0  ;;  %p52_p3 = por %p51_p2, %p50_p1 }
   0x7   : > { %s39_s24 = ssub.s32 %s1722_s21, %s1974_s23  ;;  %216 = sbr.rel (%p1413_p5) target bundleno = 20 (0x14), region = 20 }
   0x8   : > { %p41_p4 = scmp.eq.s32.totalorder %s39_s24, 0 }
   0xa   : > { %s1794_s26 = scalar_select %p41_p4, %s1714_s19, %s43_s25  }
   0xc   : > { %219 = sbr.rel (!%p52_p3) target bundleno = 20 (0x14), region = 24  ;;  %s221_s27 = sand.u32 (%p52_p3), 1, %s1714_s19  }
   0xd   : > { %s1494_s28 = sshll.u32 (%p52_p3), %s1722_s21, 5  ;;  %s1414_s29 = sshll.u32 (%p52_p3), %s221_s27, 6 }
   0xe   : > { %s229_s7 = scalar_lea.vmem (%p52_p3), %s1963_s0, %s1494_s28  ;;  %s223_s8 = scalar_lea.vmem (%p52_p3), [#allocation3], %s1414_s29 }
   0xf   : > { %v242_v0 = vld [vmem:[%s229_s7] sm:$0xff] (%p52_p3)  ;;  %v244_v1 = vld [vmem:[%s229_s7 + $0x8] sm:$0xff] (%p52_p3)  ;;  %v246_v2 = vld [vmem:[%s229_s7 + $0x10] sm:$0xff] (%p52_p3) }
  0x10   : > { %243 = vst [vmem:[%s223_s8] sm:$0xff] (%p52_p3), %v242_v0  ;;  %245 = vst [vmem:[%s223_s8 + $0x8] sm:$0xff] (%p52_p3), %v244_v1  ;;  %v248_v3 = vld [vmem:[%s229_s7 + $0x18] sm:$0xff] (%p52_p3)  ;;  %v250_v4 = vld [vmem:[%s229_s7 + $0x100] sm:$0xff] (%p52_p3) }
  0x11   : > { %247 = vst [vmem:[%s223_s8 + $0x10] sm:$0xff] %v246_v2  ;;  %v252_v5 = vld [vmem:[%s229_s7 + $0x108] sm:$0xff]  ;;  %249 = vst [vmem:[%s223_s8 + $0x18] sm:$0xff] %v248_v3  ;;  %v254_v6 = vld [vmem:[%s229_s7 + $0x110] sm:$0xff] }
  0x12   : > { %251 = vst [vmem:[%s223_s8 + $0x20] sm:$0xff] %v250_v4  ;;  %253 = vst [vmem:[%s223_s8 + $0x28] sm:$0xff] %v252_v5  ;;  %v256_v7 = vld [vmem:[%s229_s7 + $0x118] sm:$0xff] }
  0x13   : > { %255 = vst [vmem:[%s223_s8 + $0x30] sm:$0xff] %v254_v6  ;;  %257 = vst [vmem:[%s223_s8 + $0x38] sm:$0xff] %v256_v7 }
  0x14 PF: > { %p1417_p6 = scmp.ge.s32.totalorder %s1726_s22, 1  ;;  %p290_p7 = scmp.lt.s32.totalorder %s1726_s22, 9 }
  0x16   : > { %p291_p8 = pnand %p1417_p6, %p290_p7 }
  0x17   : > { %s297_s9 = sand.u32 (!%p291_p8), 1, %s1710_s18   ;;  %s1419_s10 = sshll.u32 (!%p291_p8), %s1718_s20, 7 }
  0x18   : > { %294 = sbr.rel (%p291_p8) target bundleno = 323 (0x143), region = 59  ;;  %s1418_s11 = sshll.u32 (!%p291_p8), %s297_s9, 6 }
  0x19   : > { %p349_p9 = scmp.lt.s32.totalorder (!%p291_p8), %s1419_s10, 1023  ;;  %s1421_s12 = sshll.u32 (!%p291_p8), %s1718_s20, 3 }
  0x1a   : > { %p358_p10 = scmp.lt.s32.totalorder (!%p291_p8), %s1421_s12, 63  ;;  %s1822_s29 = scalar_lea.vmem (!%p291_p8), [#allocation3], %s1418_s11 }
  0x1b   : > { %p1423_p11 = scmp.ne.s32.totalorder (!%p291_p8), %s1718_s20, 0 }
  0x1d   : > { %s1976_s10 = smov (!%p349_p9, %s1419_s10), 1023  ;;  %s1978_s12 = smov (!%p358_p10, %s1421_s12), 63 }
  0x1e   : > { %s1420_s13 = sshll.u32 %s1976_s10, 2  ;;  %s360_s18 = scalar_lea.vmem %s1965_s2, %s1978_s12 }
  0x1f   : > { %s1810_s16 = scalar_lea.vmem %s1964_s1, %s1420_s13  ;;  %s365_s28 = scalar_lea.vmem %s1966_s3, %s1978_s12 }
  0x20   : > { %383 = sbr.rel (%p1423_p11) target bundleno = 39 (0x27), region = 67 }
  0x25   : > { %v1728_v8 = vmov 0.0  }
  0x26   : > { %384 = vst [vmem:[#allocation2] sm:$0xff] %v1728_v8  ;;  %385 = vst [vmem:[#allocation2 + $0x8] sm:$0xff] %v1728_v8 }
  0x27 PF: > { %v1624_v9 = vld [vmem:[%s1810_s16 + $0x78] sm:$0xff]   ;;  %v1628_v13 = vld [vmem:[%s1810_s16 + $0x70] sm:$0xff]   ;;  %v1632_v17 = vld [vmem:[%s1810_s16 + $0x68] sm:$0xff]   ;;  %v412_v32 = vlaneseq  ;;  %p1488_p12 = scmp.ne.s32.totalorder %s1718_s20, 7 }
  0x28   : > { %v1625_v10 = vld [vmem:[%s1810_s16 + $0xf8] sm:$0xff]   ;;  %1495 = vmatprep.subr.bf16.mxu0 %v1624_v9  ;;  %v1629_v14 = vld [vmem:[%s1810_s16 + $0xf0] sm:$0xff]   ;;  %v1633_v18 = vld [vmem:[%s1810_s16 + $0xe8] sm:$0xff]  }
  0x29   : > { %v1626_v11 = vld [vmem:[%s1810_s16 + $0x38] sm:$0xff]   ;;  %1517 = vmatprep.subr.bf16.mxu1 %v1625_v10  ;;  %v1630_v15 = vld [vmem:[%s1810_s16 + $0x30] sm:$0xff]   ;;  %v1634_v19 = vld [vmem:[%s1810_s16 + $0x28] sm:$0xff]   ;;  %v1852_v37 = vshrl.u32 %v412_v32, 7 }
  0x2a   : > { %v1627_v12 = vld [vmem:[%s1810_s16 + $0xb8] sm:$0xff]   ;;  %1496 = vmatpush3.bf16.msra.mxu0 %v1626_v11  ;;  %v1631_v16 = vld [vmem:[%s1810_s16 + $0xb0] sm:$0xff]   ;;  %v1635_v20 = vld [vmem:[%s1810_s16 + $0xa8] sm:$0xff]  }
  0x2b   : > { %1518 = vmatpush3.bf16.msra.mxu1 %v1627_v12  ;;  %1497 = vmatprep.subr.bf16.mxu0 %v1628_v13  ;;  %v1636_v21 = vld [vmem:[%s1810_s16 + $0x60] sm:$0xff]   ;;  %v1640_v25 = vld [vmem:[%s1810_s16 + $0x58] sm:$0xff]   ;;  %v1644_v29 = vld [vmem:[%s1810_s16 + $0x50] sm:$0xff]   ;;  %v418_v42 = vsub.s32 1, %v1852_v37  ;;  %v426_v44 = vsub.s32 3, %v1852_v37  ;;  %v414_v48 = vsub.s32 0, %v1852_v37 }
  0x2c   : > { %1519 = vmatprep.subr.bf16.mxu1 %v1629_v14  ;;  %v1637_v22 = vld [vmem:[%s1810_s16 + $0xe0] sm:$0xff]   ;;  %v1641_v26 = vld [vmem:[%s1810_s16 + $0xd8] sm:$0xff]   ;;  %v1645_v30 = vld [vmem:[%s1810_s16 + $0xd0] sm:$0xff]   ;;  %v422_v49 = vsub.s32 2, %v1852_v37 }
  0x2d   : > { %v1638_v23 = vld [vmem:[%s1810_s16 + $0x20] sm:$0xff]   ;;  %v1642_v27 = vld [vmem:[%s1810_s16 + $0x18] sm:$0xff]   ;;  %v1646_v31 = vld [vmem:[%s1810_s16 + $0x10] sm:$0xff]  }
  0x2e   : > { %1498 = vmatpush3.bf16.msra.mxu0 %v1630_v15  ;;  %v1639_v24 = vld [vmem:[%s1810_s16 + $0xa0] sm:$0xff]   ;;  %v1643_v28 = vld [vmem:[%s1810_s16 + $0x98] sm:$0xff]   ;;  %v1647_v33 = vld [vmem:[%s1810_s16 + $0x90] sm:$0xff]  }
  0x2f   : > { %1520 = vmatpush3.bf16.msra.mxu1 %v1631_v16  ;;  %1499 = vmatprep.subr.bf16.mxu0 %v1632_v17  ;;  %v1648_v34 = vld [vmem:[%s1810_s16 + $0x48] sm:$0xff]   ;;  %v1652_v39 = vld [vmem:[%s1810_s16 + $0x40] sm:$0xff]   ;;  %v386_v45 = vld [vmem:[%s1822_s29] sm:$0xff] }
  0x30   : > { %1521 = vmatprep.subr.bf16.mxu1 %v1633_v18  ;;  %v1649_v35 = vld [vmem:[%s1810_s16 + $0xc8] sm:$0xff]   ;;  %v1653_v40 = vld [vmem:[%s1810_s16 + $0xc0] sm:$0xff]   ;;  %v390_v46 = vld [vmem:[%s1822_s29 + $0x20] sm:$0xff]  ;;  %v394_v50 = vunpack.c.l.bf16 %v386_v45  ;;  %v395_v51 = vunpack.c.h.bf16 %v386_v45 }
  0x31   : > { %v1650_v36 = vld [vmem:[%s1810_s16 + $0x8] sm:$0xff]   ;;  %v1654_v41 = vld [vmem:[%s1810_s16] sm:$0xff]   ;;  %v402_v52 = vunpack.c.l.bf16 %v390_v46  ;;  %v403_v53 = vunpack.c.h.bf16 %v390_v46  ;;  %v387_v55 = vld [vmem:[%s1822_s29 + $0x8] sm:$0xff] }
  0x32   : > { %1500 = vmatpush3.bf16.msra.mxu0 %v1634_v19  ;;  %v1651_v38 = vld [vmem:[%s1810_s16 + $0x88] sm:$0xff]   ;;  %v1655_v43 = vld [vmem:[%s1810_s16 + $0x80] sm:$0xff]   ;;  %v391_v56 = vld [vmem:[%s1822_s29 + $0x28] sm:$0xff]  ;;  %v396_v59 = vunpack.c.l.bf16 %v387_v55  ;;  %v397_v60 = vunpack.c.h.bf16 %v387_v55 }
  0x33   : > { %1522 = vmatpush3.bf16.msra.mxu1 %v1635_v20  ;;  %1501 = vmatprep.subr.bf16.mxu0 %v1636_v21  ;;  %v1868_v47 = vld [vmem:[%s360_s18] sm:$0xff]  ;;  %v1656_v61 = vld [vmem:[%s1810_s16 + $0x178] sm:$0xff]   ;;  %v404_v62 = vunpack.c.l.bf16 %v391_v56  ;;  %v405_v63 = vunpack.c.h.bf16 %v391_v56  ;;  %v1661_v46 = vld [vmem:[%s1810_s16 + $0x1f0] sm:$0xff]  }
  0x34   : > { %1523 = vmatprep.subr.bf16.mxu1 %v1637_v22  ;;  %v1877_v54 = vld [vmem:[%s365_s28] sm:$0xff]  ;;  %v419_v57 = vrot.slane %v1868_v47, %v418_v42  ;;  %v427_v0 = vrot.slane %v1868_v47, %v426_v44  ;;  %v1657_v2 = vld [vmem:[%s1810_s16 + $0x1f8] sm:$0xff]   ;;  %v415_v5 = vrot.slane %v1868_v47, %v414_v48  ;;  %v423_v9 = vrot.slane %v1868_v47, %v422_v49  ;;  %v1667_v55 = vld [vmem:[%s1810_s16 + $0x1a8] sm:$0xff]  }
  0x35   : > { %v477_v58 = vrot.slane %v1877_v54, %v418_v42  ;;  %v485_v1 = vrot.slane %v1877_v54, %v426_v44  ;;  %v473_v6 = vrot.slane %v1877_v54, %v414_v48  ;;  %v481_v10 = vrot.slane %v1877_v54, %v422_v49  ;;  %v1659_v42 = vld [vmem:[%s1810_s16 + $0x1b8] sm:$0xff]   ;;  %v1660_v44 = vld [vmem:[%s1810_s16 + $0x170] sm:$0xff]   ;;  %v1668_v56 = vld [vmem:[%s1810_s16 + $0x160] sm:$0xff]  }
  0x36   : > { %1502 = vmatpush3.bf16.msra.mxu0 %v1638_v23  ;;  %v453_v3 = vmul.f32 %v419_v57, %v395_v51  ;;  %v461_v4 = vmul.f32 %v419_v57, %v403_v53  ;;  %v455_v7 = vmul.f32 %v427_v0, %v397_v60  ;;  %v463_v8 = vmul.f32 %v427_v0, %v405_v63  ;;  %v1662_v49 = vld [vmem:[%s1810_s16 + $0x130] sm:$0xff]   ;;  %v1664_v51 = vld [vmem:[%s1810_s16 + $0x168] sm:$0xff]   ;;  %v1669_v57 = vld [vmem:[%s1810_s16 + $0x1e0] sm:$0xff]  }
  0x37   : > { %1524 = vmatpush3.bf16.msra.mxu1 %v1639_v24  ;;  %1503 = vmatprep.subr.bf16.mxu0 %v1640_v25  ;;  %v452_v13 = vmul.f32 %v415_v5, %v394_v50  ;;  %v460_v14 = vmul.f32 %v415_v5, %v402_v52  ;;  %v454_v17 = vmul.f32 %v423_v9, %v396_v59  ;;  %v1663_v50 = vld [vmem:[%s1810_s16 + $0x1b0] sm:$0xff]   ;;  %v1665_v52 = vld [vmem:[%s1810_s16 + $0x1e8] sm:$0xff]   ;;  %v1671_v59 = vld [vmem:[%s1810_s16 + $0x1a0] sm:$0xff]   ;;  %v434_v63 = vsub.s32 5, %v1852_v37 }
  0x38   : > { %1525 = vmatprep.subr.bf16.mxu1 %v1641_v26  ;;  %v511_v11 = vadd.f32 %v477_v58, %v453_v3  ;;  %v519_v12 = vadd.f32 %v477_v58, %v461_v4  ;;  %v513_v15 = vadd.f32 %v485_v1, %v455_v7  ;;  %v521_v16 = vadd.f32 %v485_v1, %v463_v8  ;;  %v1666_v53 = vld [vmem:[%s1810_s16 + $0x128] sm:$0xff]   ;;  %v1670_v58 = vld [vmem:[%s1810_s16 + $0x120] sm:$0xff]   ;;  %v1672_v60 = vld [vmem:[%s1810_s16 + $0x158] sm:$0xff]  }
  0x39   : > { %v462_v18 = vmul.f32 %v423_v9, %v404_v62  ;;  %v510_v25 = vadd.f32 %v473_v6, %v452_v13  ;;  %v518_v26 = vadd.f32 %v473_v6, %v460_v14  ;;  %v1674_v62 = vld [vmem:[%s1810_s16 + $0x118] sm:$0xff]   ;;  %v442_v1 = vsub.s32 7, %v1852_v37  ;;  %v1677_v4 = vld [vmem:[%s1810_s16 + $0x1d0] sm:$0xff]   ;;  %v1680_v8 = vld [vmem:[%s1810_s16 + $0x148] sm:$0xff]  }
  0x3a   : > { %1504 = vmatpush3.bf16.msra.mxu0 %v1642_v27  ;;  %vm527_vm0 = vcmp.gt.f32.partialorder %v511_v11, 0.0  ;;  %vm535_vm1 = vcmp.gt.f32.partialorder %v519_v12, 0.0  ;;  %v543_v19 = vmul.f32 0.2, %v511_v11  ;;  %v551_v20 = vmul.f32 0.2, %v519_v12 }
  0x3b   : > { %1526 = vmatpush3.bf16.msra.mxu1 %v1643_v28  ;;  %1505 = vmatprep.subr.bf16.mxu0 %v1644_v29  ;;  %vm529_vm2 = vcmp.gt.f32.partialorder %v513_v15, 0.0  ;;  %vm537_vm3 = vcmp.gt.f32.partialorder %v521_v16, 0.0  ;;  %v545_v21 = vmul.f32 0.2, %v513_v15  ;;  %v553_v22 = vmul.f32 0.2, %v521_v16 }
  0x3c   : > { %1527 = vmatprep.subr.bf16.mxu1 %v1645_v30  ;;  %v559_v23 = vsel %vm527_vm0, %v511_v11, %v543_v19  ;;  %v567_v24 = vsel %vm535_vm1, %v519_v12, %v551_v20  ;;  %v512_v30 = vadd.f32 %v481_v10, %v454_v17  ;;  %vm526_vm4 = vcmp.gt.f32.partialorder %v510_v25, 0.0  ;;  %v1675_v0 = vld [vmem:[%s1810_s16 + $0x198] sm:$0xff]   ;;  %v1678_v6 = vld [vmem:[%s1810_s16 + $0x110] sm:$0xff]   ;;  %v1681_v11 = vld [vmem:[%s1810_s16 + $0x1c8] sm:$0xff]  }
  0x3d   : > { %v575_v27 = vpack.c.bf16 %v567_v24, %v559_v23  ;;  %v561_v28 = vsel %vm529_vm2, %v513_v15, %v545_v21  ;;  %v569_v29 = vsel %vm537_vm3, %v521_v16, %v553_v22  ;;  %vm534_vm5 = vcmp.gt.f32.partialorder %v518_v26, 0.0  ;;  %v1679_v7 = vld [vmem:[%s1810_s16 + $0x190] sm:$0xff]   ;;  %v388_v12 = vld [vmem:[%s1822_s29 + $0x10] sm:$0xff]  ;;  %v389_v19 = vld [vmem:[%s1822_s29 + $0x18] sm:$0xff] }
  0x3e   : > { %1506 = vmatpush3.bf16.msra.mxu0 %v1646_v31  ;;  %v577_v31 = vpack.c.bf16 %v569_v29, %v561_v28  ;;  %v542_v32 = vmul.f32 0.2, %v510_v25  ;;  %vm528_vm6 = vcmp.gt.f32.partialorder %v512_v30, 0.0  ;;  %v430_v3 = vsub.s32 4, %v1852_v37  ;;  %v392_v16 = vld [vmem:[%s1822_s29 + $0x30] sm:$0xff]  ;;  %v393_v20 = vld [vmem:[%s1822_s29 + $0x38] sm:$0xff] }
  0x3f   : > { %1528 = vmatpush3.bf16.msra.mxu1 %v1647_v33  ;;  %1507 = vmatprep.subr.bf16.mxu0 %v1648_v34  ;;  %v550_v33 = vmul.f32 0.2, %v518_v26  ;;  %v520_v34 = vadd.f32 %v481_v10, %v462_v18  ;;  %v438_v5 = vsub.s32 6, %v1852_v37  ;;  %v435_v9 = vrot.slane %v1868_v47, %v434_v63  ;;  %v1682_v23 = vld [vmem:[%s1810_s16 + $0x108] sm:$0xff]  }
  0x40   : > { %1529 = vmatprep.subr.bf16.mxu1 %v1649_v35  ;;  %1128 = vmatprep.mubr.bf16.mxu0 %v575_v27  ;;  %v544_v35 = vmul.f32 0.2, %v512_v30  ;;  %v431_v10 = vrot.slane %v1868_v47, %v430_v3  ;;  %v493_v13 = vrot.slane %v1877_v54, %v434_v63  ;;  %v443_v37 = vrot.slane %v1868_v47, %v442_v1 }
  0x41   : > { %1169 = vmatprep.mubr.bf16.mxu1 %v577_v31  ;;  %vm536_vm7 = vcmp.gt.f32.partialorder %v520_v34, 0.0  ;;  %v501_v14 = vrot.slane %v1877_v54, %v442_v1  ;;  %v439_v15 = vrot.slane %v1868_v47, %v438_v5  ;;  %v398_v17 = vunpack.c.l.bf16 %v388_v12  ;;  %v1684_v47 = vld [vmem:[%s1810_s16 + $0x140] sm:$0xff]  }
  0x42   : > { %1508 = vmatpush3.bf16.msra.mxu0 %v1650_v36  ;;  %v1658_v36 = vld [vmem:[%s1810_s16 + $0x138] sm:$0xff]   ;;  %v399_v18 = vunpack.c.h.bf16 %v388_v12  ;;  %v489_v21 = vrot.slane %v1877_v54, %v430_v3  ;;  %v497_v22 = vrot.slane %v1877_v54, %v438_v5  ;;  %v406_v24 = vunpack.c.l.bf16 %v392_v16 }
  0x43   : > { %1530 = vmatpush3.bf16.msra.mxu1 %v1651_v38  ;;  %1509 = vmatprep.subr.bf16.mxu0 %v1652_v39  ;;  %v558_v38 = vsel %vm526_vm4, %v510_v25, %v542_v32  ;;  %v566_v39 = vsel %vm534_vm5, %v518_v26, %v550_v33  ;;  %v407_v25 = vunpack.c.h.bf16 %v392_v16  ;;  %v400_v26 = vunpack.c.l.bf16 %v389_v19  ;;  %v1683_v32 = vld [vmem:[%s1810_s16 + $0x188] sm:$0xff]  }
  0x44   : > { %1531 = vmatprep.subr.bf16.mxu1 %v1653_v40  ;;  %v552_v40 = vmul.f32 0.2, %v520_v34  ;;  %v401_v27 = vunpack.c.h.bf16 %v389_v19  ;;  %v457_v28 = vmul.f32 %v435_v9, %v399_v18  ;;  %v408_v29 = vunpack.c.l.bf16 %v393_v20 }
  0x45   : > { %v456_v31 = vmul.f32 %v431_v10, %v398_v17  ;;  %v465_v33 = vmul.f32 %v435_v9, %v407_v25  ;;  %v464_v54 = vmul.f32 %v431_v10, %v406_v24 }
  0x46   : > { %1510 = vmatpush3.bf16.msra.mxu0 %v1654_v41  ;;  %v560_v41 = vsel %vm528_vm6, %v512_v30, %v544_v35  ;;  %v568_v45 = vsel %vm536_vm7, %v520_v34, %v552_v40  ;;  %v409_v30 = vunpack.c.h.bf16 %v393_v20  ;;  %v459_v34 = vmul.f32 %v443_v37, %v401_v27 }
  0x47   : > { %1532 = vmatpush3.bf16.msra.mxu1 %v1655_v43  ;;  %1539 = vmatprep.subr.bf16.mxu0 %v1656_v61  ;;  %v574_v43 = vpack.c.bf16 %v566_v39, %v558_v38  ;;  %v576_v48 = vpack.c.bf16 %v568_v45, %v560_v41  ;;  %v1673_v61 = vld [vmem:[%s1810_s16 + $0x1d8] sm:$0xff]   ;;  %v458_v35 = vmul.f32 %v439_v15, %v400_v26 }
  0x48   : > { %1561 = vmatprep.subr.bf16.mxu1 %v1657_v2  ;;  %v1676_v2 = vld [vmem:[%s1810_s16 + $0x150] sm:$0xff]   ;;  %v515_v38 = vadd.f32 %v493_v13, %v457_v28  ;;  %v467_v39 = vmul.f32 %v443_v37, %v409_v30  ;;  %v514_v40 = vadd.f32 %v489_v21, %v456_v31  ;;  %v466_v41 = vmul.f32 %v439_v15, %v408_v29  ;;  %v582_v29 = vld [vmem:[#allocation2] sm:$0xff] }
  0x49   : > { %1129 = vmatmul.mubr.bf16.vlgmr.msra.gmra.mxu0 %v574_v43  ;;  %v523_v43 = vadd.f32 %v493_v13, %v465_v33  ;;  %v522_v45 = vadd.f32 %v489_v21, %v464_v54 }
  0x4a   : > { %1540 = vmatpush3.bf16.msra.mxu0 %v1658_v36  ;;  %1170 = vmatmul.mubr.bf16.vlgmr.msra.gmra.mxu1 %v576_v48  ;;  %v1685_v36 = vld [vmem:[%s1810_s16 + $0x1c0] sm:$0xff]   ;;  %vm531_vm8 = vcmp.gt.f32.partialorder %v515_v38, 0.0  ;;  %vm530_vm9 = vcmp.gt.f32.partialorder %v514_v40, 0.0 }
  0x4b   : > { %1541 = vmatprep.subr.bf16.mxu0 %v1660_v44  ;;  %1562 = vmatpush3.bf16.msra.mxu1 %v1659_v42  ;;  %v1686_v42 = vld [vmem:[%s1810_s16 + $0x100] sm:$0xff]   ;;  %v517_v44 = vadd.f32 %v501_v14, %v459_v34  ;;  %vm539_vm10 = vcmp.gt.f32.partialorder %v523_v43, 0.0  ;;  %vm538_vm13 = vcmp.gt.f32.partialorder %v522_v45, 0.0 }
  0x4c   : > { %1563 = vmatprep.subr.bf16.mxu1 %v1661_v46  ;;  %v516_v46 = vadd.f32 %v497_v22, %v458_v35  ;;  %v1687_v48 = vld [vmem:[%s1810_s16 + $0x180] sm:$0xff]  }
  0x4d   : > { %vm533_vm11 = vcmp.gt.f32.partialorder %v517_v44, 0.0 }
  0x4e   : > { %1542 = vmatpush3.bf16.msra.mxu0 %v1662_v49  ;;  %v547_v49 = vmul.f32 0.2, %v515_v38  ;;  %vm532_vm14 = vcmp.gt.f32.partialorder %v516_v46, 0.0 }
  0x4f   : > { %1543 = vmatprep.subr.bf16.mxu0 %v1664_v51  ;;  %1564 = vmatpush3.bf16.msra.mxu1 %v1663_v50  ;;  %v525_v50 = vadd.f32 %v501_v14, %v467_v39  ;;  %v555_v51 = vmul.f32 0.2, %v523_v43 }
  0x50   : > { %1565 = vmatprep.subr.bf16.mxu1 %v1665_v52  ;;  %v549_v52 = vmul.f32 0.2, %v517_v44 }
  0x51   : > { %vm541_vm12 = vcmp.gt.f32.partialorder %v525_v50, 0.0 }
  0x52   : > { %1544 = vmatpush3.bf16.msra.mxu0 %v1666_v53  ;;  %v563_v53 = vsel %vm531_vm8, %v515_v38, %v547_v49 }
  0x53   : > { %1545 = vmatprep.subr.bf16.mxu0 %v1668_v56  ;;  %1566 = vmatpush3.bf16.msra.mxu1 %v1667_v55  ;;  %v557_v55 = vmul.f32 0.2, %v525_v50  ;;  %v571_v56 = vsel %vm539_vm10, %v523_v43, %v555_v51 }
  0x54   : > { %1567 = vmatprep.subr.bf16.mxu1 %v1669_v57  ;;  %v565_v57 = vsel %vm533_vm11, %v517_v44, %v549_v52 }
  0x56   : > { %1546 = vmatpush3.bf16.msra.mxu0 %v1670_v58  ;;  %v546_v58 = vmul.f32 0.2, %v514_v40 }
  0x57   : > { %1547 = vmatprep.subr.bf16.mxu0 %v1672_v60  ;;  %1568 = vmatpush3.bf16.msra.mxu1 %v1671_v59  ;;  %v554_v59 = vmul.f32 0.2, %v522_v45  ;;  %v579_v60 = vpack.c.bf16 %v571_v56, %v563_v53 }
  0x58   : > { %1569 = vmatprep.subr.bf16.mxu1 %v1673_v61  ;;  %v573_v61 = vsel %vm541_vm12, %v525_v50, %v557_v55 }
  0x59   : > { %v581_v63 = vpack.c.bf16 %v573_v61, %v565_v57  ;;  %v570_v1 = vsel %vm538_vm13, %v522_v45, %v554_v59  ;;  %1210 = vmatprep.mubr.bf16.mxu0 %v579_v60 }
  0x5a   : > { %1548 = vmatpush3.bf16.msra.mxu0 %v1674_v62  ;;  %v524_v62 = vadd.f32 %v497_v22, %v466_v41 }
  0x5b   : > { %1549 = vmatprep.subr.bf16.mxu0 %v1676_v2  ;;  %1570 = vmatpush3.bf16.msra.mxu1 %v1675_v0  ;;  %v562_v0 = vsel %vm530_vm9, %v514_v40, %v546_v58  ;;  %v548_v2 = vmul.f32 0.2, %v516_v46 }
  0x5c   : > { %1571 = vmatprep.subr.bf16.mxu1 %v1677_v4  ;;  %v578_v3 = vpack.c.bf16 %v570_v1, %v562_v0  ;;  %vm540_vm15 = vcmp.gt.f32.partialorder %v524_v62, 0.0  ;;  %v556_v4 = vmul.f32 0.2, %v524_v62  ;;  %1251 = vmatprep.mubr.bf16.mxu1 %v581_v63 }
  0x5d   : > { %v564_v5 = vsel %vm532_vm14, %v516_v46, %v548_v2 }
  0x5e   : > { %1550 = vmatpush3.bf16.msra.mxu0 %v1678_v6  ;;  %v572_v6 = vsel %vm540_vm15, %v524_v62, %v556_v4 }
  0x5f   : > { %1551 = vmatprep.subr.bf16.mxu0 %v1680_v8  ;;  %1572 = vmatpush3.bf16.msra.mxu1 %v1679_v7  ;;  %v580_v7 = vpack.c.bf16 %v572_v6, %v564_v5 }
  0x60   : > { %1573 = vmatprep.subr.bf16.mxu1 %v1681_v11 }
  0x62   : > { %1552 = vmatpush3.bf16.msra.mxu0 %v1682_v23 }
  0x63   : > { %1553 = vmatprep.subr.bf16.mxu0 %v1684_v47  ;;  %1574 = vmatpush3.bf16.msra.mxu1 %v1683_v32 }
  0x64   : > { %1575 = vmatprep.subr.bf16.mxu1 %v1685_v36  ;;  %v583_v36 = vld [vmem:[#allocation2 + $0x8] sm:$0xff] }
  0x66   : > { %1554 = vmatpush3.bf16.msra.mxu0 %v1686_v42 }
  0x67   : > { %1576 = vmatpush3.bf16.msra.mxu1 %v1687_v48 }
  0x69   : > { %1211 = vmatmul.mubr.bf16.vlgmr.msra.gmra.mxu0 %v578_v3 }
  0x6a   : > { %1252 = vmatmul.mubr.bf16.vlgmr.msra.gmra.mxu1 %v580_v7 }
 0x109   : > { %v1511_v8 = vpop.f32.mrf.mxu0 }
 0x10a   : > { %v1533_v9 = vpop.f32.mrf.mxu1 }
 0x10b   : > { %v1512_v10 = vpop.f32.mrf.mxu0 }
 0x10c   : > { %v1534_v11 = vpop.f32.mrf.mxu1  ;;  %v1513_v14 = vadd.f32 %v1512_v10, %v1511_v8 }
 0x10d   : > { %v1514_v12 = vpop.f32.mrf.mxu0  ;;  %v1535_v15 = vadd.f32 %v1534_v11, %v1533_v9 }
 0x10e   : > { %v1536_v13 = vpop.f32.mrf.mxu1 }
 0x10f   : > { %v1515_v37 = vpop.f32.mrf.mxu0  ;;  %v1172_v19 = vadd.f32 %v1535_v15, %v1513_v14 }
 0x110   : > { %v1537_v16 = vpop.f32.mrf.mxu1  ;;  %v1516_v20 = vadd.f32 %v1515_v37, %v1514_v12 }
 0x111   : > { %v1538_v21 = vadd.f32 %v1537_v16, %v1536_v13 }
 0x113   : > { %v1175_v28 = vadd.f32 %v1538_v21, %v1516_v20 }
 0x129   : > { %v1555_v17 = vpop.f32.mrf.mxu0 }
 0x12a   : > { %v1577_v22 = vpop.f32.mrf.mxu1 }
 0x12b   : > { %v1556_v18 = vpop.f32.mrf.mxu0 }
 0x12c   : > { %v1557_v23 = vadd.f32 %v1556_v18, %v1555_v17  ;;  %v1578_v26 = vpop.f32.mrf.mxu1 }
 0x12d   : > { %v1558_v24 = vpop.f32.mrf.mxu0  ;;  %v1579_v27 = vadd.f32 %v1578_v26, %v1577_v22 }
 0x12e   : > { %v1213_v25 = vadd.f32 %v1557_v23, %v1172_v19  ;;  %v1580_v30 = vpop.f32.mrf.mxu1 }
 0x12f   : > { %v1559_v47 = vpop.f32.mrf.mxu0 }
 0x130   : > { %v1560_v31 = vadd.f32 %v1559_v47, %v1558_v24  ;;  %v1254_v32 = vadd.f32 %v1579_v27, %v1213_v25  ;;  %v1581_v34 = vpop.f32.mrf.mxu1 }
 0x131   : > { %v1582_v35 = vadd.f32 %v1581_v34, %v1580_v30 }
 0x132   : > { %v1216_v33 = vadd.f32 %v1560_v31, %v1175_v28  ;;  %v1260_v54 = vadd.f32 %v1254_v32, %v582_v29 }
 0x134   : > { %1262 = vst [vmem:[#allocation2] sm:$0xff] %v1260_v54  ;;  %v1257_v38 = vadd.f32 %v1582_v35, %v1216_v33  ;;  %1267 = sbr.rel (%p1488_p12) target bundleno = 323 (0x143), region = 71 }
 0x136   : > { %v1261_v39 = vadd.f32 %v1257_v38, %v583_v36 }
 0x138   : > { %1263 = vst [vmem:[#allocation2 + $0x8] sm:$0xff] %v1261_v39 }
 0x139   : > { %v1489_v41 = vld [vmem:[%s1967_s4] ss:$0 sm:$0xff] }
 0x13b   : > { %v1268_v40 = vld [vmem:[#allocation2] sm:$0xff] }
 0x13c   : > { %v1277_v43 = vadd.f32 %v1489_v41, %v1268_v40 }
 0x13e   : > { %1279 = vst [vmem:[%s1968_s5] sm:$0xff] %v1277_v43 }
 0x13f   : > { %v1269_v42 = vld [vmem:[#allocation2 + $0x8] sm:$0xff] }
 0x140   : > { %v1278_v44 = vadd.f32 %v1489_v41, %v1269_v42 }
 0x142   : > { %1280 = vst [vmem:[%s1968_s5 + $0x8] sm:$0xff] %v1278_v44 }
 0x143 PF: > { %s15_s22 = sadd.s32 1, %s1726_s22   ;;  %s1969_s18 = smov %s1714_s19 }
 0x144   : > { %p12_p13 = scmp.ge.s32.totalorder %s15_s22, 10   ;;  %s1970_s19 = smov %s1794_s26 }
 0x145   : > { %s1971_s20 = smov %s1722_s21  ;;  %s1972_s21 = smov %s1974_s23 }
 0x146   :  { %14 = sbr.rel (!%p12_p13) target bundleno = 3 (0x3), region = 118 }

</bundles_post_ra>
